<compile_context>
chip_gen: v7x
topology: tpu7x:2x2x1
jax: 0.10.0
libtpu: 0.0.40
codegen_flags: <defaults>
</compile_context>

<pallas_src>
import math

import jax
import jax.numpy as jnp
from jax.experimental import pallas as pl
from jax.experimental.pallas import tpu as pltpu

NHEAD = 4
LN_EPS = 1e-5


def _make_fused_kernel(B, S, M, D, H, has_mask):
    """Builds the fused decoder-stack kernel (one grid step == one layer)."""
    Dh = D // H
    scale = 1.0 / math.sqrt(Dh)

    def kernel(*refs):
        i = 0
        x_in_ref = refs[i]; i += 1          # (B*S, D)  f32
        mem_ref = refs[i]; i += 1           # (B*M, D)  f32
        mask_ref = None
        if has_mask:
            mask_ref = refs[i]; i += 1      # (S, S)    f32 additive mask
        (sa_wqkv, sa_bqkv, sa_wo, sa_bo,
         ca_wq, ca_bq, ca_wkv, ca_bkv, ca_wo, ca_bo,
         w1, b1, w2, b2,
         ln1w, ln1b, ln2w, ln2b, ln3w, ln3b,
         lin_w, lin_b) = refs[i:i + 22]
        i += 22
        out_ref = refs[i]                   # (B*S, NO_pad)
        x_scr = refs[i + 1]                 # VMEM scratch (B*S, D) f32

        layer = pl.program_id(0)
        last = pl.num_programs(0) - 1

        @pl.when(layer == 0)
        def _():
            x_scr[...] = x_in_ref[...].astype(jnp.float32)

        x = x_scr[...]                                      # (B*S, D) f32
        mem = mem_ref[...].astype(jnp.float32)              # (B*M, D) f32

        def mm(a, w_ref):
            # Weights are stored bf16; accumulate in f32 on the MXU.
            return jnp.dot(a.astype(w_ref.dtype), w_ref[...],
                           preferred_element_type=jnp.float32)

        def layer_norm(v, w_ref, b_ref):
            mu = jnp.mean(v, axis=-1, keepdims=True)
            var = jnp.mean((v - mu) ** 2, axis=-1, keepdims=True)
            return (v - mu) * jax.lax.rsqrt(var + LN_EPS) * w_ref[...] + b_ref[...]

        def mha(q2, k2, v2, Sq, Sk, wo_ref, bo_ref, mask):
            # q2:(B*Sq,D)  k2/v2:(B*Sk,D)  -> (B*Sq, D)
            q3 = q2.reshape(B, Sq, D)
            k3 = k2.reshape(B, Sk, D)
            v3 = v2.reshape(B, Sk, D)
            heads = []
            for h in range(H):              # static unroll over heads only
                sl = slice(h * Dh, (h + 1) * Dh)
                qh = q3[:, :, sl].astype(jnp.bfloat16)
                kh = k3[:, :, sl].astype(jnp.bfloat16)
                vh = v3[:, :, sl].astype(jnp.bfloat16)
                s = jnp.einsum('bqd,bkd->bqk', qh, kh,
                               preferred_element_type=jnp.float32) * scale
                if mask is not None:
                    s = s + mask
                s = s - jnp.max(s, axis=-1, keepdims=True)
                p = jnp.exp(s)
                p = p * pl.reciprocal(jnp.sum(p, axis=-1, keepdims=True),
                                      approx=True)
                heads.append(jnp.einsum('bqk,bkd->bqd', p.astype(jnp.bfloat16),
                                        vh, preferred_element_type=jnp.float32))
            o = jnp.concatenate(heads, axis=-1).reshape(B * Sq, D)
            return mm(o, wo_ref) + bo_ref[...]

        # ---- self-attention block: x = norm1(x + self_attn(x, x, x, mask)) ----
        qkv = mm(x, sa_wqkv) + sa_bqkv[...]                 # (B*S, 3D)
        sa = mha(qkv[:, 0:D], qkv[:, D:2 * D], qkv[:, 2 * D:3 * D],
                 S, S, sa_wo, sa_bo,
                 mask_ref[...] if mask_ref is not None else None)
        x = layer_norm(x + sa, ln1w, ln1b)

        # ---- cross-attention block: x = norm2(x + mha(x, memory, memory)) ----
        q = mm(x, ca_wq) + ca_bq[...]                       # (B*S, D)
        kv = mm(mem, ca_wkv) + ca_bkv[...]                  # (B*M, 2D)
        ca = mha(q, kv[:, 0:D], kv[:, D:2 * D], S, M, ca_wo, ca_bo, None)
        x = layer_norm(x + ca, ln2w, ln2b)

        # ---- feed-forward block: x = norm3(x + linear2(relu(linear1(x)))) ----
        hfc = jnp.maximum(mm(x, w1) + b1[...], 0.0)
        x = layer_norm(x + mm(hfc, w2) + b2[...], ln3w, ln3b)

        x_scr[...] = x

        # ---- final classifier folded into the last grid step ----
        @pl.when(layer == last)
        def _():
            out_ref[...] = (mm(x, lin_w) + lin_b[...]).astype(out_ref.dtype)

    return kernel


def sinusoidal_pe(seq_length, d_model):
    # assumes even d_model (true for d_model=32)
    pos = jnp.arange(seq_length, dtype=jnp.float32)[:, None]
    div = jnp.exp(jnp.arange(0, d_model, 2, dtype=jnp.float32)
                  * (-math.log(10000.0) / d_model))
    pe = jnp.zeros((seq_length, d_model), jnp.float32)
    pe = pe.at[:, 0::2].set(jnp.sin(pos * div))
    pe = pe.at[:, 1::2].set(jnp.cos(pos * div))
    return pe


_WEIGHT_ORDER = ('sa_wqkv', 'sa_bqkv', 'sa_wo', 'sa_bo',
                 'ca_wq', 'ca_bq', 'ca_wkv', 'ca_bkv', 'ca_wo', 'ca_bo',
                 'w1', 'b1', 'w2', 'b2',
                 'ln1w', 'ln1b', 'ln2w', 'ln2b', 'ln3w', 'ln3b')
_MXU_WEIGHTS = {'sa_wqkv', 'sa_wo', 'ca_wq', 'ca_wkv', 'ca_wo', 'w1', 'w2'}


def init_params(key, *, d_model, num_layers, num_output, embedding_dim,
                seq_length, dff):
    D = d_model
    keys = iter(jax.random.split(key, 8 + 20 * num_layers))

    def w(shape, scale=0.02, dtype=jnp.float32):
        return (jax.random.normal(next(keys), shape, jnp.float32) * scale).astype(dtype)

    layer_list = []
    for _ in range(num_layers):
        lp = dict(
            # self_attn in_proj (wq|wk|wv transposed, fused) and out_proj
            sa_wqkv=w((D, 3 * D)), sa_bqkv=w((1, 3 * D)),
            sa_wo=w((D, D)), sa_bo=w((1, D)),
            # multihead (cross) attn: q proj + fused k|v proj + out_proj
            ca_wq=w((D, D)), ca_bq=w((1, D)),
            ca_wkv=w((D, 2 * D)), ca_bkv=w((1, 2 * D)),
            ca_wo=w((D, D)), ca_bo=w((1, D)),
            # FFN (weights pre-transposed: (in, out))
            w1=w((D, dff)), b1=w((1, dff)),
            w2=w((dff, D)), b2=w((1, D)),
            # LayerNorms
            ln1w=jnp.ones((1, D), jnp.float32), ln1b=jnp.zeros((1, D), jnp.float32),
            ln2w=jnp.ones((1, D), jnp.float32), ln2b=jnp.zeros((1, D), jnp.float32),
            ln3w=jnp.ones((1, D), jnp.float32), ln3b=jnp.zeros((1, D), jnp.float32),
        )
        layer_list.append(lp)

    params = {}
    for name in _WEIGHT_ORDER:
        arr = jnp.stack([lp[name] for lp in layer_list], axis=0)   # (L, ...)
        if name in _MXU_WEIGHTS:
            arr = arr.astype(jnp.bfloat16)     # bf16 MXU operands, halve HBM bytes
        params[name] = arr

    # Final classifier, padded to a lane-dense (multiple of 128) output width.
    no_pad = ((num_output + 127) // 128) * 128
    lin_w = w((embedding_dim, num_output))
    lin_b = w((1, num_output))
    params['lin_w'] = (jnp.zeros((embedding_dim, no_pad), jnp.float32)
                       .at[:, :num_output].set(lin_w)).astype(jnp.bfloat16)
    params['lin_b'] = (jnp.zeros((1, no_pad), jnp.float32)
                       .at[:, :num_output].set(lin_b))
    params['emb_table'] = w((num_output, embedding_dim), 0.1)
    params['num_layers'] = num_layers
    params['num_output'] = num_output
    return params


def torch_decoder_wrapper_forward(text, memory, params, *, seq_length, d_model,
                                  mask=None):
    """text: (B, S) int32 token ids, memory: (B, M, d_model) float32."""
    B, S = text.shape
    Bm, M, Dm = memory.shape
    D = d_model
    assert Bm == B and Dm == D and D % NHEAD == 0
    L = params['num_layers']
    NO = params['num_output']
    no_pad = params['lin_w'].shape[-1]

    # glue: embedding lookup + sinusoidal positional encoding (dropout = identity)
    emb = jnp.take(params['emb_table'], text, axis=0)               # (B, S, E)
    x = (emb + sinusoidal_pe(seq_length, D)[None, :S, :]).astype(jnp.float32)
    x2 = x.reshape(B * S, D)
    mem2 = memory.astype(jnp.float32).reshape(B * M, D)

    has_mask = mask is not None
    kernel = _make_fused_kernel(B, S, M, D, NHEAD, has_mask)

    def full_spec(shape):
        return pl.BlockSpec(shape, lambda l, _n=len(shape): (0,) * _n)

    def per_layer_spec(shape_wo_layer):
        n = len(shape_wo_layer)
        return pl.BlockSpec((None,) + tuple(shape_wo_layer),
                            lambda l, _n=n: (l,) + (0,) * _n)

    in_arrays = [x2, mem2]
    in_specs = [full_spec((B * S, D)), full_spec((B * M, D))]
    if has_mask:
        in_arrays.append(mask.astype(jnp.float32))
        in_specs.append(full_spec((S, S)))
    for name in _WEIGHT_ORDER:
        arr = params[name]
        in_arrays.append(arr)
        in_specs.append(per_layer_spec(arr.shape[1:]))
    in_arrays += [params['lin_w'], params['lin_b']]
    in_specs += [full_spec(params['lin_w'].shape), full_spec(params['lin_b'].shape)]

    out = pl.pallas_call(
        kernel,
        out_shape=jax.ShapeDtypeStruct((B * S, no_pad), jnp.float32),
        grid=(L,),
        in_specs=in_specs,
        out_specs=full_spec((B * S, no_pad)),
        scratch_shapes=[pltpu.VMEM((B * S, D), jnp.float32)],
        compiler_params=pltpu.CompilerParams(
            dimension_semantics=("arbitrary",),
            vmem_limit_bytes=32 * 1024 * 1024),
    )(*in_arrays)

    return out.reshape(B, S, no_pad)[:, :, :NO]


if __name__ == "__main__":
    D_MODEL = 32          # d_model == embedding_dim (required for decoder to typecheck)
    EMB_DIM = 32
    NUM_LAYERS = 2
    NUM_OUTPUT = 16
    SEQ_LEN = 8
    MEM_LEN = 8
    BATCH = 2
    DFF = 2048            # nn.TransformerDecoderLayer default dim_feedforward

    key = jax.random.PRNGKey(0)
    kp, kt, km = jax.random.split(key, 3)
    params = init_params(kp, d_model=D_MODEL, num_layers=NUM_LAYERS,
                         num_output=NUM_OUTPUT, embedding_dim=EMB_DIM,
                         seq_length=SEQ_LEN, dff=DFF)

    text = jax.random.randint(kt, (BATCH, SEQ_LEN), 0, NUM_OUTPUT, dtype=jnp.int32)
    memory = jax.random.normal(km, (BATCH, MEM_LEN, D_MODEL), jnp.float32)

    out = torch_decoder_wrapper_forward(text, memory, params,
                                        seq_length=SEQ_LEN, d_model=D_MODEL, mask=None)
    out = jax.block_until_ready(out)
    assert out.shape == (BATCH, SEQ_LEN, NUM_OUTPUT)
    assert bool(jnp.all(jnp.isfinite(out)))
    print("KERNEL_OK")
</pallas_src>

<mosaic_0001>
module attributes {stable_mosaic.version = 11 : i64} {
  func.func @kernel(%arg0: i32, %arg1: memref<16x32xf32, #tpu.memory_space<vmem>>, %arg2: memref<16x32xf32, #tpu.memory_space<vmem>>, %arg3: memref<1x32x96xbf16, #tpu.memory_space<vmem>>, %arg4: memref<1x1x96xf32, #tpu.memory_space<vmem>>, %arg5: memref<1x32x32xbf16, #tpu.memory_space<vmem>>, %arg6: memref<1x1x32xf32, #tpu.memory_space<vmem>>, %arg7: memref<1x32x32xbf16, #tpu.memory_space<vmem>>, %arg8: memref<1x1x32xf32, #tpu.memory_space<vmem>>, %arg9: memref<1x32x64xbf16, #tpu.memory_space<vmem>>, %arg10: memref<1x1x64xf32, #tpu.memory_space<vmem>>, %arg11: memref<1x32x32xbf16, #tpu.memory_space<vmem>>, %arg12: memref<1x1x32xf32, #tpu.memory_space<vmem>>, %arg13: memref<1x32x2048xbf16, #tpu.memory_space<vmem>>, %arg14: memref<1x1x2048xf32, #tpu.memory_space<vmem>>, %arg15: memref<1x2048x32xbf16, #tpu.memory_space<vmem>>, %arg16: memref<1x1x32xf32, #tpu.memory_space<vmem>>, %arg17: memref<1x1x32xf32, #tpu.memory_space<vmem>>, %arg18: memref<1x1x32xf32, #tpu.memory_space<vmem>>, %arg19: memref<1x1x32xf32, #tpu.memory_space<vmem>>, %arg20: memref<1x1x32xf32, #tpu.memory_space<vmem>>, %arg21: memref<1x1x32xf32, #tpu.memory_space<vmem>>, %arg22: memref<1x1x32xf32, #tpu.memory_space<vmem>>, %arg23: memref<32x128xbf16, #tpu.memory_space<vmem>>, %arg24: memref<1x128xf32, #tpu.memory_space<vmem>>, %arg25: memref<16x128xf32, #tpu.memory_space<vmem>>, %arg26: memref<16x32xf32, #tpu.memory_space<vmem>>) attributes {dimension_semantics = [#tpu.dimension_semantics<arbitrary>], iteration_bounds = array<i64: 2>, scalar_prefetch = 0 : i64, scratch_operands = 1 : i64, tpu.core_type = #tpu.core_type<tc>, window_params = [{pipeline_mode = #tpu.pipeline_mode<synchronous>, transform_indices = @transform_0, window_bounds = array<i64: 16, 32>}, {pipeline_mode = #tpu.pipeline_mode<synchronous>, transform_indices = @transform_1, window_bounds = array<i64: 16, 32>}, {transform_indices = @transform_2, window_bounds = array<i64: 1, 32, 96>}, {transform_indices = @transform_3, window_bounds = array<i64: 1, 1, 96>}, {transform_indices = @transform_4, window_bounds = array<i64: 1, 32, 32>}, {transform_indices = @transform_5, window_bounds = array<i64: 1, 1, 32>}, {transform_indices = @transform_6, window_bounds = array<i64: 1, 32, 32>}, {transform_indices = @transform_7, window_bounds = array<i64: 1, 1, 32>}, {transform_indices = @transform_8, window_bounds = array<i64: 1, 32, 64>}, {transform_indices = @transform_9, window_bounds = array<i64: 1, 1, 64>}, {transform_indices = @transform_10, window_bounds = array<i64: 1, 32, 32>}, {transform_indices = @transform_11, window_bounds = array<i64: 1, 1, 32>}, {transform_indices = @transform_12, window_bounds = array<i64: 1, 32, 2048>}, {transform_indices = @transform_13, window_bounds = array<i64: 1, 1, 2048>}, {transform_indices = @transform_14, window_bounds = array<i64: 1, 2048, 32>}, {transform_indices = @transform_15, window_bounds = array<i64: 1, 1, 32>}, {transform_indices = @transform_16, window_bounds = array<i64: 1, 1, 32>}, {transform_indices = @transform_17, window_bounds = array<i64: 1, 1, 32>}, {transform_indices = @transform_18, window_bounds = array<i64: 1, 1, 32>}, {transform_indices = @transform_19, window_bounds = array<i64: 1, 1, 32>}, {transform_indices = @transform_20, window_bounds = array<i64: 1, 1, 32>}, {transform_indices = @transform_21, window_bounds = array<i64: 1, 1, 32>}, {pipeline_mode = #tpu.pipeline_mode<synchronous>, transform_indices = @transform_22, window_bounds = array<i64: 32, 128>}, {pipeline_mode = #tpu.pipeline_mode<synchronous>, transform_indices = @transform_23, window_bounds = array<i64: 1, 128>}, {pipeline_mode = #tpu.pipeline_mode<synchronous>, transform_indices = @transform_24, window_bounds = array<i64: 16, 128>}]} {
    %c0_i32 = arith.constant 0 : i32
    %0 = arith.cmpi eq, %arg0, %c0_i32 : i32
    %1 = arith.extui %0 : i1 to i32
    %c0_i32_0 = arith.constant 0 : i32
    %2 = arith.cmpi ne, %1, %c0_i32_0 : i32
    scf.if %2 {
      %c0_129 = arith.constant 0 : index
      %c0_130 = arith.constant 0 : index
      %331 = vector.load %arg1[%c0_129, %c0_130] : memref<16x32xf32, #tpu.memory_space<vmem>>, vector<16x32xf32>
      %c0_131 = arith.constant 0 : index
      %c0_132 = arith.constant 0 : index
      %332 = vector.load %arg26[%c0_131, %c0_132] : memref<16x32xf32, #tpu.memory_space<vmem>>, vector<16x32xf32>
      tpu.vector_store %arg26[%c0_131, %c0_132], %331 {strides = array<i32>} : memref<16x32xf32, #tpu.memory_space<vmem>>, vector<16x32xf32>,
    } else {
    }
    %c0 = arith.constant 0 : index
    %c0_1 = arith.constant 0 : index
    %3 = vector.load %arg26[%c0, %c0_1] : memref<16x32xf32, #tpu.memory_space<vmem>>, vector<16x32xf32>
    %c0_2 = arith.constant 0 : index
    %c0_3 = arith.constant 0 : index
    %4 = vector.load %arg2[%c0_2, %c0_3] : memref<16x32xf32, #tpu.memory_space<vmem>>, vector<16x32xf32>
    %5 = arith.truncf %3 : vector<16x32xf32> to vector<16x32xbf16>
    %c0_4 = arith.constant 0 : index
    %c0_5 = arith.constant 0 : index
    %c0_6 = arith.constant 0 : index
    %6 = vector.load %arg3[%c0_4, %c0_5, %c0_6] : memref<1x32x96xbf16, #tpu.memory_space<vmem>>, vector<1x32x96xbf16>
    %7 = vector.shape_cast %6 : vector<1x32x96xbf16> to vector<32x96xbf16>
    %cst = arith.constant dense<0.000000e+00> : vector<16x96xf32>
    %8 = tpu.matmul %5, %7, %cst {dimension_numbers = #tpu.dot_dimension_numbers<[1], [0], [0], [1], [0, 0, 1, 1], [], []>} : vector<16x32xbf16>, vector<32x96xbf16>, vector<16x96xf32> -> vector<16x96xf32>
    %c0_7 = arith.constant 0 : index
    %c0_8 = arith.constant 0 : index
    %c0_9 = arith.constant 0 : index
    %9 = vector.load %arg4[%c0_7, %c0_8, %c0_9] : memref<1x1x96xf32, #tpu.memory_space<vmem>>, vector<1x1x96xf32>
    %10 = vector.shape_cast %9 : vector<1x1x96xf32> to vector<1x96xf32>
    %11 = vector.broadcast %10 : vector<1x96xf32> to vector<16x96xf32>
    %12 = arith.addf %8, %11 : vector<16x96xf32>
    %13 = vector.extract_strided_slice %12 {offsets = [0, 0], sizes = [16, 32], strides = [1, 1]} : vector<16x96xf32> to vector<16x32xf32>
    %14 = vector.extract_strided_slice %12 {offsets = [0, 32], sizes = [16, 32], strides = [1, 1]} : vector<16x96xf32> to vector<16x32xf32>
    %15 = vector.extract_strided_slice %12 {offsets = [0, 64], sizes = [16, 32], strides = [1, 1]} : vector<16x96xf32> to vector<16x32xf32>
    %16 = vector.shape_cast %13 : vector<16x32xf32> to vector<2x8x32xf32>
    %17 = vector.shape_cast %14 : vector<16x32xf32> to vector<2x8x32xf32>
    %18 = vector.shape_cast %15 : vector<16x32xf32> to vector<2x8x32xf32>
    %19 = vector.extract_strided_slice %16 {offsets = [0, 0, 0], sizes = [2, 8, 8], strides = [1, 1, 1]} : vector<2x8x32xf32> to vector<2x8x8xf32>
    %20 = arith.truncf %19 : vector<2x8x8xf32> to vector<2x8x8xbf16>
    %21 = vector.extract_strided_slice %17 {offsets = [0, 0, 0], sizes = [2, 8, 8], strides = [1, 1, 1]} : vector<2x8x32xf32> to vector<2x8x8xf32>
    %22 = arith.truncf %21 : vector<2x8x8xf32> to vector<2x8x8xbf16>
    %23 = vector.extract_strided_slice %18 {offsets = [0, 0, 0], sizes = [2, 8, 8], strides = [1, 1, 1]} : vector<2x8x32xf32> to vector<2x8x8xf32>
    %24 = arith.truncf %23 : vector<2x8x8xf32> to vector<2x8x8xbf16>
    "tpu.trace_start"() <{level = 10 : i32, message = "bqd,bkd->bqk"}> : () -> ()
    %cst_10 = arith.constant dense<0.000000e+00> : vector<2x8x8xf32>
    %25 = tpu.matmul %20, %22, %cst_10 {dimension_numbers = #tpu.dot_dimension_numbers<[2], [2], [1], [1], [0, 0, 0, 1, 1, 1], [0], [0]>} : vector<2x8x8xbf16>, vector<2x8x8xbf16>, vector<2x8x8xf32> -> vector<2x8x8xf32>
    "tpu.trace_stop"() : () -> ()
    %cst_11 = arith.constant 0.353553385 : f32
    %26 = vector.broadcast %cst_11 : f32 to vector<2x8x8xf32>
    %27 = arith.mulf %25, %26 : vector<2x8x8xf32>
    %cst_12 = arith.constant dense<0xFF800000> : vector<2x8xf32>
    %28 = vector.multi_reduction <maximumf>, %27, %cst_12 [2] : vector<2x8x8xf32> to vector<2x8xf32>
    %29 = vector.shape_cast %28 : vector<2x8xf32> to vector<2x8x1xf32>
    %30 = vector.broadcast %29 : vector<2x8x1xf32> to vector<2x8x8xf32>
    %31 = arith.subf %27, %30 : vector<2x8x8xf32>
    %32 = math.exp %31 : vector<2x8x8xf32>
    %cst_13 = arith.constant dense<0.000000e+00> : vector<2x8xf32>
    %33 = vector.multi_reduction <add>, %32, %cst_13 [2] : vector<2x8x8xf32> to vector<2x8xf32>
    %34 = vector.shape_cast %33 : vector<2x8xf32> to vector<2x8x1xf32>
    %35 = tpu.reciprocal %34 {approx = true} : vector<2x8x1xf32> -> vector<2x8x1xf32>
    %36 = vector.broadcast %35 : vector<2x8x1xf32> to vector<2x8x8xf32>
    %37 = arith.mulf %32, %36 : vector<2x8x8xf32>
    %38 = arith.truncf %37 : vector<2x8x8xf32> to vector<2x8x8xbf16>
    "tpu.trace_start"() <{level = 10 : i32, message = "bqk,bkd->bqd"}> : () -> ()
    %cst_14 = arith.constant dense<0.000000e+00> : vector<2x8x8xf32>
    %39 = tpu.matmul %38, %24, %cst_14 {dimension_numbers = #tpu.dot_dimension_numbers<[2], [1], [1], [2], [0, 0, 0, 1, 1, 2], [0], [0]>} : vector<2x8x8xbf16>, vector<2x8x8xbf16>, vector<2x8x8xf32> -> vector<2x8x8xf32>
    "tpu.trace_stop"() : () -> ()
    %40 = vector.extract_strided_slice %16 {offsets = [0, 0, 8], sizes = [2, 8, 8], strides = [1, 1, 1]} : vector<2x8x32xf32> to vector<2x8x8xf32>
    %41 = arith.truncf %40 : vector<2x8x8xf32> to vector<2x8x8xbf16>
    %42 = vector.extract_strided_slice %17 {offsets = [0, 0, 8], sizes = [2, 8, 8], strides = [1, 1, 1]} : vector<2x8x32xf32> to vector<2x8x8xf32>
    %43 = arith.truncf %42 : vector<2x8x8xf32> to vector<2x8x8xbf16>
    %44 = vector.extract_strided_slice %18 {offsets = [0, 0, 8], sizes = [2, 8, 8], strides = [1, 1, 1]} : vector<2x8x32xf32> to vector<2x8x8xf32>
    %45 = arith.truncf %44 : vector<2x8x8xf32> to vector<2x8x8xbf16>
    "tpu.trace_start"() <{level = 10 : i32, message = "bqd,bkd->bqk"}> : () -> ()
    %cst_15 = arith.constant dense<0.000000e+00> : vector<2x8x8xf32>
    %46 = tpu.matmul %41, %43, %cst_15 {dimension_numbers = #tpu.dot_dimension_numbers<[2], [2], [1], [1], [0, 0, 0, 1, 1, 1], [0], [0]>} : vector<2x8x8xbf16>, vector<2x8x8xbf16>, vector<2x8x8xf32> -> vector<2x8x8xf32>
    "tpu.trace_stop"() : () -> ()
    %cst_16 = arith.constant 0.353553385 : f32
    %47 = vector.broadcast %cst_16 : f32 to vector<2x8x8xf32>
    %48 = arith.mulf %46, %47 : vector<2x8x8xf32>
    %cst_17 = arith.constant dense<0xFF800000> : vector<2x8xf32>
    %49 = vector.multi_reduction <maximumf>, %48, %cst_17 [2] : vector<2x8x8xf32> to vector<2x8xf32>
    %50 = vector.shape_cast %49 : vector<2x8xf32> to vector<2x8x1xf32>
    %51 = vector.broadcast %50 : vector<2x8x1xf32> to vector<2x8x8xf32>
    %52 = arith.subf %48, %51 : vector<2x8x8xf32>
    %53 = math.exp %52 : vector<2x8x8xf32>
    %cst_18 = arith.constant dense<0.000000e+00> : vector<2x8xf32>
    %54 = vector.multi_reduction <add>, %53, %cst_18 [2] : vector<2x8x8xf32> to vector<2x8xf32>
    %55 = vector.shape_cast %54 : vector<2x8xf32> to vector<2x8x1xf32>
    %56 = tpu.reciprocal %55 {approx = true} : vector<2x8x1xf32> -> vector<2x8x1xf32>
    %57 = vector.broadcast %56 : vector<2x8x1xf32> to vector<2x8x8xf32>
    %58 = arith.mulf %53, %57 : vector<2x8x8xf32>
    %59 = arith.truncf %58 : vector<2x8x8xf32> to vector<2x8x8xbf16>
    "tpu.trace_start"() <{level = 10 : i32, message = "bqk,bkd->bqd"}> : () -> ()
    %cst_19 = arith.constant dense<0.000000e+00> : vector<2x8x8xf32>
    %60 = tpu.matmul %59, %45, %cst_19 {dimension_numbers = #tpu.dot_dimension_numbers<[2], [1], [1], [2], [0, 0, 0, 1, 1, 2], [0], [0]>} : vector<2x8x8xbf16>, vector<2x8x8xbf16>, vector<2x8x8xf32> -> vector<2x8x8xf32>
    "tpu.trace_stop"() : () -> ()
    %61 = vector.extract_strided_slice %16 {offsets = [0, 0, 16], sizes = [2, 8, 8], strides = [1, 1, 1]} : vector<2x8x32xf32> to vector<2x8x8xf32>
    %62 = arith.truncf %61 : vector<2x8x8xf32> to vector<2x8x8xbf16>
    %63 = vector.extract_strided_slice %17 {offsets = [0, 0, 16], sizes = [2, 8, 8], strides = [1, 1, 1]} : vector<2x8x32xf32> to vector<2x8x8xf32>
    %64 = arith.truncf %63 : vector<2x8x8xf32> to vector<2x8x8xbf16>
    %65 = vector.extract_strided_slice %18 {offsets = [0, 0, 16], sizes = [2, 8, 8], strides = [1, 1, 1]} : vector<2x8x32xf32> to vector<2x8x8xf32>
    %66 = arith.truncf %65 : vector<2x8x8xf32> to vector<2x8x8xbf16>
    "tpu.trace_start"() <{level = 10 : i32, message = "bqd,bkd->bqk"}> : () -> ()
    %cst_20 = arith.constant dense<0.000000e+00> : vector<2x8x8xf32>
    %67 = tpu.matmul %62, %64, %cst_20 {dimension_numbers = #tpu.dot_dimension_numbers<[2], [2], [1], [1], [0, 0, 0, 1, 1, 1], [0], [0]>} : vector<2x8x8xbf16>, vector<2x8x8xbf16>, vector<2x8x8xf32> -> vector<2x8x8xf32>
    "tpu.trace_stop"() : () -> ()
    %cst_21 = arith.constant 0.353553385 : f32
    %68 = vector.broadcast %cst_21 : f32 to vector<2x8x8xf32>
    %69 = arith.mulf %67, %68 : vector<2x8x8xf32>
    %cst_22 = arith.constant dense<0xFF800000> : vector<2x8xf32>
    %70 = vector.multi_reduction <maximumf>, %69, %cst_22 [2] : vector<2x8x8xf32> to vector<2x8xf32>
    %71 = vector.shape_cast %70 : vector<2x8xf32> to vector<2x8x1xf32>
    %72 = vector.broadcast %71 : vector<2x8x1xf32> to vector<2x8x8xf32>
    %73 = arith.subf %69, %72 : vector<2x8x8xf32>
    %74 = math.exp %73 : vector<2x8x8xf32>
    %cst_23 = arith.constant dense<0.000000e+00> : vector<2x8xf32>
    %75 = vector.multi_reduction <add>, %74, %cst_23 [2] : vector<2x8x8xf32> to vector<2x8xf32>
    %76 = vector.shape_cast %75 : vector<2x8xf32> to vector<2x8x1xf32>
    %77 = tpu.reciprocal %76 {approx = true} : vector<2x8x1xf32> -> vector<2x8x1xf32>
    %78 = vector.broadcast %77 : vector<2x8x1xf32> to vector<2x8x8xf32>
    %79 = arith.mulf %74, %78 : vector<2x8x8xf32>
    %80 = arith.truncf %79 : vector<2x8x8xf32> to vector<2x8x8xbf16>
    "tpu.trace_start"() <{level = 10 : i32, message = "bqk,bkd->bqd"}> : () -> ()
    %cst_24 = arith.constant dense<0.000000e+00> : vector<2x8x8xf32>
    %81 = tpu.matmul %80, %66, %cst_24 {dimension_numbers = #tpu.dot_dimension_numbers<[2], [1], [1], [2], [0, 0, 0, 1, 1, 2], [0], [0]>} : vector<2x8x8xbf16>, vector<2x8x8xbf16>, vector<2x8x8xf32> -> vector<2x8x8xf32>
    "tpu.trace_stop"() : () -> ()
    %82 = vector.extract_strided_slice %16 {offsets = [0, 0, 24], sizes = [2, 8, 8], strides = [1, 1, 1]} : vector<2x8x32xf32> to vector<2x8x8xf32>
    %83 = arith.truncf %82 : vector<2x8x8xf32> to vector<2x8x8xbf16>
    %84 = vector.extract_strided_slice %17 {offsets = [0, 0, 24], sizes = [2, 8, 8], strides = [1, 1, 1]} : vector<2x8x32xf32> to vector<2x8x8xf32>
    %85 = arith.truncf %84 : vector<2x8x8xf32> to vector<2x8x8xbf16>
    %86 = vector.extract_strided_slice %18 {offsets = [0, 0, 24], sizes = [2, 8, 8], strides = [1, 1, 1]} : vector<2x8x32xf32> to vector<2x8x8xf32>
    %87 = arith.truncf %86 : vector<2x8x8xf32> to vector<2x8x8xbf16>
    "tpu.trace_start"() <{level = 10 : i32, message = "bqd,bkd->bqk"}> : () -> ()
    %cst_25 = arith.constant dense<0.000000e+00> : vector<2x8x8xf32>
    %88 = tpu.matmul %83, %85, %cst_25 {dimension_numbers = #tpu.dot_dimension_numbers<[2], [2], [1], [1], [0, 0, 0, 1, 1, 1], [0], [0]>} : vector<2x8x8xbf16>, vector<2x8x8xbf16>, vector<2x8x8xf32> -> vector<2x8x8xf32>
    "tpu.trace_stop"() : () -> ()
    %cst_26 = arith.constant 0.353553385 : f32
    %89 = vector.broadcast %cst_26 : f32 to vector<2x8x8xf32>
    %90 = arith.mulf %88, %89 : vector<2x8x8xf32>
    %cst_27 = arith.constant dense<0xFF800000> : vector<2x8xf32>
    %91 = vector.multi_reduction <maximumf>, %90, %cst_27 [2] : vector<2x8x8xf32> to vector<2x8xf32>
    %92 = vector.shape_cast %91 : vector<2x8xf32> to vector<2x8x1xf32>
    %93 = vector.broadcast %92 : vector<2x8x1xf32> to vector<2x8x8xf32>
    %94 = arith.subf %90, %93 : vector<2x8x8xf32>
    %95 = math.exp %94 : vector<2x8x8xf32>
    %cst_28 = arith.constant dense<0.000000e+00> : vector<2x8xf32>
    %96 = vector.multi_reduction <add>, %95, %cst_28 [2] : vector<2x8x8xf32> to vector<2x8xf32>
    %97 = vector.shape_cast %96 : vector<2x8xf32> to vector<2x8x1xf32>
    %98 = tpu.reciprocal %97 {approx = true} : vector<2x8x1xf32> -> vector<2x8x1xf32>
    %99 = vector.broadcast %98 : vector<2x8x1xf32> to vector<2x8x8xf32>
    %100 = arith.mulf %95, %99 : vector<2x8x8xf32>
    %101 = arith.truncf %100 : vector<2x8x8xf32> to vector<2x8x8xbf16>
    "tpu.trace_start"() <{level = 10 : i32, message = "bqk,bkd->bqd"}> : () -> ()
    %cst_29 = arith.constant dense<0.000000e+00> : vector<2x8x8xf32>
    %102 = tpu.matmul %101, %87, %cst_29 {dimension_numbers = #tpu.dot_dimension_numbers<[2], [1], [1], [2], [0, 0, 0, 1, 1, 2], [0], [0]>} : vector<2x8x8xbf16>, vector<2x8x8xbf16>, vector<2x8x8xf32> -> vector<2x8x8xf32>
    "tpu.trace_stop"() : () -> ()
    %103 = tpu.concatenate %39, %60, %81, %102 in 2 : vector<2x8x8xf32>, vector<2x8x8xf32>, vector<2x8x8xf32>, vector<2x8x8xf32> -> vector<2x8x32xf32>
    %104 = vector.shape_cast %103 : vector<2x8x32xf32> to vector<16x32xf32>
    %105 = arith.truncf %104 : vector<16x32xf32> to vector<16x32xbf16>
    %c0_30 = arith.constant 0 : index
    %c0_31 = arith.constant 0 : index
    %c0_32 = arith.constant 0 : index
    %106 = vector.load %arg5[%c0_30, %c0_31, %c0_32] : memref<1x32x32xbf16, #tpu.memory_space<vmem>>, vector<1x32x32xbf16>
    %107 = vector.shape_cast %106 : vector<1x32x32xbf16> to vector<32x32xbf16>
    %cst_33 = arith.constant dense<0.000000e+00> : vector<16x32xf32>
    %108 = tpu.matmul %105, %107, %cst_33 {dimension_numbers = #tpu.dot_dimension_numbers<[1], [0], [0], [1], [0, 0, 1, 1], [], []>} : vector<16x32xbf16>, vector<32x32xbf16>, vector<16x32xf32> -> vector<16x32xf32>
    %c0_34 = arith.constant 0 : index
    %c0_35 = arith.constant 0 : index
    %c0_36 = arith.constant 0 : index
    %109 = vector.load %arg6[%c0_34, %c0_35, %c0_36] : memref<1x1x32xf32, #tpu.memory_space<vmem>>, vector<1x1x32xf32>
    %110 = vector.shape_cast %109 : vector<1x1x32xf32> to vector<1x32xf32>
    %111 = vector.broadcast %110 : vector<1x32xf32> to vector<16x32xf32>
    %112 = arith.addf %108, %111 : vector<16x32xf32>
    %113 = arith.addf %3, %112 : vector<16x32xf32>
    %cst_37 = arith.constant dense<0.000000e+00> : vector<16xf32>
    %114 = vector.multi_reduction <add>, %113, %cst_37 [1] : vector<16x32xf32> to vector<16xf32>
    %115 = vector.shape_cast %114 : vector<16xf32> to vector<16x1xf32>
    %cst_38 = arith.constant 3.200000e+01 : f32
    %116 = vector.broadcast %cst_38 : f32 to vector<16x1xf32>
    %117 = arith.divf %115, %116 : vector<16x1xf32>
    %118 = vector.broadcast %117 : vector<16x1xf32> to vector<16x32xf32>
    %119 = arith.subf %113, %118 : vector<16x32xf32>
    %120 = arith.mulf %119, %119 : vector<16x32xf32>
    %cst_39 = arith.constant dense<0.000000e+00> : vector<16xf32>
    %121 = vector.multi_reduction <add>, %120, %cst_39 [1] : vector<16x32xf32> to vector<16xf32>
    %122 = vector.shape_cast %121 : vector<16xf32> to vector<16x1xf32>
    %cst_40 = arith.constant 3.200000e+01 : f32
    %123 = vector.broadcast %cst_40 : f32 to vector<16x1xf32>
    %124 = arith.divf %122, %123 : vector<16x1xf32>
    %125 = vector.broadcast %117 : vector<16x1xf32> to vector<16x32xf32>
    %126 = arith.subf %113, %125 : vector<16x32xf32>
    %cst_41 = arith.constant 9.99999974E-6 : f32
    %127 = vector.broadcast %cst_41 : f32 to vector<16x1xf32>
    %128 = arith.addf %124, %127 : vector<16x1xf32>
    %129 = math.rsqrt %128 : vector<16x1xf32>
    %130 = vector.broadcast %129 : vector<16x1xf32> to vector<16x32xf32>
    %131 = arith.mulf %126, %130 : vector<16x32xf32>
    %c0_42 = arith.constant 0 : index
    %c0_43 = arith.constant 0 : index
    %c0_44 = arith.constant 0 : index
    %132 = vector.load %arg17[%c0_42, %c0_43, %c0_44] : memref<1x1x32xf32, #tpu.memory_space<vmem>>, vector<1x1x32xf32>
    %133 = vector.shape_cast %132 : vector<1x1x32xf32> to vector<1x32xf32>
    %134 = vector.broadcast %133 : vector<1x32xf32> to vector<16x32xf32>
    %135 = arith.mulf %131, %134 : vector<16x32xf32>
    %c0_45 = arith.constant 0 : index
    %c0_46 = arith.constant 0 : index
    %c0_47 = arith.constant 0 : index
    %136 = vector.load %arg18[%c0_45, %c0_46, %c0_47] : memref<1x1x32xf32, #tpu.memory_space<vmem>>, vector<1x1x32xf32>
    %137 = vector.shape_cast %136 : vector<1x1x32xf32> to vector<1x32xf32>
    %138 = vector.broadcast %137 : vector<1x32xf32> to vector<16x32xf32>
    %139 = arith.addf %135, %138 : vector<16x32xf32>
    %140 = arith.truncf %139 : vector<16x32xf32> to vector<16x32xbf16>
    %c0_48 = arith.constant 0 : index
    %c0_49 = arith.constant 0 : index
    %c0_50 = arith.constant 0 : index
    %141 = vector.load %arg7[%c0_48, %c0_49, %c0_50] : memref<1x32x32xbf16, #tpu.memory_space<vmem>>, vector<1x32x32xbf16>
    %142 = vector.shape_cast %141 : vector<1x32x32xbf16> to vector<32x32xbf16>
    %cst_51 = arith.constant dense<0.000000e+00> : vector<16x32xf32>
    %143 = tpu.matmul %140, %142, %cst_51 {dimension_numbers = #tpu.dot_dimension_numbers<[1], [0], [0], [1], [0, 0, 1, 1], [], []>} : vector<16x32xbf16>, vector<32x32xbf16>, vector<16x32xf32> -> vector<16x32xf32>
    %c0_52 = arith.constant 0 : index
    %c0_53 = arith.constant 0 : index
    %c0_54 = arith.constant 0 : index
    %144 = vector.load %arg8[%c0_52, %c0_53, %c0_54] : memref<1x1x32xf32, #tpu.memory_space<vmem>>, vector<1x1x32xf32>
    %145 = vector.shape_cast %144 : vector<1x1x32xf32> to vector<1x32xf32>
    %146 = vector.broadcast %145 : vector<1x32xf32> to vector<16x32xf32>
    %147 = arith.addf %143, %146 : vector<16x32xf32>
    %148 = arith.truncf %4 : vector<16x32xf32> to vector<16x32xbf16>
    %c0_55 = arith.constant 0 : index
    %c0_56 = arith.constant 0 : index
    %c0_57 = arith.constant 0 : index
    %149 = vector.load %arg9[%c0_55, %c0_56, %c0_57] : memref<1x32x64xbf16, #tpu.memory_space<vmem>>, vector<1x32x64xbf16>
    %150 = vector.shape_cast %149 : vector<1x32x64xbf16> to vector<32x64xbf16>
    %cst_58 = arith.constant dense<0.000000e+00> : vector<16x64xf32>
    %151 = tpu.matmul %148, %150, %cst_58 {dimension_numbers = #tpu.dot_dimension_numbers<[1], [0], [0], [1], [0, 0, 1, 1], [], []>} : vector<16x32xbf16>, vector<32x64xbf16>, vector<16x64xf32> -> vector<16x64xf32>
    %c0_59 = arith.constant 0 : index
    %c0_60 = arith.constant 0 : index
    %c0_61 = arith.constant 0 : index
    %152 = vector.load %arg10[%c0_59, %c0_60, %c0_61] : memref<1x1x64xf32, #tpu.memory_space<vmem>>, vector<1x1x64xf32>
    %153 = vector.shape_cast %152 : vector<1x1x64xf32> to vector<1x64xf32>
    %154 = vector.broadcast %153 : vector<1x64xf32> to vector<16x64xf32>
    %155 = arith.addf %151, %154 : vector<16x64xf32>
    %156 = vector.extract_strided_slice %155 {offsets = [0, 0], sizes = [16, 32], strides = [1, 1]} : vector<16x64xf32> to vector<16x32xf32>
    %157 = vector.extract_strided_slice %155 {offsets = [0, 32], sizes = [16, 32], strides = [1, 1]} : vector<16x64xf32> to vector<16x32xf32>
    %158 = vector.shape_cast %147 : vector<16x32xf32> to vector<2x8x32xf32>
    %159 = vector.shape_cast %156 : vector<16x32xf32> to vector<2x8x32xf32>
    %160 = vector.shape_cast %157 : vector<16x32xf32> to vector<2x8x32xf32>
    %161 = vector.extract_strided_slice %158 {offsets = [0, 0, 0], sizes = [2, 8, 8], strides = [1, 1, 1]} : vector<2x8x32xf32> to vector<2x8x8xf32>
    %162 = arith.truncf %161 : vector<2x8x8xf32> to vector<2x8x8xbf16>
    %163 = vector.extract_strided_slice %159 {offsets = [0, 0, 0], sizes = [2, 8, 8], strides = [1, 1, 1]} : vector<2x8x32xf32> to vector<2x8x8xf32>
    %164 = arith.truncf %163 : vector<2x8x8xf32> to vector<2x8x8xbf16>
    %165 = vector.extract_strided_slice %160 {offsets = [0, 0, 0], sizes = [2, 8, 8], strides = [1, 1, 1]} : vector<2x8x32xf32> to vector<2x8x8xf32>
    %166 = arith.truncf %165 : vector<2x8x8xf32> to vector<2x8x8xbf16>
    "tpu.trace_start"() <{level = 10 : i32, message = "bqd,bkd->bqk"}> : () -> ()
    %cst_62 = arith.constant dense<0.000000e+00> : vector<2x8x8xf32>
    %167 = tpu.matmul %162, %164, %cst_62 {dimension_numbers = #tpu.dot_dimension_numbers<[2], [2], [1], [1], [0, 0, 0, 1, 1, 1], [0], [0]>} : vector<2x8x8xbf16>, vector<2x8x8xbf16>, vector<2x8x8xf32> -> vector<2x8x8xf32>
    "tpu.trace_stop"() : () -> ()
    %cst_63 = arith.constant 0.353553385 : f32
    %168 = vector.broadcast %cst_63 : f32 to vector<2x8x8xf32>
    %169 = arith.mulf %167, %168 : vector<2x8x8xf32>
    %cst_64 = arith.constant dense<0xFF800000> : vector<2x8xf32>
    %170 = vector.multi_reduction <maximumf>, %169, %cst_64 [2] : vector<2x8x8xf32> to vector<2x8xf32>
    %171 = vector.shape_cast %170 : vector<2x8xf32> to vector<2x8x1xf32>
    %172 = vector.broadcast %171 : vector<2x8x1xf32> to vector<2x8x8xf32>
    %173 = arith.subf %169, %172 : vector<2x8x8xf32>
    %174 = math.exp %173 : vector<2x8x8xf32>
    %cst_65 = arith.constant dense<0.000000e+00> : vector<2x8xf32>
    %175 = vector.multi_reduction <add>, %174, %cst_65 [2] : vector<2x8x8xf32> to vector<2x8xf32>
    %176 = vector.shape_cast %175 : vector<2x8xf32> to vector<2x8x1xf32>
    %177 = tpu.reciprocal %176 {approx = true} : vector<2x8x1xf32> -> vector<2x8x1xf32>
    %178 = vector.broadcast %177 : vector<2x8x1xf32> to vector<2x8x8xf32>
    %179 = arith.mulf %174, %178 : vector<2x8x8xf32>
    %180 = arith.truncf %179 : vector<2x8x8xf32> to vector<2x8x8xbf16>
    "tpu.trace_start"() <{level = 10 : i32, message = "bqk,bkd->bqd"}> : () -> ()
    %cst_66 = arith.constant dense<0.000000e+00> : vector<2x8x8xf32>
    %181 = tpu.matmul %180, %166, %cst_66 {dimension_numbers = #tpu.dot_dimension_numbers<[2], [1], [1], [2], [0, 0, 0, 1, 1, 2], [0], [0]>} : vector<2x8x8xbf16>, vector<2x8x8xbf16>, vector<2x8x8xf32> -> vector<2x8x8xf32>
    "tpu.trace_stop"() : () -> ()
    %182 = vector.extract_strided_slice %158 {offsets = [0, 0, 8], sizes = [2, 8, 8], strides = [1, 1, 1]} : vector<2x8x32xf32> to vector<2x8x8xf32>
    %183 = arith.truncf %182 : vector<2x8x8xf32> to vector<2x8x8xbf16>
    %184 = vector.extract_strided_slice %159 {offsets = [0, 0, 8], sizes = [2, 8, 8], strides = [1, 1, 1]} : vector<2x8x32xf32> to vector<2x8x8xf32>
    %185 = arith.truncf %184 : vector<2x8x8xf32> to vector<2x8x8xbf16>
    %186 = vector.extract_strided_slice %160 {offsets = [0, 0, 8], sizes = [2, 8, 8], strides = [1, 1, 1]} : vector<2x8x32xf32> to vector<2x8x8xf32>
    %187 = arith.truncf %186 : vector<2x8x8xf32> to vector<2x8x8xbf16>
    "tpu.trace_start"() <{level = 10 : i32, message = "bqd,bkd->bqk"}> : () -> ()
    %cst_67 = arith.constant dense<0.000000e+00> : vector<2x8x8xf32>
    %188 = tpu.matmul %183, %185, %cst_67 {dimension_numbers = #tpu.dot_dimension_numbers<[2], [2], [1], [1], [0, 0, 0, 1, 1, 1], [0], [0]>} : vector<2x8x8xbf16>, vector<2x8x8xbf16>, vector<2x8x8xf32> -> vector<2x8x8xf32>
    "tpu.trace_stop"() : () -> ()
    %cst_68 = arith.constant 0.353553385 : f32
    %189 = vector.broadcast %cst_68 : f32 to vector<2x8x8xf32>
    %190 = arith.mulf %188, %189 : vector<2x8x8xf32>
    %cst_69 = arith.constant dense<0xFF800000> : vector<2x8xf32>
    %191 = vector.multi_reduction <maximumf>, %190, %cst_69 [2] : vector<2x8x8xf32> to vector<2x8xf32>
    %192 = vector.shape_cast %191 : vector<2x8xf32> to vector<2x8x1xf32>
    %193 = vector.broadcast %192 : vector<2x8x1xf32> to vector<2x8x8xf32>
    %194 = arith.subf %190, %193 : vector<2x8x8xf32>
    %195 = math.exp %194 : vector<2x8x8xf32>
    %cst_70 = arith.constant dense<0.000000e+00> : vector<2x8xf32>
    %196 = vector.multi_reduction <add>, %195, %cst_70 [2] : vector<2x8x8xf32> to vector<2x8xf32>
    %197 = vector.shape_cast %196 : vector<2x8xf32> to vector<2x8x1xf32>
    %198 = tpu.reciprocal %197 {approx = true} : vector<2x8x1xf32> -> vector<2x8x1xf32>
    %199 = vector.broadcast %198 : vector<2x8x1xf32> to vector<2x8x8xf32>
    %200 = arith.mulf %195, %199 : vector<2x8x8xf32>
    %201 = arith.truncf %200 : vector<2x8x8xf32> to vector<2x8x8xbf16>
    "tpu.trace_start"() <{level = 10 : i32, message = "bqk,bkd->bqd"}> : () -> ()
    %cst_71 = arith.constant dense<0.000000e+00> : vector<2x8x8xf32>
    %202 = tpu.matmul %201, %187, %cst_71 {dimension_numbers = #tpu.dot_dimension_numbers<[2], [1], [1], [2], [0, 0, 0, 1, 1, 2], [0], [0]>} : vector<2x8x8xbf16>, vector<2x8x8xbf16>, vector<2x8x8xf32> -> vector<2x8x8xf32>
    "tpu.trace_stop"() : () -> ()
    %203 = vector.extract_strided_slice %158 {offsets = [0, 0, 16], sizes = [2, 8, 8], strides = [1, 1, 1]} : vector<2x8x32xf32> to vector<2x8x8xf32>
    %204 = arith.truncf %203 : vector<2x8x8xf32> to vector<2x8x8xbf16>
    %205 = vector.extract_strided_slice %159 {offsets = [0, 0, 16], sizes = [2, 8, 8], strides = [1, 1, 1]} : vector<2x8x32xf32> to vector<2x8x8xf32>
    %206 = arith.truncf %205 : vector<2x8x8xf32> to vector<2x8x8xbf16>
    %207 = vector.extract_strided_slice %160 {offsets = [0, 0, 16], sizes = [2, 8, 8], strides = [1, 1, 1]} : vector<2x8x32xf32> to vector<2x8x8xf32>
    %208 = arith.truncf %207 : vector<2x8x8xf32> to vector<2x8x8xbf16>
    "tpu.trace_start"() <{level = 10 : i32, message = "bqd,bkd->bqk"}> : () -> ()
    %cst_72 = arith.constant dense<0.000000e+00> : vector<2x8x8xf32>
    %209 = tpu.matmul %204, %206, %cst_72 {dimension_numbers = #tpu.dot_dimension_numbers<[2], [2], [1], [1], [0, 0, 0, 1, 1, 1], [0], [0]>} : vector<2x8x8xbf16>, vector<2x8x8xbf16>, vector<2x8x8xf32> -> vector<2x8x8xf32>
    "tpu.trace_stop"() : () -> ()
    %cst_73 = arith.constant 0.353553385 : f32
    %210 = vector.broadcast %cst_73 : f32 to vector<2x8x8xf32>
    %211 = arith.mulf %209, %210 : vector<2x8x8xf32>
    %cst_74 = arith.constant dense<0xFF800000> : vector<2x8xf32>
    %212 = vector.multi_reduction <maximumf>, %211, %cst_74 [2] : vector<2x8x8xf32> to vector<2x8xf32>
    %213 = vector.shape_cast %212 : vector<2x8xf32> to vector<2x8x1xf32>
    %214 = vector.broadcast %213 : vector<2x8x1xf32> to vector<2x8x8xf32>
    %215 = arith.subf %211, %214 : vector<2x8x8xf32>
    %216 = math.exp %215 : vector<2x8x8xf32>
    %cst_75 = arith.constant dense<0.000000e+00> : vector<2x8xf32>
    %217 = vector.multi_reduction <add>, %216, %cst_75 [2] : vector<2x8x8xf32> to vector<2x8xf32>
    %218 = vector.shape_cast %217 : vector<2x8xf32> to vector<2x8x1xf32>
    %219 = tpu.reciprocal %218 {approx = true} : vector<2x8x1xf32> -> vector<2x8x1xf32>
    %220 = vector.broadcast %219 : vector<2x8x1xf32> to vector<2x8x8xf32>
    %221 = arith.mulf %216, %220 : vector<2x8x8xf32>
    %222 = arith.truncf %221 : vector<2x8x8xf32> to vector<2x8x8xbf16>
    "tpu.trace_start"() <{level = 10 : i32, message = "bqk,bkd->bqd"}> : () -> ()
    %cst_76 = arith.constant dense<0.000000e+00> : vector<2x8x8xf32>
    %223 = tpu.matmul %222, %208, %cst_76 {dimension_numbers = #tpu.dot_dimension_numbers<[2], [1], [1], [2], [0, 0, 0, 1, 1, 2], [0], [0]>} : vector<2x8x8xbf16>, vector<2x8x8xbf16>, vector<2x8x8xf32> -> vector<2x8x8xf32>
    "tpu.trace_stop"() : () -> ()
    %224 = vector.extract_strided_slice %158 {offsets = [0, 0, 24], sizes = [2, 8, 8], strides = [1, 1, 1]} : vector<2x8x32xf32> to vector<2x8x8xf32>
    %225 = arith.truncf %224 : vector<2x8x8xf32> to vector<2x8x8xbf16>
    %226 = vector.extract_strided_slice %159 {offsets = [0, 0, 24], sizes = [2, 8, 8], strides = [1, 1, 1]} : vector<2x8x32xf32> to vector<2x8x8xf32>
    %227 = arith.truncf %226 : vector<2x8x8xf32> to vector<2x8x8xbf16>
    %228 = vector.extract_strided_slice %160 {offsets = [0, 0, 24], sizes = [2, 8, 8], strides = [1, 1, 1]} : vector<2x8x32xf32> to vector<2x8x8xf32>
    %229 = arith.truncf %228 : vector<2x8x8xf32> to vector<2x8x8xbf16>
    "tpu.trace_start"() <{level = 10 : i32, message = "bqd,bkd->bqk"}> : () -> ()
    %cst_77 = arith.constant dense<0.000000e+00> : vector<2x8x8xf32>
    %230 = tpu.matmul %225, %227, %cst_77 {dimension_numbers = #tpu.dot_dimension_numbers<[2], [2], [1], [1], [0, 0, 0, 1, 1, 1], [0], [0]>} : vector<2x8x8xbf16>, vector<2x8x8xbf16>, vector<2x8x8xf32> -> vector<2x8x8xf32>
    "tpu.trace_stop"() : () -> ()
    %cst_78 = arith.constant 0.353553385 : f32
    %231 = vector.broadcast %cst_78 : f32 to vector<2x8x8xf32>
    %232 = arith.mulf %230, %231 : vector<2x8x8xf32>
    %cst_79 = arith.constant dense<0xFF800000> : vector<2x8xf32>
    %233 = vector.multi_reduction <maximumf>, %232, %cst_79 [2] : vector<2x8x8xf32> to vector<2x8xf32>
    %234 = vector.shape_cast %233 : vector<2x8xf32> to vector<2x8x1xf32>
    %235 = vector.broadcast %234 : vector<2x8x1xf32> to vector<2x8x8xf32>
    %236 = arith.subf %232, %235 : vector<2x8x8xf32>
    %237 = math.exp %236 : vector<2x8x8xf32>
    %cst_80 = arith.constant dense<0.000000e+00> : vector<2x8xf32>
    %238 = vector.multi_reduction <add>, %237, %cst_80 [2] : vector<2x8x8xf32> to vector<2x8xf32>
    %239 = vector.shape_cast %238 : vector<2x8xf32> to vector<2x8x1xf32>
    %240 = tpu.reciprocal %239 {approx = true} : vector<2x8x1xf32> -> vector<2x8x1xf32>
    %241 = vector.broadcast %240 : vector<2x8x1xf32> to vector<2x8x8xf32>
    %242 = arith.mulf %237, %241 : vector<2x8x8xf32>
    %243 = arith.truncf %242 : vector<2x8x8xf32> to vector<2x8x8xbf16>
    "tpu.trace_start"() <{level = 10 : i32, message = "bqk,bkd->bqd"}> : () -> ()
    %cst_81 = arith.constant dense<0.000000e+00> : vector<2x8x8xf32>
    %244 = tpu.matmul %243, %229, %cst_81 {dimension_numbers = #tpu.dot_dimension_numbers<[2], [1], [1], [2], [0, 0, 0, 1, 1, 2], [0], [0]>} : vector<2x8x8xbf16>, vector<2x8x8xbf16>, vector<2x8x8xf32> -> vector<2x8x8xf32>
    "tpu.trace_stop"() : () -> ()
    %245 = tpu.concatenate %181, %202, %223, %244 in 2 : vector<2x8x8xf32>, vector<2x8x8xf32>, vector<2x8x8xf32>, vector<2x8x8xf32> -> vector<2x8x32xf32>
    %246 = vector.shape_cast %245 : vector<2x8x32xf32> to vector<16x32xf32>
    %247 = arith.truncf %246 : vector<16x32xf32> to vector<16x32xbf16>
    %c0_82 = arith.constant 0 : index
    %c0_83 = arith.constant 0 : index
    %c0_84 = arith.constant 0 : index
    %248 = vector.load %arg11[%c0_82, %c0_83, %c0_84] : memref<1x32x32xbf16, #tpu.memory_space<vmem>>, vector<1x32x32xbf16>
    %249 = vector.shape_cast %248 : vector<1x32x32xbf16> to vector<32x32xbf16>
    %cst_85 = arith.constant dense<0.000000e+00> : vector<16x32xf32>
    %250 = tpu.matmul %247, %249, %cst_85 {dimension_numbers = #tpu.dot_dimension_numbers<[1], [0], [0], [1], [0, 0, 1, 1], [], []>} : vector<16x32xbf16>, vector<32x32xbf16>, vector<16x32xf32> -> vector<16x32xf32>
    %c0_86 = arith.constant 0 : index
    %c0_87 = arith.constant 0 : index
    %c0_88 = arith.constant 0 : index
    %251 = vector.load %arg12[%c0_86, %c0_87, %c0_88] : memref<1x1x32xf32, #tpu.memory_space<vmem>>, vector<1x1x32xf32>
    %252 = vector.shape_cast %251 : vector<1x1x32xf32> to vector<1x32xf32>
    %253 = vector.broadcast %252 : vector<1x32xf32> to vector<16x32xf32>
    %254 = arith.addf %250, %253 : vector<16x32xf32>
    %255 = arith.addf %139, %254 : vector<16x32xf32>
    %cst_89 = arith.constant dense<0.000000e+00> : vector<16xf32>
    %256 = vector.multi_reduction <add>, %255, %cst_89 [1] : vector<16x32xf32> to vector<16xf32>
    %257 = vector.shape_cast %256 : vector<16xf32> to vector<16x1xf32>
    %cst_90 = arith.constant 3.200000e+01 : f32
    %258 = vector.broadcast %cst_90 : f32 to vector<16x1xf32>
    %259 = arith.divf %257, %258 : vector<16x1xf32>
    %260 = vector.broadcast %259 : vector<16x1xf32> to vector<16x32xf32>
    %261 = arith.subf %255, %260 : vector<16x32xf32>
    %262 = arith.mulf %261, %261 : vector<16x32xf32>
    %cst_91 = arith.constant dense<0.000000e+00> : vector<16xf32>
    %263 = vector.multi_reduction <add>, %262, %cst_91 [1] : vector<16x32xf32> to vector<16xf32>
    %264 = vector.shape_cast %263 : vector<16xf32> to vector<16x1xf32>
    %cst_92 = arith.constant 3.200000e+01 : f32
    %265 = vector.broadcast %cst_92 : f32 to vector<16x1xf32>
    %266 = arith.divf %264, %265 : vector<16x1xf32>
    %267 = vector.broadcast %259 : vector<16x1xf32> to vector<16x32xf32>
    %268 = arith.subf %255, %267 : vector<16x32xf32>
    %cst_93 = arith.constant 9.99999974E-6 : f32
    %269 = vector.broadcast %cst_93 : f32 to vector<16x1xf32>
    %270 = arith.addf %266, %269 : vector<16x1xf32>
    %271 = math.rsqrt %270 : vector<16x1xf32>
    %272 = vector.broadcast %271 : vector<16x1xf32> to vector<16x32xf32>
    %273 = arith.mulf %268, %272 : vector<16x32xf32>
    %c0_94 = arith.constant 0 : index
    %c0_95 = arith.constant 0 : index
    %c0_96 = arith.constant 0 : index
    %274 = vector.load %arg19[%c0_94, %c0_95, %c0_96] : memref<1x1x32xf32, #tpu.memory_space<vmem>>, vector<1x1x32xf32>
    %275 = vector.shape_cast %274 : vector<1x1x32xf32> to vector<1x32xf32>
    %276 = vector.broadcast %275 : vector<1x32xf32> to vector<16x32xf32>
    %277 = arith.mulf %273, %276 : vector<16x32xf32>
    %c0_97 = arith.constant 0 : index
    %c0_98 = arith.constant 0 : index
    %c0_99 = arith.constant 0 : index
    %278 = vector.load %arg20[%c0_97, %c0_98, %c0_99] : memref<1x1x32xf32, #tpu.memory_space<vmem>>, vector<1x1x32xf32>
    %279 = vector.shape_cast %278 : vector<1x1x32xf32> to vector<1x32xf32>
    %280 = vector.broadcast %279 : vector<1x32xf32> to vector<16x32xf32>
    %281 = arith.addf %277, %280 : vector<16x32xf32>
    %282 = arith.truncf %281 : vector<16x32xf32> to vector<16x32xbf16>
    %c0_100 = arith.constant 0 : index
    %c0_101 = arith.constant 0 : index
    %c0_102 = arith.constant 0 : index
    %283 = vector.load %arg13[%c0_100, %c0_101, %c0_102] : memref<1x32x2048xbf16, #tpu.memory_space<vmem>>, vector<1x32x2048xbf16>
    %284 = vector.shape_cast %283 : vector<1x32x2048xbf16> to vector<32x2048xbf16>
    %cst_103 = arith.constant dense<0.000000e+00> : vector<16x2048xf32>
    %285 = tpu.matmul %282, %284, %cst_103 {dimension_numbers = #tpu.dot_dimension_numbers<[1], [0], [0], [1], [0, 0, 1, 1], [], []>} : vector<16x32xbf16>, vector<32x2048xbf16>, vector<16x2048xf32> -> vector<16x2048xf32>
    %c0_104 = arith.constant 0 : index
    %c0_105 = arith.constant 0 : index
    %c0_106 = arith.constant 0 : index
    %286 = vector.load %arg14[%c0_104, %c0_105, %c0_106] : memref<1x1x2048xf32, #tpu.memory_space<vmem>>, vector<1x1x2048xf32>
    %287 = vector.shape_cast %286 : vector<1x1x2048xf32> to vector<1x2048xf32>
    %288 = vector.broadcast %287 : vector<1x2048xf32> to vector<16x2048xf32>
    %289 = arith.addf %285, %288 : vector<16x2048xf32>
    %cst_107 = arith.constant 0.000000e+00 : f32
    %290 = vector.broadcast %cst_107 : f32 to vector<16x2048xf32>
    %291 = arith.maximumf %289, %290 : vector<16x2048xf32>
    %292 = arith.truncf %291 : vector<16x2048xf32> to vector<16x2048xbf16>
    %c0_108 = arith.constant 0 : index
    %c0_109 = arith.constant 0 : index
    %c0_110 = arith.constant 0 : index
    %293 = vector.load %arg15[%c0_108, %c0_109, %c0_110] : memref<1x2048x32xbf16, #tpu.memory_space<vmem>>, vector<1x2048x32xbf16>
    %294 = vector.shape_cast %293 : vector<1x2048x32xbf16> to vector<2048x32xbf16>
    %cst_111 = arith.constant dense<0.000000e+00> : vector<16x32xf32>
    %295 = tpu.matmul %292, %294, %cst_111 {dimension_numbers = #tpu.dot_dimension_numbers<[1], [0], [0], [1], [0, 0, 1, 1], [], []>} : vector<16x2048xbf16>, vector<2048x32xbf16>, vector<16x32xf32> -> vector<16x32xf32>
    %296 = arith.addf %281, %295 : vector<16x32xf32>
    %c0_112 = arith.constant 0 : index
    %c0_113 = arith.constant 0 : index
    %c0_114 = arith.constant 0 : index
    %297 = vector.load %arg16[%c0_112, %c0_113, %c0_114] : memref<1x1x32xf32, #tpu.memory_space<vmem>>, vector<1x1x32xf32>
    %298 = vector.shape_cast %297 : vector<1x1x32xf32> to vector<1x32xf32>
    %299 = vector.broadcast %298 : vector<1x32xf32> to vector<16x32xf32>
    %300 = arith.addf %296, %299 : vector<16x32xf32>
    %cst_115 = arith.constant dense<0.000000e+00> : vector<16xf32>
    %301 = vector.multi_reduction <add>, %300, %cst_115 [1] : vector<16x32xf32> to vector<16xf32>
    %302 = vector.shape_cast %301 : vector<16xf32> to vector<16x1xf32>
    %cst_116 = arith.constant 3.200000e+01 : f32
    %303 = vector.broadcast %cst_116 : f32 to vector<16x1xf32>
    %304 = arith.divf %302, %303 : vector<16x1xf32>
    %305 = vector.broadcast %304 : vector<16x1xf32> to vector<16x32xf32>
    %306 = arith.subf %300, %305 : vector<16x32xf32>
    %307 = arith.mulf %306, %306 : vector<16x32xf32>
    %cst_117 = arith.constant dense<0.000000e+00> : vector<16xf32>
    %308 = vector.multi_reduction <add>, %307, %cst_117 [1] : vector<16x32xf32> to vector<16xf32>
    %309 = vector.shape_cast %308 : vector<16xf32> to vector<16x1xf32>
    %cst_118 = arith.constant 3.200000e+01 : f32
    %310 = vector.broadcast %cst_118 : f32 to vector<16x1xf32>
    %311 = arith.divf %309, %310 : vector<16x1xf32>
    %312 = vector.broadcast %304 : vector<16x1xf32> to vector<16x32xf32>
    %313 = arith.subf %300, %312 : vector<16x32xf32>
    %cst_119 = arith.constant 9.99999974E-6 : f32
    %314 = vector.broadcast %cst_119 : f32 to vector<16x1xf32>
    %315 = arith.addf %311, %314 : vector<16x1xf32>
    %316 = math.rsqrt %315 : vector<16x1xf32>
    %317 = vector.broadcast %316 : vector<16x1xf32> to vector<16x32xf32>
    %318 = arith.mulf %313, %317 : vector<16x32xf32>
    %c0_120 = arith.constant 0 : index
    %c0_121 = arith.constant 0 : index
    %c0_122 = arith.constant 0 : index
    %319 = vector.load %arg21[%c0_120, %c0_121, %c0_122] : memref<1x1x32xf32, #tpu.memory_space<vmem>>, vector<1x1x32xf32>
    %320 = vector.shape_cast %319 : vector<1x1x32xf32> to vector<1x32xf32>
    %321 = vector.broadcast %320 : vector<1x32xf32> to vector<16x32xf32>
    %322 = arith.mulf %318, %321 : vector<16x32xf32>
    %c0_123 = arith.constant 0 : index
    %c0_124 = arith.constant 0 : index
    %c0_125 = arith.constant 0 : index
    %323 = vector.load %arg22[%c0_123, %c0_124, %c0_125] : memref<1x1x32xf32, #tpu.memory_space<vmem>>, vector<1x1x32xf32>
    %324 = vector.shape_cast %323 : vector<1x1x32xf32> to vector<1x32xf32>
    %325 = vector.broadcast %324 : vector<1x32xf32> to vector<16x32xf32>
    %326 = arith.addf %322, %325 : vector<16x32xf32>
    %c0_126 = arith.constant 0 : index
    %c0_127 = arith.constant 0 : index
    %327 = vector.load %arg26[%c0_126, %c0_127] : memref<16x32xf32, #tpu.memory_space<vmem>>, vector<16x32xf32>
    tpu.vector_store %arg26[%c0_126, %c0_127], %326 {strides = array<i32>} : memref<16x32xf32, #tpu.memory_space<vmem>>, vector<16x32xf32>,
    %c1_i32 = arith.constant 1 : i32
    %328 = arith.cmpi eq, %arg0, %c1_i32 : i32
    %329 = arith.extui %328 : i1 to i32
    %c0_i32_128 = arith.constant 0 : i32
    %330 = arith.cmpi ne, %329, %c0_i32_128 : i32
    scf.if %330 {
      %331 = arith.truncf %326 : vector<16x32xf32> to vector<16x32xbf16>
      %c0_129 = arith.constant 0 : index
      %c0_130 = arith.constant 0 : index
      %332 = vector.load %arg23[%c0_129, %c0_130] : memref<32x128xbf16, #tpu.memory_space<vmem>>, vector<32x128xbf16>
      %cst_131 = arith.constant dense<0.000000e+00> : vector<16x128xf32>
      %333 = tpu.matmul %331, %332, %cst_131 {dimension_numbers = #tpu.dot_dimension_numbers<[1], [0], [0], [1], [0, 0, 1, 1], [], []>} : vector<16x32xbf16>, vector<32x128xbf16>, vector<16x128xf32> -> vector<16x128xf32>
      %c0_132 = arith.constant 0 : index
      %c0_133 = arith.constant 0 : index
      %334 = vector.load %arg24[%c0_132, %c0_133] : memref<1x128xf32, #tpu.memory_space<vmem>>, vector<1x128xf32>
      %335 = vector.broadcast %334 : vector<1x128xf32> to vector<16x128xf32>
      %336 = arith.addf %333, %335 : vector<16x128xf32>
      %c0_134 = arith.constant 0 : index
      %c0_135 = arith.constant 0 : index
      %337 = vector.load %arg25[%c0_134, %c0_135] : memref<16x128xf32, #tpu.memory_space<vmem>>, vector<16x128xf32>
      tpu.vector_store %arg25[%c0_134, %c0_135], %336 {strides = array<i32>} : memref<16x128xf32, #tpu.memory_space<vmem>>, vector<16x128xf32>,
    } else {
    }
    return
  }
  func.func @transform_0(%arg0: i32) -> (i32, i32) {
    %c0_i32 = arith.constant 0 : i32
    %c0_i32_0 = arith.constant 0 : i32
    %c0_i32_1 = arith.constant 0 : i32
    return %c0_i32, %c0_i32_0 : i32, i32
  }
  func.func @transform_1(%arg0: i32) -> (i32, i32) {
    %c0_i32 = arith.constant 0 : i32
    %c0_i32_0 = arith.constant 0 : i32
    %c0_i32_1 = arith.constant 0 : i32
    return %c0_i32, %c0_i32_0 : i32, i32
  }
  func.func @transform_2(%arg0: i32) -> (i32, i32, i32) {
    %c0_i32 = arith.constant 0 : i32
    %c0_i32_0 = arith.constant 0 : i32
    %c0_i32_1 = arith.constant 0 : i32
    return %arg0, %c0_i32, %c0_i32_0 : i32, i32, i32
  }
  func.func @transform_3(%arg0: i32) -> (i32, i32, i32) {
    %c0_i32 = arith.constant 0 : i32
    %c0_i32_0 = arith.constant 0 : i32
    %c0_i32_1 = arith.constant 0 : i32
    return %arg0, %c0_i32, %c0_i32_0 : i32, i32, i32
  }
  func.func @transform_4(%arg0: i32) -> (i32, i32, i32) {
    %c0_i32 = arith.constant 0 : i32
    %c0_i32_0 = arith.constant 0 : i32
    %c0_i32_1 = arith.constant 0 : i32
    return %arg0, %c0_i32, %c0_i32_0 : i32, i32, i32
  }
  func.func @transform_5(%arg0: i32) -> (i32, i32, i32) {
    %c0_i32 = arith.constant 0 : i32
    %c0_i32_0 = arith.constant 0 : i32
    %c0_i32_1 = arith.constant 0 : i32
    return %arg0, %c0_i32, %c0_i32_0 : i32, i32, i32
  }
  func.func @transform_6(%arg0: i32) -> (i32, i32, i32) {
    %c0_i32 = arith.constant 0 : i32
    %c0_i32_0 = arith.constant 0 : i32
    %c0_i32_1 = arith.constant 0 : i32
    return %arg0, %c0_i32, %c0_i32_0 : i32, i32, i32
  }
  func.func @transform_7(%arg0: i32) -> (i32, i32, i32) {
    %c0_i32 = arith.constant 0 : i32
    %c0_i32_0 = arith.constant 0 : i32
    %c0_i32_1 = arith.constant 0 : i32
    return %arg0, %c0_i32, %c0_i32_0 : i32, i32, i32
  }
  func.func @transform_8(%arg0: i32) -> (i32, i32, i32) {
    %c0_i32 = arith.constant 0 : i32
    %c0_i32_0 = arith.constant 0 : i32
    %c0_i32_1 = arith.constant 0 : i32
    return %arg0, %c0_i32, %c0_i32_0 : i32, i32, i32
  }
  func.func @transform_9(%arg0: i32) -> (i32, i32, i32) {
    %c0_i32 = arith.constant 0 : i32
    %c0_i32_0 = arith.constant 0 : i32
    %c0_i32_1 = arith.constant 0 : i32
    return %arg0, %c0_i32, %c0_i32_0 : i32, i32, i32
  }
  func.func @transform_10(%arg0: i32) -> (i32, i32, i32) {
    %c0_i32 = arith.constant 0 : i32
    %c0_i32_0 = arith.constant 0 : i32
    %c0_i32_1 = arith.constant 0 : i32
    return %arg0, %c0_i32, %c0_i32_0 : i32, i32, i32
  }
  func.func @transform_11(%arg0: i32) -> (i32, i32, i32) {
    %c0_i32 = arith.constant 0 : i32
    %c0_i32_0 = arith.constant 0 : i32
    %c0_i32_1 = arith.constant 0 : i32
    return %arg0, %c0_i32, %c0_i32_0 : i32, i32, i32
  }
  func.func @transform_12(%arg0: i32) -> (i32, i32, i32) {
    %c0_i32 = arith.constant 0 : i32
    %c0_i32_0 = arith.constant 0 : i32
    %c0_i32_1 = arith.constant 0 : i32
    return %arg0, %c0_i32, %c0_i32_0 : i32, i32, i32
  }
  func.func @transform_13(%arg0: i32) -> (i32, i32, i32) {
    %c0_i32 = arith.constant 0 : i32
    %c0_i32_0 = arith.constant 0 : i32
    %c0_i32_1 = arith.constant 0 : i32
    return %arg0, %c0_i32, %c0_i32_0 : i32, i32, i32
  }
  func.func @transform_14(%arg0: i32) -> (i32, i32, i32) {
    %c0_i32 = arith.constant 0 : i32
    %c0_i32_0 = arith.constant 0 : i32
    %c0_i32_1 = arith.constant 0 : i32
    return %arg0, %c0_i32, %c0_i32_0 : i32, i32, i32
  }
  func.func @transform_15(%arg0: i32) -> (i32, i32, i32) {
    %c0_i32 = arith.constant 0 : i32
    %c0_i32_0 = arith.constant 0 : i32
    %c0_i32_1 = arith.constant 0 : i32
    return %arg0, %c0_i32, %c0_i32_0 : i32, i32, i32
  }
  func.func @transform_16(%arg0: i32) -> (i32, i32, i32) {
    %c0_i32 = arith.constant 0 : i32
    %c0_i32_0 = arith.constant 0 : i32
    %c0_i32_1 = arith.constant 0 : i32
    return %arg0, %c0_i32, %c0_i32_0 : i32, i32, i32
  }
  func.func @transform_17(%arg0: i32) -> (i32, i32, i32) {
    %c0_i32 = arith.constant 0 : i32
    %c0_i32_0 = arith.constant 0 : i32
    %c0_i32_1 = arith.constant 0 : i32
    return %arg0, %c0_i32, %c0_i32_0 : i32, i32, i32
  }
  func.func @transform_18(%arg0: i32) -> (i32, i32, i32) {
    %c0_i32 = arith.constant 0 : i32
    %c0_i32_0 = arith.constant 0 : i32
    %c0_i32_1 = arith.constant 0 : i32
    return %arg0, %c0_i32, %c0_i32_0 : i32, i32, i32
  }
  func.func @transform_19(%arg0: i32) -> (i32, i32, i32) {
    %c0_i32 = arith.constant 0 : i32
    %c0_i32_0 = arith.constant 0 : i32
    %c0_i32_1 = arith.constant 0 : i32
    return %arg0, %c0_i32, %c0_i32_0 : i32, i32, i32
  }
  func.func @transform_20(%arg0: i32) -> (i32, i32, i32) {
    %c0_i32 = arith.constant 0 : i32
    %c0_i32_0 = arith.constant 0 : i32
    %c0_i32_1 = arith.constant 0 : i32
    return %arg0, %c0_i32, %c0_i32_0 : i32, i32, i32
  }
  func.func @transform_21(%arg0: i32) -> (i32, i32, i32) {
    %c0_i32 = arith.constant 0 : i32
    %c0_i32_0 = arith.constant 0 : i32
    %c0_i32_1 = arith.constant 0 : i32
    return %arg0, %c0_i32, %c0_i32_0 : i32, i32, i32
  }
  func.func @transform_22(%arg0: i32) -> (i32, i32) {
    %c0_i32 = arith.constant 0 : i32
    %c0_i32_0 = arith.constant 0 : i32
    %c0_i32_1 = arith.constant 0 : i32
    return %c0_i32, %c0_i32_0 : i32, i32
  }
  func.func @transform_23(%arg0: i32) -> (i32, i32) {
    %c0_i32 = arith.constant 0 : i32
    %c0_i32_0 = arith.constant 0 : i32
    %c0_i32_1 = arith.constant 0 : i32
    return %c0_i32, %c0_i32_0 : i32, i32
  }
  func.func @transform_24(%arg0: i32) -> (i32, i32) {
    %c0_i32 = arith.constant 0 : i32
    %c0_i32_0 = arith.constant 0 : i32
    %c0_i32_1 = arith.constant 0 : i32
    return %c0_i32, %c0_i32_0 : i32, i32
  }
}

</mosaic_0001>

<bundles_post_ra>
// kernel: tpu_custom_call.1
= control target key start
LH: loop header
LB: loop body
LE: loop exit
PB: predicated region body
PF: predicated region fallthrough
CT: control target
= control target key end

     0   :  { %s7817_s0 = inlined_call_operand.vmem [shape: f32[16,32], index: 0, kind: input, shape index: {}]   ;;  %s7818_s1 = inlined_call_operand.vmem [shape: f32[16,32], index: 1, kind: input, shape index: {}]   ;;  %s7819_s2 = inlined_call_operand.vmem [shape: bf16[2,32,96], index: 2, kind: input, shape index: {}]   ;;  %s7820_s3 = inlined_call_operand.vmem [shape: f32[2,1,96], index: 3, kind: input, shape index: {}]   ;;  %s7821_s4 = inlined_call_operand.vmem [shape: bf16[2,32,32], index: 4, kind: input, shape index: {}]   ;;  %s7822_s5 = inlined_call_operand.vmem [shape: f32[2,1,32], index: 5, kind: input, shape index: {}]   ;;  %s7823_s6 = inlined_call_operand.vmem [shape: bf16[2,32,32], index: 6, kind: input, shape index: {}]   ;;  %s7824_s7 = inlined_call_operand.vmem [shape: f32[2,1,32], index: 7, kind: input, shape index: {}]   ;;  %s7825_s8 = inlined_call_operand.vmem [shape: bf16[2,32,64], index: 8, kind: input, shape index: {}]   ;;  %s7826_s9 = inlined_call_operand.vmem [shape: f32[2,1,64], index: 9, kind: input, shape index: {}]   ;;  %s7827_s10 = inlined_call_operand.vmem [shape: bf16[2,32,32], index: 10, kind: input, shape index: {}]   ;;  %s7828_s11 = inlined_call_operand.vmem [shape: f32[2,1,32], index: 11, kind: input, shape index: {}]   ;;  %s7829_s12 = inlined_call_operand.vmem [shape: bf16[2,32,2048], index: 12, kind: input, shape index: {}]   ;;  %s7830_s13 = inlined_call_operand.vmem [shape: f32[2,1,2048], index: 13, kind: input, shape index: {}]   ;;  %s7831_s14 = inlined_call_operand.vmem [shape: bf16[2,2048,32], index: 14, kind: input, shape index: {}]   ;;  %s7832_s15 = inlined_call_operand.vmem [shape: f32[2,1,32], index: 15, kind: input, shape index: {}]   ;;  %s7833_s16 = inlined_call_operand.vmem [shape: f32[2,1,32], index: 16, kind: input, shape index: {}]   ;;  %s7834_s17 = inlined_call_operand.vmem [shape: f32[2,1,32], index: 17, kind: input, shape index: {}]   ;;  %s7835_s18 = inlined_call_operand.vmem [shape: f32[2,1,32], index: 18, kind: input, shape index: {}]   ;;  %s7836_s19 = inlined_call_operand.vmem [shape: f32[2,1,32], index: 19, kind: input, shape index: {}]   ;;  %s7837_s20 = inlined_call_operand.vmem [shape: f32[2,1,32], index: 20, kind: input, shape index: {}]   ;;  %s7838_s21 = inlined_call_operand.vmem [shape: f32[2,1,32], index: 21, kind: input, shape index: {}]   ;;  %s7839_s22 = inlined_call_operand.vmem [shape: bf16[32,128], index: 22, kind: input, shape index: {}]   ;;  %s7840_s23 = inlined_call_operand.vmem [shape: f32[1,128], index: 23, kind: input, shape index: {}]   ;;  %s7841_s24 = inlined_call_operand.hbm [shape: f32[16,128], index: 24, kind: output, shape index: {}]  }
   0x1   :  { %7852 = sst [smem:[#allocation11_spill]] %s7817_s0 }
   0x2   :  { %7853 = sst [smem:[#allocation12_spill]] %s7818_s1 }
   0x3   :  { %7854 = sst [smem:[#allocation13_spill]] %s7819_s2 }
   0x4   :  { %7855 = sst [smem:[#allocation14_spill]] %s7820_s3 }
   0x5   :  { %7856 = sst [smem:[#allocation15_spill]] %s7821_s4 }
   0x6   :  { %7857 = sst [smem:[#allocation16_spill]] %s7822_s5 }
   0x7   :  { %7858 = sst [smem:[#allocation17_spill]] %s7823_s6 }
   0x8   :  { %7859 = sst [smem:[#allocation18_spill]] %s7824_s7 }
   0x9   :  { %7860 = sst [smem:[#allocation19_spill]] %s7825_s8 }
   0xa   :  { %7861 = sst [smem:[#allocation20_spill]] %s7827_s10 }
   0xb   :  { %7862 = sst [smem:[#allocation21_spill]] %s7829_s12 }
   0xc   :  { %7863 = sst [smem:[#allocation22_spill]] %s7830_s13 }
   0xd   :  { %7864 = sst [smem:[#allocation23_spill]] %s7831_s14 }
   0xe   :  { %7865 = sst [smem:[#allocation24_spill]] %s7838_s21 }
   0xf   :  { %7866 = sst [smem:[#allocation25_spill]] %s7839_s22 }
  0x10   :  { %7867 = sst [smem:[#allocation26_spill]] %s7840_s23 }
  0x11   :  { %7868 = sst [smem:[#allocation27_spill]] %s7841_s24 }
  0x12   :  { %29 = vsyncpa [#allocation4], 0  ;;  %s6940_s5 = smov 0  }
  0x13 LB: > { %7869 = sst [smem:[#allocation6_spill]] %s6792_s5  ;;  %s6946_s26 = sadd.s32 4294967295, %s6792_s5   ;;  %s6792_s5 = sphi %s6940_s5, %s35_s5  }
  0x14   : > { %7870 = sst [smem:[#allocation7_spill]] %s6946_s26  ;;  %p5715_p0 = scmp.ge.s32.totalorder %s6792_s5, 1 }
  0x15   : > { %p823_p1 = scmp.lt.s32.totalorder %s6792_s5, 3 }
  0x17   : > { %p824_p2 = pnand %p5715_p0, %p823_p1 }
  0x19   : > { %827 = sbr.rel (%p824_p2) target bundleno = 7763 (0x1e53), region = 116 }
  0x20   : > { %p954_p3 = scmp.lt.s32.totalorder %s6946_s26, 1  ;;  %s7872_s3 = sld [smem:[#allocation13_spill]] }
  0x21   : > { %s7873_s1 = sld [smem:[#allocation15_spill]]  ;;  %s7876_s2 = sld [smem:[#allocation17_spill]] }
  0x22   : > { %s6952_s27 = scalar_select %p954_p3, %s6946_s26, 1 }
  0x23   : > { %s7880_s10 = sld [smem:[#allocation20_spill]]  ;;  %s7882_s12 = sld [smem:[#allocation21_spill]] }
  0x24   : > { %s5968_s28 = sshll.u32 %s6952_s27, 4  ;;  %s5973_s30 = sshll.u32 %s6952_s27, 8 }
  0x25   : > { %s7883_s13 = sld [smem:[#allocation22_spill]]  ;;  %s5974_s24 = sshll.u32 %s6952_s27, 10 }
  0x26   : > { %s6962_s25 = scalar_lea.vmem %s7872_s3, %s5968_s28  ;;  %s7884_s14 = sld [smem:[#allocation23_spill]] }
  0x27   : > { %s6967_s5 = scalar_lea.vmem %s7873_s1, %s5968_s28  ;;  %s6976_s29 = scalar_lea.vmem %s7876_s2, %s5968_s28 }
  0x28   : > { %7874 = sst [smem:[#allocation8_spill]] %s6967_s5  ;;  %s7879_s1 = sld [smem:[#allocation19_spill]] }
  0x29   : > { %7877 = sst [smem:[#allocation9_spill]] %s6976_s29  ;;  %s6994_s6 = scalar_lea.vmem %s7880_s10, %s5968_s28 }
  0x2a   : > { %7881 = sst [smem:[#allocation10_spill]] %s6994_s6  ;;  %s7004_s8 = scalar_lea.vmem %s7882_s12, %s5973_s30 }
  0x2b   : > { %s7009_s23 = scalar_lea.vmem %s7883_s13, %s5968_s28  ;;  %s1019_s12 = scalar_lea.vmem %s7835_s18, %s6952_s27 }
  0x2c   : > { %s7019_s29 = scalar_lea.vmem %s7884_s14, %s5974_s24  ;;  %s7886_s0 = sld [smem:[#allocation7_spill]] }
  0x2e   : > { %s6985_s5 = scalar_lea.vmem %s7879_s1, %s5968_s28 }
  0x32   : > { %p5731_p4 = scmp.ne.s32.totalorder %s7886_s0, 0 }
  0x33   : > { %s7887_s4 = sld [smem:[#allocation11_spill]] (!%p5731_p4)  ;;  %vm1036_vm0 = vcmask (!%p5731_p4), 261120  }
  0x34   : > { %1033 = sbr.rel (%p5731_p4) target bundleno = 59 (0x3b), region = 120 }
  0x39   : > { %v1034_v0 = vld [vmem:[%s7887_s4] sm:$0xff] (!%p5731_p4)  ;;  %v1035_v1 = vld [vmem:[%s7887_s4 + $0x8] sm:$0xff] (!%p5731_p4) }
  0x3a   : > { %1037 = vst.msk [vmem:[#allocation2] sm:$0xff] (!%p5731_p4), %vm1036_vm0, %v1034_v0  ;;  %1038 = vst.msk [vmem:[#allocation2 + $0x8] sm:$0xff] (!%p5731_p4), %vm1036_vm0, %v1035_v1 }
  0x3b PF: > { %v6538_v2 = vld [vmem:[%s6962_s25] sm:$0xff]   ;;  %v6794_v3 = vmov 0.0   ;;  %v6539_v4 = vld [vmem:[%s6962_s25 + $0x8] sm:$0xff]   ;;  %vm6795_vm1 = vmmov 0   ;;  %vm1067_vm2 = vcmask 261120   ;;  %s7888_s25 = sld [smem:[#allocation14_spill]]  ;;  %s7895_s6 = scalar_lea.vmem %s7833_s16, %s6952_s27 }
  0x3c   : > { %6233 = vmatprep.subr.bf16.mxu0 %v6794_v3  ;;  %6241 = vmatprep.subr.bf16.mxu1 %v6794_v3  ;;  %s6796_s0 = smov 96   ;;  %vm1117_vm3 = vcmask 64512   ;;  %s6797_s22 = smov 64   ;;  %vm1244_vm4 = vcmask 1043456   ;;  %vm2028_vm5 = vcmask 130048   ;;  %vm2031_vm6 = vcmask 195584  }
  0x3d   : > { %6234 = vmatpush3.bf16.msra.mxu0 %v6538_v2  ;;  %6237 = vmatprep.mubr.msk.bf16.mxu0 %vm6795_vm1, %v6794_v3  ;;  %s6798_s10 = smov 88   ;;  %s6799_s24 = smov 120  }
  0x3e   : > { %6235 = vmatprep.subr.bf16.mxu0 %v6794_v3  ;;  %6243 = vmatprep.mubr.msk.bf16.mxu1 %vm6795_vm1, %v6794_v3  ;;  %s6800_s7 = smov 56   ;;  %s6801_s30 = smov 80  }
  0x3f   : > { %s6802_s3 = smov 112   ;;  %s6803_s28 = smov 48  }
  0x40   : > { %s6804_s1 = smov 72   ;;  %s6805_s13 = smov 104  }
  0x41   : > { %v1039_v5 = vld [vmem:[#allocation2] sm:$0xff]  ;;  %v1040_v6 = vld [vmem:[#allocation2 + $0x8] sm:$0xff]  ;;  %6236 = vmatpush3.bf16.msra.mxu0 %v6539_v4  ;;  %s7889_s21 = scalar_lea.vmem %s7888_s25, %s6952_s27  ;;  %s6806_s14 = smov 40  }
  0x42   : > { %v1043_v7 = vpack.c.bf16 %v1040_v6, %v1039_v5  ;;  %6247 = vmatprep.subr.bf16.mxu0 %v6794_v3  ;;  %v5732_v8 = vld [vmem:[%s7889_s21] ss:$0 sm:$0xff]  ;;  %s6807_s25 = smov 8   ;;  %s6808_s21 = smov 16  }
  0x44   : > { %6238 = vmatmul.mubr.msk.bf16.vlgmr.msra.gmra.mrb[0].mxu0 %vm1067_vm2, %v1043_v7 }
  0x45   : > { %6249 = vmatprep.mubr.msk.bf16.mxu0 %vm6795_vm1, %v6794_v3 }
 0x117   : > { %v1105_v9 = vpop.f32.mrb[0].mxu0 }
 0x118   : > { %v1106_v10 = vadd.f32 %v5732_v8, %v1105_v9  ;;  %v6239_v11 = vpop.f32.mrb[1].mxu0 }
 0x119   : > { %v1108_v12 = vpop.f32.mrb[2].mxu0 }
 0x11a   : > { %v7070_v13 = vpack.c.bf16 %v1106_v10, %v1106_v10  ;;  %v1109_v14 = vadd.f32 %v5732_v8, %v1108_v12  ;;  %v6240_v15 = vpop.f32.mrb[3].mxu0 }
 0x11c   : > { %1115 = vrot.lane.b32.xlu0 %v7070_v13, %s6796_s0  ;;  %v7074_v16 = vpack.c.bf16 %v1109_v14, %v1109_v14 }
 0x120   : > { %1165 = vrot.lane.b32.xlu0 %v7074_v16, %s6796_s0 }
 0x18e   : > { %v1116_v17 = vpop.permute.xlu0 %1115 }
 0x18f   : > { %v1122_v18 = vsel %vm1117_vm3, %v1116_v17, 0 }
 0x190   : > { %6242 = vmatpush3.bf16.xpose.msra.mxu1 %v1122_v18 }
 0x191   : > { %6253 = vmatprep.subr.bf16.mxu1 %v6794_v3 }
 0x192   : > { %v1166_v19 = vpop.permute.xlu0 %1165 }
 0x193   : > { %v1171_v20 = vsel %vm1117_vm3, %v1166_v19, 0 }
 0x194   : > { %6248 = vmatpush3.bf16.xpose.msra.mxu0 %v1171_v20 }
 0x195   : > { %6259 = vmatprep.subr.bf16.mxu0 %v6794_v3 }
 0x197   : > { %6244 = vmatmul.mubr.msk.bf16.vlgmr.msra.gmra.mrb[0].mxu1 %vm1117_vm3, %v7070_v13 }
 0x198   : > { %6255 = vmatprep.mubr.msk.bf16.mxu1 %vm6795_vm1, %v6794_v3 }
 0x19b   : > { %6250 = vmatmul.mubr.msk.bf16.vlgmr.msra.gmra.mrb[4].mxu0 %vm1117_vm3, %v7074_v16 }
 0x19c   : > { %6261 = vmatprep.mubr.msk.bf16.mxu0 %vm6795_vm1, %v6794_v3 }
 0x26a   : > { %v1158_v21 = vpop.f32.mrb[0].mxu1 }
 0x26b   : > { %v1213_v22 = vmul.f32 0.35355338, %v1158_v21  ;;  %v6245_v23 = vpop.f32.mrb[1].mxu1 }
 0x26c   : > { %v1161_v24 = vpop.f32.mrb[2].mxu1 }
 0x26d   : > { %v6246_v25 = vpop.f32.mrb[3].mxu1  ;;  %v1215_v26 = vsel %vm1117_vm3, %v1213_v22, -inf }
 0x26e   : > { %1216 = vmax.xlane.f32.xlu1 %v1215_v26  ;;  %v1207_v27 = vpop.f32.mrb[4].mxu0 }
 0x26f   : > { %v1214_v28 = vmul.f32 0.35355338, %v1207_v27  ;;  %v6251_v29 = vpop.f32.mrb[5].mxu0 }
 0x270   : > { %v1210_v30 = vpop.f32.mrb[6].mxu0 }
 0x271   : > { %v6252_v31 = vpop.f32.mrb[7].mxu0  ;;  %v1218_v32 = vsel %vm1117_vm3, %v1214_v28, -inf }
 0x272   : > { %1219 = vmax.xlane.f32.xlu1 %v1218_v32 }
 0x283   : > { %1239 = vrot.lane.b32.xlu1 %v7070_v13, %s6797_s22 }
 0x287   : > { %1288 = vrot.lane.b32.xlu1 %v7074_v16, %s6797_s22  ;;  %s7890_s22 = sld [smem:[#allocation8_spill]] }
 0x28b   : > { %1338 = vrot.lane.b32.xlu1 %v7070_v13, %s6798_s10 }
 0x2fb   : > { %v1217_v33 = vpop.xlane.xlu1 %1216 }
 0x2fc   : > { %v1221_v34 = vsub.f32 %v1213_v22, %v1217_v33 }
 0x2fe   : > { %v1223_v35 = vmul.f32 1.442695, %v1221_v34 }
 0x2ff   : > { %v1220_v36 = vpop.xlane.xlu1 %1219 }
 0x300   : > { %6676 = vpow2.f32 %v1223_v35  ;;  %v1222_v37 = vsub.f32 %v1214_v28, %v1220_v36 }
 0x302   : > { %v1225_v38 = vmul.f32 1.442695, %v1222_v37 }
 0x303   : > { %v1240_v39 = vpop.permute.xlu1 %1239 }
 0x304   : > { %6678 = vpow2.f32 %v1225_v38  ;;  %v1246_v40 = vsel %vm1244_vm4, %v1240_v39, 0 }
 0x305   : > { %6254 = vmatpush3.bf16.msra.mxu1 %v1246_v40 }
 0x306   : > { %6265 = vmatprep.subr.bf16.mxu1 %v6794_v3 }
 0x307   : > { %v1289_v41 = vpop.permute.xlu1 %1288 }
 0x308   : > { %v1294_v42 = vsel %vm1244_vm4, %v1289_v41, 0 }
 0x309   : > { %6260 = vmatpush3.bf16.msra.mxu0 %v1294_v42 }
 0x30a   : > { %v6677_v43 = vpop.eup %6676  ;;  %6271 = vmatprep.subr.bf16.mxu0 %v6794_v3 }
 0x30b   : > { %v1227_v44 = vsel %vm1117_vm3, %v6677_v43, 0.0  ;;  %v1339_v47 = vpop.permute.xlu1 %1338 }
 0x30c   : > { %1228 = vadd.xlane.f32.xlu0 %v1227_v44  ;;  %v1344_v54 = vsel %vm1117_vm3, %v1339_v47, 0 }
 0x30e   : > { %v6679_v45 = vpop.eup %6678 }
 0x30f   : > { %v1230_v46 = vsel %vm1117_vm3, %v6679_v45, 0.0 }
 0x310   : > { %1231 = vadd.xlane.f32.xlu1 %v1230_v46 }
 0x321   : > { %1388 = vrot.lane.b32.xlu1 %v7074_v16, %s6798_s10 }
 0x322   : > { %1336 = vrot.lane.b32.xlu0 %v7070_v13, %s6799_s24 }
 0x325   : > { %1386 = vrot.lane.b32.xlu1 %v7074_v16, %s6799_s24 }
 0x399   : > { %v1229_v48 = vpop.xlane.xlu0 %1228 }
 0x39a   : > { %6680 = vrcp.f32 %v1229_v48 }
 0x39d   : > { %v1232_v49 = vpop.xlane.xlu1 %1231  ;;  %v1337_v59 = vpop.permute.xlu0 %1336 }
 0x39e   : > { %6682 = vrcp.f32 %v1232_v49 }
 0x3a1   : > { %v1389_v56 = vpop.permute.xlu1 %1388 }
 0x3a2   : > { %v1394_v58 = vsel %vm1117_vm3, %v1389_v56, 0 }
 0x3a4   : > { %v6681_v50 = vpop.eup %6680 }
 0x3a5   : > { %v1235_v51 = vmul.f32 %v6681_v50, %v6677_v43  ;;  %v1387_v60 = vpop.permute.xlu1 %1386 }
 0x3a7   : > { %v1237_v52 = vpack.c.bf16 %v1235_v51, %v1235_v51 }
 0x3a8   : > { %v6683_v53 = vpop.eup %6682 }
 0x3a9   : > { %v1236_v55 = vmul.f32 %v6683_v53, %v6679_v45  ;;  %6256 = vmatmul.mubr.msk.bf16.vlgmr.msra.gmra.mrb[4].mxu1 %vm1117_vm3, %v1237_v52 }
 0x3aa   : > { %6266 = vmatpush3.bf16.xpose.msra.mxu1 %v1344_v54  ;;  %6267 = vmatprep.mubr.msk.bf16.mxu1 %vm6795_vm1, %v6794_v3 }
 0x3ab   : > { %v1238_v57 = vpack.c.bf16 %v1236_v55, %v1236_v55  ;;  %6277 = vmatprep.subr.bf16.mxu1 %v6794_v3 }
 0x3ad   : > { %6262 = vmatmul.mubr.msk.bf16.vlgmr.msra.gmra.mrb[8].mxu0 %vm1117_vm3, %v1238_v57 }
 0x3ae   : > { %6272 = vmatpush3.bf16.xpose.msra.mxu0 %v1394_v58  ;;  %6273 = vmatprep.mubr.msk.bf16.mxu0 %vm6795_vm1, %v6794_v3 }
 0x3af   : > { %6283 = vmatprep.subr.bf16.mxu0 %v6794_v3 }
 0x3b1   : > { %6268 = vmatmul.mubr.msk.bf16.vlgmr.msra.gmra.mrb[8].mxu1 %vm1117_vm3, %v1337_v59 }
 0x3b2   : > { %6279 = vmatprep.mubr.msk.bf16.mxu1 %vm6795_vm1, %v6794_v3 }
 0x3b5   : > { %6274 = vmatmul.mubr.msk.bf16.vlgmr.msra.gmra.mrb[12].mxu0 %vm1117_vm3, %v1387_v60 }
 0x3b6   : > { %6285 = vmatprep.mubr.msk.bf16.mxu0 %vm6795_vm1, %v6794_v3 }
 0x47c   : > { %v7124_v61 = vpop.f32.mrb[4].mxu1 }
 0x47d   : > { %v6257_v62 = vpop.f32.mrb[5].mxu1 }
 0x47e   : > { %v1285_v63 = vpop.f32.mrb[6].mxu1 }
 0x47f   : > { %v6258_v0 = vpop.f32.mrb[7].mxu1 }
 0x480   : > { %v7126_v1 = vpop.f32.mrb[8].mxu0 }
 0x481   : > { %v6263_v2 = vpop.f32.mrb[9].mxu0 }
 0x482   : > { %v1333_v4 = vpop.f32.mrb[10].mxu0 }
 0x483   : > { %v6264_v5 = vpop.f32.mrb[11].mxu0 }
 0x484   : > { %v1380_v6 = vpop.f32.mrb[8].mxu1 }
 0x485   : > { %v1436_v7 = vmul.f32 0.35355338, %v1380_v6  ;;  %v6269_v8 = vpop.f32.mrb[9].mxu1 }
 0x486   : > { %v1383_v9 = vpop.f32.mrb[10].mxu1 }
 0x487   : > { %v6270_v10 = vpop.f32.mrb[11].mxu1  ;;  %v1438_v11 = vsel %vm1117_vm3, %v1436_v7, -inf }
 0x488   : > { %1439 = vmax.xlane.f32.xlu1 %v1438_v11  ;;  %v1430_v12 = vpop.f32.mrb[12].mxu0 }
 0x489   : > { %v1437_v14 = vmul.f32 0.35355338, %v1430_v12  ;;  %v6275_v15 = vpop.f32.mrb[13].mxu0 }
 0x48a   : > { %v1433_v17 = vpop.f32.mrb[14].mxu0 }
 0x48b   : > { %v6276_v18 = vpop.f32.mrb[15].mxu0  ;;  %v1441_v19 = vsel %vm1117_vm3, %v1437_v14, -inf }
 0x48c   : > { %1442 = vmax.xlane.f32.xlu0 %v1441_v19 }
 0x499   : > { %1462 = vrot.lane.b32.xlu1 %v7070_v13, %s6800_s7 }
 0x49d   : > { %1560 = vrot.lane.b32.xlu1 %v7070_v13, %s6801_s30 }
 0x4a2   : > { %1510 = vrot.lane.b32.xlu0 %v7074_v16, %s6800_s7  ;;  %s6809_s7 = smov 24  }
 0x4a6   : > { %1558 = vrot.lane.b32.xlu0 %v7070_v13, %s6802_s3 }
 0x515   : > { %v1440_v20 = vpop.xlane.xlu1 %1439 }
 0x516   : > { %v1444_v21 = vsub.f32 %v1436_v7, %v1440_v20 }
 0x518   : > { %v1446_v22 = vmul.f32 1.442695, %v1444_v21 }
 0x519   : > { %v1463_v23 = vpop.permute.xlu1 %1462  ;;  %v1443_v24 = vpop.xlane.xlu0 %1442 }
 0x51a   : > { %6684 = vpow2.f32 %v1446_v22  ;;  %v1468_v25 = vsel %vm1244_vm4, %v1463_v23, 0  ;;  %v1445_v26 = vsub.f32 %v1437_v14, %v1443_v24 }
 0x51b   : > { %6278 = vmatpush3.bf16.msra.mxu1 %v1468_v25 }
 0x51c   : > { %v1448_v27 = vmul.f32 1.442695, %v1445_v26  ;;  %6289 = vmatprep.subr.bf16.mxu1 %v6794_v3 }
 0x51d   : > { %v1511_v28 = vpop.permute.xlu0 %1510  ;;  %v1561_v34 = vpop.permute.xlu1 %1560 }
 0x51e   : > { %6686 = vpow2.f32 %v1448_v27  ;;  %v1516_v29 = vsel %vm1244_vm4, %v1511_v28, 0  ;;  %v1566_v41 = vsel %vm1117_vm3, %v1561_v34, 0 }
 0x51f   : > { %6284 = vmatpush3.bf16.msra.mxu0 %v1516_v29 }
 0x520   : > { %6295 = vmatprep.subr.bf16.mxu0 %v6794_v3 }
 0x521   : > { %v1559_v46 = vpop.permute.xlu0 %1558 }
 0x524   : > { %v6685_v30 = vpop.eup %6684 }
 0x525   : > { %v1450_v31 = vsel %vm1117_vm3, %v6685_v30, 0.0 }
 0x526   : > { %1451 = vadd.xlane.f32.xlu1 %v1450_v31 }
 0x528   : > { %v6687_v32 = vpop.eup %6686 }
 0x529   : > { %v1453_v33 = vsel %vm1117_vm3, %v6687_v32, 0.0 }
 0x52a   : > { %1454 = vadd.xlane.f32.xlu1 %v1453_v33 }
 0x53b   : > { %1610 = vrot.lane.b32.xlu1 %v7074_v16, %s6801_s30 }
 0x53f   : > { %1608 = vrot.lane.b32.xlu1 %v7074_v16, %s6802_s3 }
 0x5b3   : > { %v1452_v35 = vpop.xlane.xlu1 %1451 }
 0x5b4   : > { %6688 = vrcp.f32 %v1452_v35 }
 0x5b7   : > { %v1455_v36 = vpop.xlane.xlu1 %1454 }
 0x5b8   : > { %6690 = vrcp.f32 %v1455_v36 }
 0x5bb   : > { %v1611_v43 = vpop.permute.xlu1 %1610 }
 0x5bc   : > { %v1616_v45 = vsel %vm1117_vm3, %v1611_v43, 0 }
 0x5be   : > { %v6689_v37 = vpop.eup %6688 }
 0x5bf   : > { %v1458_v38 = vmul.f32 %v6689_v37, %v6685_v30  ;;  %v1609_v47 = vpop.permute.xlu1 %1608 }
 0x5c1   : > { %v1460_v39 = vpack.c.bf16 %v1458_v38, %v1458_v38 }
 0x5c2   : > { %v6691_v40 = vpop.eup %6690 }
 0x5c3   : > { %v1459_v42 = vmul.f32 %v6691_v40, %v6687_v32  ;;  %6280 = vmatmul.mubr.msk.bf16.vlgmr.msra.gmra.mrb[12].mxu1 %vm1117_vm3, %v1460_v39 }
 0x5c4   : > { %6290 = vmatpush3.bf16.xpose.msra.mxu1 %v1566_v41  ;;  %6291 = vmatprep.mubr.msk.bf16.mxu1 %vm6795_vm1, %v6794_v3 }
 0x5c5   : > { %v1461_v44 = vpack.c.bf16 %v1459_v42, %v1459_v42  ;;  %6301 = vmatprep.subr.bf16.mxu1 %v6794_v3 }
 0x5c7   : > { %6286 = vmatmul.mubr.msk.bf16.vlgmr.msra.gmra.mrb[16].mxu0 %vm1117_vm3, %v1461_v44 }
 0x5c8   : > { %6296 = vmatpush3.bf16.xpose.msra.mxu0 %v1616_v45  ;;  %6297 = vmatprep.mubr.msk.bf16.mxu0 %vm6795_vm1, %v6794_v3 }
 0x5c9   : > { %6307 = vmatprep.subr.bf16.mxu0 %v6794_v3 }
 0x5cb   : > { %6292 = vmatmul.mubr.msk.bf16.vlgmr.msra.gmra.mrb[16].mxu1 %vm1117_vm3, %v1559_v46 }
 0x5cc   : > { %6303 = vmatprep.mubr.msk.bf16.mxu1 %vm6795_vm1, %v6794_v3 }
 0x5cf   : > { %6298 = vmatmul.mubr.msk.bf16.vlgmr.msra.gmra.mrb[20].mxu0 %vm1117_vm3, %v1609_v47 }
 0x5d0   : > { %6309 = vmatprep.mubr.msk.bf16.mxu0 %vm6795_vm1, %v6794_v3 }
 0x696   : > { %v7162_v48 = vpop.f32.mrb[12].mxu1 }
 0x697   : > { %v6281_v49 = vpop.f32.mrb[13].mxu1 }
 0x698   : > { %v1507_v50 = vpop.f32.mrb[14].mxu1 }
 0x699   : > { %v6282_v51 = vpop.f32.mrb[15].mxu1 }
 0x69a   : > { %v7164_v52 = vpop.f32.mrb[16].mxu0 }
 0x69b   : > { %v6508_v53 = vpack.i.bf16 %v7164_v52, %v7162_v48  ;;  %v6287_v54 = vpop.f32.mrb[17].mxu0 }
 0x69c   : > { %v1555_v55 = vpop.f32.mrb[18].mxu0 }
 0x69d   : > { %v6288_v56 = vpop.f32.mrb[19].mxu0 }
 0x69e   : > { %v1602_v57 = vpop.f32.mrb[16].mxu1 }
 0x69f   : > { %v1658_v58 = vmul.f32 0.35355338, %v1602_v57  ;;  %v6293_v59 = vpop.f32.mrb[17].mxu1 }
 0x6a0   : > { %v1605_v60 = vpop.f32.mrb[18].mxu1 }
 0x6a1   : > { %v6294_v62 = vpop.f32.mrb[19].mxu1  ;;  %v1660_v63 = vsel %vm1117_vm3, %v1658_v58, -inf }
 0x6a2   : > { %1661 = vmax.xlane.f32.xlu0 %v1660_v63  ;;  %v1652_v0 = vpop.f32.mrb[20].mxu0 }
 0x6a3   : > { %v1659_v2 = vmul.f32 0.35355338, %v1652_v0  ;;  %v6299_v4 = vpop.f32.mrb[21].mxu0 }
 0x6a4   : > { %v1655_v5 = vpop.f32.mrb[22].mxu0 }
 0x6a5   : > { %v6300_v6 = vpop.f32.mrb[23].mxu0  ;;  %v1663_v7 = vsel %vm1117_vm3, %v1659_v2, -inf }
 0x6a6   : > { %1664 = vmax.xlane.f32.xlu1 %v1663_v7 }
 0x6b7   : > { %1684 = vrot.lane.b32.xlu1 %v7070_v13, %s6803_s28 }
 0x6bb   : > { %1782 = vrot.lane.b32.xlu1 %v7070_v13, %s6804_s1 }
 0x6bf   : > { %1832 = vrot.lane.b32.xlu1 %v7074_v16, %s6804_s1 }
 0x6c3   : > { %1830 = vrot.lane.b32.xlu1 %v7074_v16, %s6805_s13 }
 0x72f   : > { %v1662_v8 = vpop.xlane.xlu0 %1661 }
 0x730   : > { %v1666_v9 = vsub.f32 %v1658_v58, %v1662_v8 }
 0x732   : > { %v1668_v10 = vmul.f32 1.442695, %v1666_v9 }
 0x733   : > { %v1665_v11 = vpop.xlane.xlu1 %1664 }
 0x734   : > { %6692 = vpow2.f32 %v1668_v10  ;;  %v1667_v12 = vsub.f32 %v1659_v2, %v1665_v11 }
 0x736   : > { %v1670_v14 = vmul.f32 1.442695, %v1667_v12 }
 0x737   : > { %v1685_v15 = vpop.permute.xlu1 %1684 }
 0x738   : > { %6694 = vpow2.f32 %v1670_v14  ;;  %v1690_v17 = vsel %vm1244_vm4, %v1685_v15, 0 }
 0x739   : > { %6302 = vmatpush3.bf16.msra.mxu1 %v1690_v17 }
 0x73a   : > { %6313 = vmatprep.subr.bf16.mxu1 %v6794_v3 }
 0x73b   : > { %v1783_v27 = vpop.permute.xlu1 %1782 }
 0x73c   : > { %v1788_v31 = vsel %vm1117_vm3, %v1783_v27, 0 }
 0x73e   : > { %v6693_v18 = vpop.eup %6692 }
 0x73f   : > { %v1672_v19 = vsel %vm1117_vm3, %v6693_v18, 0.0  ;;  %v1833_v33 = vpop.permute.xlu1 %1832 }
 0x740   : > { %1673 = vadd.xlane.f32.xlu0 %v1672_v19  ;;  %v1838_v35 = vsel %vm1117_vm3, %v1833_v33, 0 }
 0x742   : > { %v6695_v20 = vpop.eup %6694 }
 0x743   : > { %v1675_v21 = vsel %vm1117_vm3, %v6695_v20, 0.0  ;;  %v1831_v37 = vpop.permute.xlu1 %1830 }
 0x744   : > { %1676 = vadd.xlane.f32.xlu0 %v1675_v21  ;;  %v6541_v21 = vld [vmem:[%s7890_s22 + $0x8] sm:$0xff]  }
 0x75a   : > { %1732 = vrot.lane.b32.xlu0 %v7074_v16, %s6803_s28 }
 0x75e   : > { %1780 = vrot.lane.b32.xlu0 %v7070_v13, %s6805_s13 }
 0x7cd   : > { %v1674_v22 = vpop.xlane.xlu0 %1673 }
 0x7ce   : > { %6696 = vrcp.f32 %v1674_v22 }
 0x7d1   : > { %v1677_v23 = vpop.xlane.xlu0 %1676 }
 0x7d2   : > { %6698 = vrcp.f32 %v1677_v23 }
 0x7d5   : > { %v1733_v24 = vpop.permute.xlu0 %1732 }
 0x7d6   : > { %v1738_v25 = vsel %vm1244_vm4, %v1733_v24, 0 }
 0x7d7   : > { %6308 = vmatpush3.bf16.msra.mxu0 %v1738_v25 }
 0x7d8   : > { %v6697_v26 = vpop.eup %6696  ;;  %6319 = vmatprep.subr.bf16.mxu0 %v6794_v3 }
 0x7d9   : > { %v1680_v28 = vmul.f32 %v6697_v26, %v6693_v18  ;;  %v1781_v36 = vpop.permute.xlu0 %1780 }
 0x7db   : > { %v1682_v29 = vpack.c.bf16 %v1680_v28, %v1680_v28 }
 0x7dc   : > { %v6699_v30 = vpop.eup %6698 }
 0x7dd   : > { %v1681_v32 = vmul.f32 %v6699_v30, %v6695_v20  ;;  %6304 = vmatmul.mubr.msk.bf16.vlgmr.msra.gmra.mrb[20].mxu1 %vm1117_vm3, %v1682_v29  ;;  %v6540_v20 = vld [vmem:[%s7890_s22] sm:$0xff]   ;;  %s7891_s22 = sld [smem:[#allocation16_spill]] }
 0x7de   : > { %6314 = vmatpush3.bf16.xpose.msra.mxu1 %v1788_v31  ;;  %6315 = vmatprep.mubr.msk.bf16.mxu1 %vm6795_vm1, %v6794_v3 }
 0x7df   : > { %v1683_v34 = vpack.c.bf16 %v1681_v32, %v1681_v32  ;;  %6325 = vmatprep.subr.bf16.mxu1 %v6794_v3 }
 0x7e1   : > { %6310 = vmatmul.mubr.msk.bf16.vlgmr.msra.gmra.mrb[24].mxu0 %vm1117_vm3, %v1683_v34 }
 0x7e2   : > { %6320 = vmatpush3.bf16.xpose.msra.mxu0 %v1838_v35  ;;  %6321 = vmatprep.mubr.msk.bf16.mxu0 %vm6795_vm1, %v6794_v3 }
 0x7e3   : > { %6331 = vmatprep.subr.bf16.mxu0 %v6794_v3  ;;  %s7892_s2 = scalar_lea.vmem %s7891_s22, %s6952_s27  ;;  %s7894_s22 = sld [smem:[#allocation12_spill]] }
 0x7e5   : > { %6316 = vmatmul.mubr.msk.bf16.vlgmr.msra.gmra.mrb[24].mxu1 %vm1117_vm3, %v1781_v36 }
 0x7e6   : > { %6327 = vmatprep.mubr.msk.bf16.mxu1 %vm6795_vm1, %v6794_v3 }
 0x7e9   : > { %6322 = vmatmul.mubr.msk.bf16.vlgmr.msra.gmra.mrb[28].mxu0 %vm1117_vm3, %v1831_v37 }
 0x7ea   : > { %6333 = vmatprep.mubr.msk.bf16.mxu0 %vm6795_vm1, %v6794_v3 }
 0x8b0   : > { %v1726_v38 = vpop.f32.mrb[20].mxu1 }
 0x8b1   : > { %v6305_v39 = vpop.f32.mrb[21].mxu1 }
 0x8b2   : > { %v1729_v40 = vpop.f32.mrb[22].mxu1 }
 0x8b3   : > { %v6306_v41 = vpop.f32.mrb[23].mxu1 }
 0x8b4   : > { %v1774_v42 = vpop.f32.mrb[24].mxu0 }
 0x8b5   : > { %v6513_v43 = vpack.i.bf16 %v1774_v42, %v1726_v38  ;;  %v6311_v44 = vpop.f32.mrb[25].mxu0 }
 0x8b6   : > { %v1777_v45 = vpop.f32.mrb[26].mxu0 }
 0x8b7   : > { %v6312_v46 = vpop.f32.mrb[27].mxu0 }
 0x8b8   : > { %v1824_v47 = vpop.f32.mrb[24].mxu1 }
 0x8b9   : > { %v1880_v49 = vmul.f32 0.35355338, %v1824_v47  ;;  %v6317_v50 = vpop.f32.mrb[25].mxu1 }
 0x8ba   : > { %v1827_v51 = vpop.f32.mrb[26].mxu1 }
 0x8bb   : > { %v6318_v54 = vpop.f32.mrb[27].mxu1  ;;  %v1882_v55 = vsel %vm1117_vm3, %v1880_v49, -inf }
 0x8bc   : > { %1883 = vmax.xlane.f32.xlu0 %v1882_v55  ;;  %v1874_v56 = vpop.f32.mrb[28].mxu0  ;;  %v6752_v55 = vld [vmem:[#allocation2] sm:$0xff] }
 0x8bd   : > { %v1881_v57 = vmul.f32 0.35355338, %v1874_v56  ;;  %v6323_v58 = vpop.f32.mrb[29].mxu0 }
 0x8be   : > { %v1877_v59 = vpop.f32.mrb[30].mxu0  ;;  %v6753_v58 = vld [vmem:[#allocation2 + $0x8] sm:$0xff] }
 0x8bf   : > { %v6324_v60 = vpop.f32.mrb[31].mxu0  ;;  %v1885_v62 = vsel %vm1117_vm3, %v1881_v57, -inf }
 0x8c0   : > { %1886 = vmax.xlane.f32.xlu1 %v1885_v62 }
 0x8d1   : > { %1906 = vrot.lane.b32.xlu1 %v7070_v13, %s6806_s14 }
 0x8d5   : > { %6509 = vrot.lane.b32.xlu1 %v6508_v53, %s6807_s25 }
 0x8d9   : > { %6514 = vrot.lane.b32.xlu1 %v6513_v43, %s6808_s21 }
 0x949   : > { %v1884_v63 = vpop.xlane.xlu0 %1883 }
 0x94a   : > { %v1888_v0 = vsub.f32 %v1880_v49, %v1884_v63 }
 0x94c   : > { %v1890_v2 = vmul.f32 1.442695, %v1888_v0 }
 0x94d   : > { %v1887_v4 = vpop.xlane.xlu1 %1886 }
 0x94e   : > { %6700 = vpow2.f32 %v1890_v2  ;;  %v1889_v5 = vsub.f32 %v1881_v57, %v1887_v4 }
 0x950   : > { %v1892_v6 = vmul.f32 1.442695, %v1889_v5 }
 0x951   : > { %v1907_v7 = vpop.permute.xlu1 %1906 }
 0x952   : > { %6702 = vpow2.f32 %v1892_v6  ;;  %v1912_v13 = vsel %vm1244_vm4, %v1907_v7, 0 }
 0x953   : > { %6326 = vmatpush3.bf16.msra.mxu1 %v1912_v13 }
 0x954   : > { %6337 = vmatprep.subr.bf16.mxu1 %v6794_v3 }
 0x955   : > { %v6510_v31 = vpop.permute.xlu1 %6509 }
 0x956   : > { %v6512_v33 = vunpack.i.h.bf16 %v6510_v31  ;;  %v6511_v34 = vunpack.i.l.bf16 %v6510_v31 }
 0x958   : > { %v6701_v8 = vpop.eup %6700  ;;  %v2027_v38 = vsel %vm1117_vm3, %v7126_v1, %v6512_v33  ;;  %v2026_v39 = vsel %vm1117_vm3, %v7124_v61, %v6511_v34  ;;  %v5752_v61 = vld [vmem:[%s7892_s2] ss:$0 sm:$0xff]  ;;  %s7893_s2 = sld [smem:[#allocation9_spill]] }
 0x959   : > { %v1894_v48 = vsel %vm1117_vm3, %v6701_v8, 0.0  ;;  %v6515_v32 = vpop.permute.xlu1 %6514 }
 0x95a   : > { %1895 = vadd.xlane.f32.xlu0 %v1894_v48  ;;  %v6517_v35 = vunpack.i.h.bf16 %v6515_v32  ;;  %v6516_v36 = vunpack.i.l.bf16 %v6515_v32  ;;  %v6542_v48 = vld [vmem:[%s6985_s5] sm:$0xff]  }
 0x95c   : > { %v6703_v52 = vpop.eup %6702  ;;  %v2029_v42 = vsel %vm2028_vm5, %v2026_v39, %v6516_v36  ;;  %v2030_v43 = vsel %vm2028_vm5, %v2027_v38, %v6517_v35 }
 0x95d   : > { %v1897_v53 = vsel %vm1117_vm3, %v6703_v52, 0.0 }
 0x95e   : > { %1898 = vadd.xlane.f32.xlu0 %v1897_v53  ;;  %v1041_v53 = vld [vmem:[%s7894_s22] sm:$0xff] }
 0x974   : > { %1954 = vrot.lane.b32.xlu0 %v7074_v16, %s6806_s14  ;;  %s7896_s14 = scalar_lea.vmem %s7834_s17, %s6952_s27 }
 0x9e7   : > { %v1896_v9 = vpop.xlane.xlu0 %1895 }
 0x9e8   : > { %6704 = vrcp.f32 %v1896_v9  ;;  %v1042_v9 = vld [vmem:[%s7894_s22 + $0x8] sm:$0xff] }
 0x9eb   : > { %v1899_v10 = vpop.xlane.xlu0 %1898 }
 0x9ec   : > { %6706 = vrcp.f32 %v1899_v10  ;;  %v2217_v10 = vpack.c.bf16 %v1042_v9, %v1041_v53 }
 0x9ef   : > { %v1955_v11 = vpop.permute.xlu0 %1954 }
 0x9f0   : > { %v1960_v12 = vsel %vm1244_vm4, %v1955_v11, 0  ;;  %v6544_v11 = vld [vmem:[%s7893_s2] sm:$0xff]  }
 0x9f1   : > { %6332 = vmatpush3.bf16.msra.mxu0 %v1960_v12  ;;  %v6545_v12 = vld [vmem:[%s7893_s2 + $0x8] sm:$0xff]  }
 0x9f2   : > { %v6705_v14 = vpop.eup %6704  ;;  %6345 = vmatprep.subr.bf16.mxu0 %v6794_v3 }
 0x9f3   : > { %v1902_v15 = vmul.f32 %v6705_v14, %v6701_v8 }
 0x9f5   : > { %v1904_v17 = vpack.c.bf16 %v1902_v15, %v1902_v15 }
 0x9f6   : > { %v6707_v18 = vpop.eup %6706 }
 0x9f7   : > { %v1903_v19 = vmul.f32 %v6707_v18, %v6703_v52  ;;  %6328 = vmatmul.mubr.msk.bf16.vlgmr.msra.gmra.mrb[28].mxu1 %vm1117_vm3, %v1904_v17  ;;  %v6543_v52 = vld [vmem:[%s6985_s5 + $0x8] sm:$0xff]  }
 0x9f8   : > { %6341 = vmatprep.mubr.msk.bf16.mxu1 %vm6795_vm1, %v6794_v3  ;;  %6338 = vmatpush3.bf16.msra.mxu1 %v6540_v20 }
 0x9f9   : > { %v1905_v16 = vpack.c.bf16 %v1903_v19, %v1903_v19  ;;  %6339 = vmatprep.subr.bf16.mxu1 %v6794_v3 }
 0x9fb   : > { %6334 = vmatmul.mubr.msk.bf16.vlgmr.msra.gmra.mrb[32].mxu0 %vm1117_vm3, %v1905_v16 }
 0x9fc   : > { %6349 = vmatprep.mubr.msk.bf16.mxu0 %vm6795_vm1, %v6794_v3  ;;  %6340 = vmatpush3.bf16.msra.mxu1 %v6541_v21  ;;  %v5756_v21 = vld [vmem:[%s7895_s6] ss:$0 sm:$0xff]  ;;  %s7897_s6 = scalar_lea.vmem %s7826_s9, %s6952_s27 }
 0x9fd   : > { %6353 = vmatprep.subr.bf16.mxu1 %v6794_v3  ;;  %6346 = vmatpush3.bf16.msra.mxu0 %v6544_v11  ;;  %v5762_v31 = vld [vmem:[%s7897_s6] ss:$0 sm:$0xff]  ;;  %s7904_s6 = scalar_lea.vmem %s7837_s20, %s6952_s27 }
 0x9fe   : > { %6347 = vmatprep.subr.bf16.mxu0 %v6794_v3 }
 0xa01   : > { %6348 = vmatpush3.bf16.msra.mxu0 %v6545_v12 }
 0xa02   : > { %6361 = vmatprep.subr.bf16.mxu0 %v6794_v3 }
 0xaca   : > { %v1948_v22 = vpop.f32.mrb[28].mxu1 }
 0xacb   : > { %v6329_v23 = vpop.f32.mrb[29].mxu1 }
 0xacc   : > { %v1951_v24 = vpop.f32.mrb[30].mxu1 }
 0xacd   : > { %v6330_v25 = vpop.f32.mrb[31].mxu1 }
 0xace   : > { %v1996_v26 = vpop.f32.mrb[32].mxu0 }
 0xacf   : > { %v6518_v27 = vpack.i.bf16 %v1996_v26, %v1948_v22  ;;  %v6335_v28 = vpop.f32.mrb[33].mxu0  ;;  %v5757_v26 = vld [vmem:[%s7896_s14] ss:$0 sm:$0xff]  ;;  %s7898_s14 = sld [smem:[#allocation18_spill]] }
 0xad0   : > { %v1999_v29 = vpop.f32.mrb[34].mxu0 }
 0xad1   : > { %6519 = vrot.lane.b32.xlu0 %v6518_v27, %s6809_s7  ;;  %v6336_v30 = vpop.f32.mrb[35].mxu0 }
 0xad5   : > { %s7899_s5 = scalar_lea.vmem %s7898_s14, %s6952_s27  ;;  %s7905_s14 = sld [smem:[#allocation24_spill]] }
 0xb43   : > { %v6520_v37 = vpop.permute.xlu0 %6519 }
 0xb44   : > { %v6522_v40 = vunpack.i.h.bf16 %v6520_v37  ;;  %v6521_v41 = vunpack.i.l.bf16 %v6520_v37 }
 0xb46   : > { %v2033_v44 = vsel %vm2031_vm6, %v2030_v43, %v6522_v40  ;;  %v2032_v45 = vsel %vm2031_vm6, %v2029_v42, %v6521_v41  ;;  %v5758_v42 = vld [vmem:[%s7899_s5] ss:$0 sm:$0xff]  ;;  %s7906_s5 = scalar_lea.vmem %s7905_s14, %s6952_s27 }
 0xb47   : > { %v2034_v46 = vpack.c.bf16 %v2033_v44, %v2032_v45 }
 0xb49   : > { %6342 = vmatmul.mubr.msk.bf16.vlgmr.msra.gmra.mrb[32].mxu1 %vm1067_vm2, %v2034_v46 }
 0xb4a   : > { %6357 = vmatprep.mubr.msk.bf16.mxu1 %vm6795_vm1, %v6794_v3  ;;  %6354 = vmatpush3.bf16.msra.mxu1 %v6542_v48 }
 0xb4b   : > { %6355 = vmatprep.subr.bf16.mxu1 %v6794_v3 }
 0xb4e   : > { %6356 = vmatpush3.bf16.msra.mxu1 %v6543_v52 }
 0xb4f   : > { %6367 = vmatprep.subr.bf16.mxu1 %v6794_v3 }
 0xb51   : > { %6358 = vmatmul.mubr.msk.bf16.vlgmr.msra.gmra.mrb[36].mxu1 %vm1067_vm2, %v2217_v10 }
 0xb52   : > { %6369 = vmatprep.mubr.msk.bf16.mxu1 %vm6795_vm1, %v6794_v3 }
 0xc1c   : > { %v2095_v1 = vpop.f32.mrb[32].mxu1 }
 0xc1d   : > { %v2096_v47 = vadd.f32 %v5752_v61, %v2095_v1  ;;  %v6343_v49 = vpop.f32.mrb[33].mxu1 }
 0xc1e   : > { %v2098_v50 = vpop.f32.mrb[34].mxu1 }
 0xc1f   : > { %v2099_v51 = vadd.f32 %v5752_v61, %v2098_v50  ;;  %v6344_v54 = vpop.f32.mrb[35].mxu1  ;;  %v2102_v56 = vadd.f32 %v6752_v55, %v2096_v47 }
 0xc21   : > { %v2104_v57 = vsel %vm1067_vm2, %v2102_v56, 0.0  ;;  %v2103_v59 = vadd.f32 %v6753_v58, %v2099_v51 }
 0xc22   : > { %2105 = vadd.xlane.f32.xlu1 %v2104_v57 }
 0xc23   : > { %v2107_v60 = vsel %vm1067_vm2, %v2103_v59, 0.0 }
 0xc24   : > { %2108 = vadd.xlane.f32.xlu0 %v2107_v60  ;;  %v2278_v32 = vpop.f32.mrb[36].mxu1 }
 0xc25   : > { %v2279_v33 = vadd.f32 %v5762_v31, %v2278_v32  ;;  %v6359_v34 = vpop.f32.mrb[37].mxu1 }
 0xc26   : > { %v2281_v35 = vpop.f32.mrb[38].mxu1 }
 0xc27   : > { %v7289_v36 = vpack.c.bf16 %v2279_v33, %v2279_v33  ;;  %v2282_v37 = vadd.f32 %v5762_v31, %v2281_v35  ;;  %v6360_v38 = vpop.f32.mrb[39].mxu1 }
 0xc29   : > { %v7291_v39 = vpack.c.bf16 %v2282_v37, %v2282_v37  ;;  %v2293_v40 = vsel %vm1117_vm3, %v7289_v36, 0 }
 0xc2b   : > { %v2339_v41 = vsel %vm1117_vm3, %v7291_v39, 0 }
 0xc2c   : > { %6368 = vmatpush3.bf16.xpose.msra.mxu1 %v2339_v41 }
 0xc2d   : > { %6379 = vmatprep.subr.bf16.mxu1 %v6794_v3 }
 0xcaf   : > { %v2106_v62 = vpop.xlane.xlu1 %2105 }
 0xcb0   : > { %v2111_v63 = vmul.f32 0.03125, %v2106_v62 }
 0xcb1   : > { %v2109_v0 = vpop.xlane.xlu0 %2108 }
 0xcb2   : > { %v2113_v2 = vsub.f32 %v2102_v56, %v2111_v63  ;;  %v2112_v4 = vmul.f32 0.03125, %v2109_v0 }
 0xcb4   : > { %v2114_v5 = vsub.f32 %v2103_v59, %v2112_v4  ;;  %v2115_v6 = vmul.f32 %v2113_v2, %v2113_v2 }
 0xcb6   : > { %v2117_v7 = vsel %vm1067_vm2, %v2115_v6, 0.0  ;;  %v2116_v13 = vmul.f32 %v2114_v5, %v2114_v5 }
 0xcb7   : > { %2118 = vadd.xlane.f32.xlu0 %v2117_v7 }
 0xcb8   : > { %v2120_v8 = vsel %vm1067_vm2, %v2116_v13, 0.0 }
 0xcb9   : > { %2121 = vadd.xlane.f32.xlu1 %v2120_v8 }
 0xd44   : > { %v2119_v14 = vpop.xlane.xlu0 %2118 }
 0xd45   : > { %v2123_v15 = vmul.f32 0.03125, %v2119_v14 }
 0xd46   : > { %v2122_v17 = vpop.xlane.xlu1 %2121 }
 0xd47   : > { %v2125_v18 = vadd.f32 1e-05, %v2123_v15  ;;  %v2124_v19 = vmul.f32 0.03125, %v2122_v17 }
 0xd49   : > { %6708 = vrsqrt.f32 %v2125_v18  ;;  %v2126_v16 = vadd.f32 1e-05, %v2124_v19 }
 0xd4b   : > { %6710 = vrsqrt.f32 %v2126_v16 }
 0xd53   : > { %v6709_v20 = vpop.eup %6708 }
 0xd54   : > { %v2129_v22 = vmul.f32 %v6709_v20, %v2113_v2 }
 0xd55   : > { %v6711_v23 = vpop.eup %6710 }
 0xd56   : > { %v2138_v24 = vmul.f32 %v5756_v21, %v2129_v22  ;;  %v2130_v25 = vmul.f32 %v6711_v23, %v2114_v5 }
 0xd58   : > { %v2139_v27 = vmul.f32 %v5756_v21, %v2130_v25  ;;  %v7275_v28 = vadd.f32 %v5757_v26, %v2138_v24 }
 0xd5a   : > { %v7277_v29 = vadd.f32 %v5757_v26, %v2139_v27 }
 0xd5c   : > { %v2149_v30 = vpack.c.bf16 %v7277_v29, %v7275_v28 }
 0xd5e   : > { %6350 = vmatmul.mubr.msk.bf16.vlgmr.msra.gmra.mrb[36].mxu0 %vm1067_vm2, %v2149_v30 }
 0xd5f   : > { %6363 = vmatprep.mubr.msk.bf16.mxu0 %vm6795_vm1, %v6794_v3  ;;  %6362 = vmatpush3.bf16.xpose.msra.mxu0 %v2293_v40 }
 0xd60   : > { %6373 = vmatprep.subr.bf16.mxu0 %v6794_v3 }
 0xe31   : > { %v2210_v43 = vpop.f32.mrb[36].mxu0 }
 0xe32   : > { %v2211_v44 = vadd.f32 %v5758_v42, %v2210_v43  ;;  %v6351_v45 = vpop.f32.mrb[37].mxu0 }
 0xe33   : > { %v2213_v46 = vpop.f32.mrb[38].mxu0 }
 0xe34   : > { %v7304_v61 = vpack.c.bf16 %v2211_v44, %v2211_v44  ;;  %v2214_v1 = vadd.f32 %v5758_v42, %v2213_v46  ;;  %v6352_v47 = vpop.f32.mrb[39].mxu0 }
 0xe36   : > { %v7306_v49 = vpack.c.bf16 %v2214_v1, %v2214_v1  ;;  %6364 = vmatmul.mubr.msk.bf16.vlgmr.msra.gmra.mrb[40].mxu0 %vm1117_vm3, %v7304_v61 }
 0xe37   : > { %6375 = vmatprep.mubr.msk.bf16.mxu0 %vm6795_vm1, %v6794_v3 }
 0xe38   : > { %6370 = vmatmul.mubr.msk.bf16.vlgmr.msra.gmra.mrb[40].mxu1 %vm1117_vm3, %v7306_v49 }
 0xe39   : > { %6381 = vmatprep.mubr.msk.bf16.mxu1 %vm6795_vm1, %v6794_v3 }
 0xf09   : > { %v2329_v50 = vpop.f32.mrb[40].mxu0 }
 0xf0a   : > { %v2381_v51 = vmul.f32 0.35355338, %v2329_v50  ;;  %v6365_v54 = vpop.f32.mrb[41].mxu0 }
 0xf0b   : > { %v2332_v55 = vpop.f32.mrb[42].mxu0  ;;  %v2375_v56 = vpop.f32.mrb[40].mxu1 }
 0xf0c   : > { %v2382_v57 = vmul.f32 0.35355338, %v2375_v56  ;;  %v6366_v58 = vpop.f32.mrb[43].mxu0  ;;  %v6371_v59 = vpop.f32.mrb[41].mxu1  ;;  %v2383_v60 = vsel %vm1117_vm3, %v2381_v51, -inf }
 0xf0d   : > { %v2378_v62 = vpop.f32.mrb[42].mxu1  ;;  %2384 = vmax.xlane.f32.xlu0 %v2383_v60 }
 0xf0e   : > { %v6372_v63 = vpop.f32.mrb[43].mxu1  ;;  %v2386_v0 = vsel %vm1117_vm3, %v2382_v57, -inf }
 0xf0f   : > { %2387 = vmax.xlane.f32.xlu1 %v2386_v0 }
 0xf20   : > { %2457 = vrot.lane.b32.xlu1 %v7291_v39, %s6796_s0 }
 0xf23   : > { %2408 = vrot.lane.b32.xlu0 %v7289_v36, %s6796_s0  ;;  %s7900_s0 = sld [smem:[#allocation10_spill]] }
 0xf9a   : > { %v2385_v2 = vpop.xlane.xlu0 %2384 }
 0xf9b   : > { %v2389_v4 = vsub.f32 %v2381_v51, %v2385_v2 }
 0xf9c   : > { %v2388_v5 = vpop.xlane.xlu1 %2387 }
 0xf9d   : > { %v2391_v6 = vmul.f32 1.442695, %v2389_v4  ;;  %v2390_v7 = vsub.f32 %v2382_v57, %v2388_v5 }
 0xf9e   : > { %v2409_v13 = vpop.permute.xlu0 %2408 }
 0xf9f   : > { %6712 = vpow2.f32 %v2391_v6  ;;  %v2393_v8 = vmul.f32 1.442695, %v2390_v7  ;;  %v2414_v48 = vsel %vm1244_vm4, %v2409_v13, 0 }
 0xfa0   : > { %v2458_v52 = vpop.permute.xlu1 %2457  ;;  %6374 = vmatpush3.bf16.msra.mxu0 %v2414_v48 }
 0xfa1   : > { %6714 = vpow2.f32 %v2393_v8  ;;  %v2463_v53 = vsel %vm1244_vm4, %v2458_v52, 0  ;;  %6385 = vmatprep.subr.bf16.mxu0 %v6794_v3 }
 0xfa2   : > { %6380 = vmatpush3.bf16.msra.mxu1 %v2463_v53 }
 0xfa3   : > { %6391 = vmatprep.subr.bf16.mxu1 %v6794_v3 }
 0xfa9   : > { %v6713_v9 = vpop.eup %6712 }
 0xfaa   : > { %v2395_v10 = vsel %vm1117_vm3, %v6713_v9, 0.0 }
 0xfab   : > { %v6715_v11 = vpop.eup %6714  ;;  %2396 = vadd.xlane.f32.xlu0 %v2395_v10 }
 0xfac   : > { %v2398_v12 = vsel %vm1117_vm3, %v6715_v11, 0.0 }
 0xfad   : > { %2399 = vadd.xlane.f32.xlu1 %v2398_v12 }
 0xfbe   : > { %2508 = vrot.lane.b32.xlu1 %v7289_v36, %s6799_s24 }
 0xfc1   : > { %2559 = vrot.lane.b32.xlu0 %v7291_v39, %s6799_s24 }
 0xfc2   : > { %2506 = vrot.lane.b32.xlu1 %v7304_v61, %s6799_s24 }
 0xfc5   : > { %2557 = vrot.lane.b32.xlu0 %v7306_v49, %s6799_s24 }
0x1038   : > { %v2397_v14 = vpop.xlane.xlu0 %2396 }
0x1039   : > { %6716 = vrcp.f32 %v2397_v14 }
0x103a   : > { %v2400_v15 = vpop.xlane.xlu1 %2399 }
0x103b   : > { %6718 = vrcp.f32 %v2400_v15 }
0x103c   : > { %v2560_v22 = vpop.permute.xlu0 %2559 }
0x103d   : > { %v2565_v25 = vsel %vm1117_vm3, %v2560_v22, 0 }
0x103e   : > { %v2509_v16 = vpop.permute.xlu1 %2508 }
0x103f   : > { %v2514_v23 = vsel %vm1117_vm3, %v2509_v16, 0 }
0x1040   : > { %v2558_v27 = vpop.permute.xlu0 %2557 }
0x1042   : > { %v2507_v26 = vpop.permute.xlu1 %2506 }
0x1043   : > { %v6717_v17 = vpop.eup %6716 }
0x1044   : > { %v2403_v18 = vmul.f32 %v6717_v17, %v6713_v9 }
0x1045   : > { %v6719_v19 = vpop.eup %6718 }
0x1046   : > { %v2404_v20 = vmul.f32 %v6719_v19, %v6715_v11  ;;  %v2405_v21 = vpack.c.bf16 %v2403_v18, %v2403_v18 }
0x1048   : > { %6376 = vmatmul.mubr.msk.bf16.vlgmr.msra.gmra.mrb[44].mxu0 %vm1117_vm3, %v2405_v21  ;;  %v2406_v24 = vpack.c.bf16 %v2404_v20, %v2404_v20 }
0x1049   : > { %6386 = vmatpush3.bf16.xpose.msra.mxu0 %v2514_v23  ;;  %6387 = vmatprep.mubr.msk.bf16.mxu0 %vm6795_vm1, %v6794_v3 }
0x104a   : > { %6382 = vmatmul.mubr.msk.bf16.vlgmr.msra.gmra.mrb[44].mxu1 %vm1117_vm3, %v2406_v24  ;;  %6397 = vmatprep.subr.bf16.mxu0 %v6794_v3 }
0x104b   : > { %6392 = vmatpush3.bf16.xpose.msra.mxu1 %v2565_v25  ;;  %6393 = vmatprep.mubr.msk.bf16.mxu1 %vm6795_vm1, %v6794_v3 }
0x104c   : > { %6403 = vmatprep.subr.bf16.mxu1 %v6794_v3 }
0x1050   : > { %6388 = vmatmul.mubr.msk.bf16.vlgmr.msra.gmra.mrb[48].mxu0 %vm1117_vm3, %v2507_v26 }
0x1051   : > { %6399 = vmatprep.mubr.msk.bf16.mxu0 %vm6795_vm1, %v6794_v3 }
0x1052   : > { %6394 = vmatmul.mubr.msk.bf16.vlgmr.msra.gmra.mrb[48].mxu1 %vm1117_vm3, %v2558_v27 }
0x1053   : > { %6405 = vmatprep.mubr.msk.bf16.mxu1 %vm6795_vm1, %v6794_v3 }
0x111b   : > { %v7352_v30 = vpop.f32.mrb[44].mxu0 }
0x111c   : > { %v6377_v31 = vpop.f32.mrb[45].mxu0 }
0x111d   : > { %v2453_v32 = vpop.f32.mrb[46].mxu0  ;;  %v7354_v33 = vpop.f32.mrb[44].mxu1 }
0x111e   : > { %v6378_v34 = vpop.f32.mrb[47].mxu0  ;;  %v6383_v35 = vpop.f32.mrb[45].mxu1 }
0x111f   : > { %v2502_v37 = vpop.f32.mrb[46].mxu1 }
0x1120   : > { %v6384_v38 = vpop.f32.mrb[47].mxu1 }
0x1123   : > { %v2550_v40 = vpop.f32.mrb[48].mxu0 }
0x1124   : > { %v2607_v41 = vmul.f32 0.35355338, %v2550_v40  ;;  %v6389_v42 = vpop.f32.mrb[49].mxu0 }
0x1125   : > { %v2553_v43 = vpop.f32.mrb[50].mxu0  ;;  %v2601_v44 = vpop.f32.mrb[48].mxu1 }
0x1126   : > { %v2608_v45 = vmul.f32 0.35355338, %v2601_v44  ;;  %v6390_v46 = vpop.f32.mrb[51].mxu0  ;;  %v6395_v1 = vpop.f32.mrb[49].mxu1  ;;  %v2609_v47 = vsel %vm1117_vm3, %v2607_v41, -inf }
0x1127   : > { %v2604_v50 = vpop.f32.mrb[50].mxu1  ;;  %2610 = vmax.xlane.f32.xlu1 %v2609_v47 }
0x1128   : > { %v6396_v51 = vpop.f32.mrb[51].mxu1  ;;  %v2612_v54 = vsel %vm1117_vm3, %v2608_v45, -inf }
0x1129   : > { %2613 = vmax.xlane.f32.xlu0 %v2612_v54 }
0x1138   : > { %2681 = vrot.lane.b32.xlu1 %v7291_v39, %s6798_s10 }
0x113f   : > { %2633 = vrot.lane.b32.xlu0 %v7289_v36, %s6798_s10 }
0x11b4   : > { %v2611_v55 = vpop.xlane.xlu1 %2610 }
0x11b5   : > { %v2615_v56 = vsub.f32 %v2607_v41, %v2611_v55 }
0x11b6   : > { %v2614_v57 = vpop.xlane.xlu0 %2613 }
0x11b7   : > { %v2617_v58 = vmul.f32 1.442695, %v2615_v56  ;;  %v2616_v59 = vsub.f32 %v2608_v45, %v2614_v57 }
0x11b8   : > { %v2682_v60 = vpop.permute.xlu1 %2681 }
0x11b9   : > { %6720 = vpow2.f32 %v2617_v58  ;;  %v2619_v62 = vmul.f32 1.442695, %v2616_v59  ;;  %v2687_v63 = vsel %vm1244_vm4, %v2682_v60, 0 }
0x11ba   : > { %v2634_v0 = vpop.permute.xlu0 %2633  ;;  %6404 = vmatpush3.bf16.msra.mxu1 %v2687_v63 }
0x11bb   : > { %6722 = vpow2.f32 %v2619_v62  ;;  %v2639_v2 = vsel %vm1244_vm4, %v2634_v0, 0  ;;  %6415 = vmatprep.subr.bf16.mxu1 %v6794_v3 }
0x11bc   : > { %6398 = vmatpush3.bf16.msra.mxu0 %v2639_v2 }
0x11bd   : > { %6409 = vmatprep.subr.bf16.mxu0 %v6794_v3 }
0x11c3   : > { %v6721_v4 = vpop.eup %6720 }
0x11c4   : > { %v2621_v5 = vsel %vm1117_vm3, %v6721_v4, 0.0 }
0x11c5   : > { %v6723_v6 = vpop.eup %6722  ;;  %2622 = vadd.xlane.f32.xlu0 %v2621_v5 }
0x11c6   : > { %v2624_v7 = vsel %vm1117_vm3, %v6723_v6, 0.0 }
0x11c7   : > { %2625 = vadd.xlane.f32.xlu1 %v2624_v7 }
0x11d8   : > { %2731 = vrot.lane.b32.xlu1 %v7289_v36, %s6802_s3 }
0x11db   : > { %2781 = vrot.lane.b32.xlu0 %v7291_v39, %s6802_s3 }
0x11dc   : > { %2729 = vrot.lane.b32.xlu1 %v7304_v61, %s6802_s3 }
0x11df   : > { %2779 = vrot.lane.b32.xlu0 %v7306_v49, %s6802_s3 }
0x1252   : > { %v2623_v13 = vpop.xlane.xlu0 %2622 }
0x1253   : > { %6724 = vrcp.f32 %v2623_v13 }
0x1254   : > { %v2626_v8 = vpop.xlane.xlu1 %2625 }
0x1255   : > { %6726 = vrcp.f32 %v2626_v8 }
0x1256   : > { %v2782_v12 = vpop.permute.xlu0 %2781 }
0x1257   : > { %v2787_v17 = vsel %vm1117_vm3, %v2782_v12, 0 }
0x1258   : > { %v2732_v9 = vpop.permute.xlu1 %2731 }
0x1259   : > { %v2737_v14 = vsel %vm1117_vm3, %v2732_v9, 0 }
0x125a   : > { %v2780_v19 = vpop.permute.xlu0 %2779 }
0x125c   : > { %v2730_v18 = vpop.permute.xlu1 %2729 }
0x125d   : > { %v6725_v48 = vpop.eup %6724 }
0x125e   : > { %v2629_v52 = vmul.f32 %v6725_v48, %v6721_v4 }
0x125f   : > { %v6727_v53 = vpop.eup %6726 }
0x1260   : > { %v2630_v10 = vmul.f32 %v6727_v53, %v6723_v6  ;;  %v2631_v11 = vpack.c.bf16 %v2629_v52, %v2629_v52 }
0x1262   : > { %6400 = vmatmul.mubr.msk.bf16.vlgmr.msra.gmra.mrb[52].mxu0 %vm1117_vm3, %v2631_v11  ;;  %v2632_v15 = vpack.c.bf16 %v2630_v10, %v2630_v10 }
0x1263   : > { %6410 = vmatpush3.bf16.xpose.msra.mxu0 %v2737_v14  ;;  %6411 = vmatprep.mubr.msk.bf16.mxu0 %vm6795_vm1, %v6794_v3 }
0x1264   : > { %6406 = vmatmul.mubr.msk.bf16.vlgmr.msra.gmra.mrb[52].mxu1 %vm1117_vm3, %v2632_v15  ;;  %6421 = vmatprep.subr.bf16.mxu0 %v6794_v3 }
0x1265   : > { %6416 = vmatpush3.bf16.xpose.msra.mxu1 %v2787_v17  ;;  %6417 = vmatprep.mubr.msk.bf16.mxu1 %vm6795_vm1, %v6794_v3 }
0x1266   : > { %6427 = vmatprep.subr.bf16.mxu1 %v6794_v3 }
0x126a   : > { %6412 = vmatmul.mubr.msk.bf16.vlgmr.msra.gmra.mrb[56].mxu0 %vm1117_vm3, %v2730_v18 }
0x126b   : > { %6423 = vmatprep.mubr.msk.bf16.mxu0 %vm6795_vm1, %v6794_v3 }
0x126c   : > { %6418 = vmatmul.mubr.msk.bf16.vlgmr.msra.gmra.mrb[56].mxu1 %vm1117_vm3, %v2780_v19 }
0x126d   : > { %6429 = vmatprep.mubr.msk.bf16.mxu1 %vm6795_vm1, %v6794_v3 }
0x1335   : > { %v7392_v16 = vpop.f32.mrb[52].mxu0 }
0x1336   : > { %v6401_v20 = vpop.f32.mrb[53].mxu0 }
0x1337   : > { %v2678_v21 = vpop.f32.mrb[54].mxu0  ;;  %v7394_v22 = vpop.f32.mrb[52].mxu1 }
0x1338   : > { %v6523_v23 = vpack.i.bf16 %v7394_v22, %v7392_v16  ;;  %v6402_v24 = vpop.f32.mrb[55].mxu0  ;;  %v6407_v25 = vpop.f32.mrb[53].mxu1 }
0x1339   : > { %v2726_v26 = vpop.f32.mrb[54].mxu1 }
0x133a   : > { %v6408_v27 = vpop.f32.mrb[55].mxu1 }
0x133d   : > { %v2773_v31 = vpop.f32.mrb[56].mxu0 }
0x133e   : > { %v2829_v32 = vmul.f32 0.35355338, %v2773_v31  ;;  %v6413_v34 = vpop.f32.mrb[57].mxu0 }
0x133f   : > { %v2776_v35 = vpop.f32.mrb[58].mxu0  ;;  %v2823_v37 = vpop.f32.mrb[56].mxu1 }
0x1340   : > { %v2830_v38 = vmul.f32 0.35355338, %v2823_v37  ;;  %v6414_v40 = vpop.f32.mrb[59].mxu0  ;;  %v6419_v41 = vpop.f32.mrb[57].mxu1  ;;  %v2831_v42 = vsel %vm1117_vm3, %v2829_v32, -inf }
0x1341   : > { %v2826_v43 = vpop.f32.mrb[58].mxu1  ;;  %2832 = vmax.xlane.f32.xlu1 %v2831_v42 }
0x1342   : > { %v6420_v44 = vpop.f32.mrb[59].mxu1  ;;  %v2834_v45 = vsel %vm1117_vm3, %v2830_v38, -inf }
0x1343   : > { %2835 = vmax.xlane.f32.xlu0 %v2834_v45 }
0x1352   : > { %2903 = vrot.lane.b32.xlu1 %v7291_v39, %s6801_s30 }
0x1359   : > { %2855 = vrot.lane.b32.xlu0 %v7289_v36, %s6801_s30  ;;  %s7901_s30 = scalar_lea.vmem %s7828_s11, %s6952_s27 }
0x13ce   : > { %v2833_v46 = vpop.xlane.xlu1 %2832 }
0x13cf   : > { %v2837_v1 = vsub.f32 %v2829_v32, %v2833_v46 }
0x13d0   : > { %v2836_v47 = vpop.xlane.xlu0 %2835 }
0x13d1   : > { %v2839_v50 = vmul.f32 1.442695, %v2837_v1  ;;  %v2838_v51 = vsub.f32 %v2830_v38, %v2836_v47 }
0x13d2   : > { %v2904_v54 = vpop.permute.xlu1 %2903 }
0x13d3   : > { %6728 = vpow2.f32 %v2839_v50  ;;  %v2841_v55 = vmul.f32 1.442695, %v2838_v51  ;;  %v2909_v56 = vsel %vm1244_vm4, %v2904_v54, 0 }
0x13d4   : > { %v2856_v57 = vpop.permute.xlu0 %2855  ;;  %6428 = vmatpush3.bf16.msra.mxu1 %v2909_v56 }
0x13d5   : > { %6730 = vpow2.f32 %v2841_v55  ;;  %v2861_v58 = vsel %vm1244_vm4, %v2856_v57, 0  ;;  %6439 = vmatprep.subr.bf16.mxu1 %v6794_v3 }
0x13d6   : > { %6422 = vmatpush3.bf16.msra.mxu0 %v2861_v58 }
0x13d7   : > { %6433 = vmatprep.subr.bf16.mxu0 %v6794_v3 }
0x13dd   : > { %v6729_v59 = vpop.eup %6728 }
0x13de   : > { %v2843_v60 = vsel %vm1117_vm3, %v6729_v59, 0.0 }
0x13df   : > { %v6731_v62 = vpop.eup %6730  ;;  %2844 = vadd.xlane.f32.xlu0 %v2843_v60 }
0x13e0   : > { %v2846_v63 = vsel %vm1117_vm3, %v6731_v62, 0.0 }
0x13e1   : > { %2847 = vadd.xlane.f32.xlu1 %v2846_v63  ;;  %v6547_v63 = vld [vmem:[%s7900_s0 + $0x8] sm:$0xff]  }
0x13f2   : > { %2953 = vrot.lane.b32.xlu1 %v7289_v36, %s6805_s13 }
0x13f5   : > { %3003 = vrot.lane.b32.xlu0 %v7291_v39, %s6805_s13 }
0x13f6   : > { %2951 = vrot.lane.b32.xlu1 %v7304_v61, %s6805_s13 }
0x13f9   : > { %3001 = vrot.lane.b32.xlu0 %v7306_v49, %s6805_s13 }
0x146c   : > { %v2845_v0 = vpop.xlane.xlu0 %2844 }
0x146d   : > { %6732 = vrcp.f32 %v2845_v0 }
0x146e   : > { %v2848_v2 = vpop.xlane.xlu1 %2847 }
0x146f   : > { %6734 = vrcp.f32 %v2848_v2 }
0x1470   : > { %v3004_v48 = vpop.permute.xlu0 %3003 }
0x1471   : > { %v3009_v61 = vsel %vm1117_vm3, %v3004_v48, 0 }
0x1472   : > { %v2954_v7 = vpop.permute.xlu1 %2953 }
0x1473   : > { %v2959_v52 = vsel %vm1117_vm3, %v2954_v7, 0 }
0x1474   : > { %v3002_v9 = vpop.permute.xlu0 %3001 }
0x1476   : > { %v2952_v49 = vpop.permute.xlu1 %2951 }
0x1477   : > { %v6733_v4 = vpop.eup %6732 }
0x1478   : > { %v2851_v5 = vmul.f32 %v6733_v4, %v6729_v59 }
0x1479   : > { %v6735_v6 = vpop.eup %6734 }
0x147a   : > { %v2852_v13 = vmul.f32 %v6735_v6, %v6731_v62  ;;  %v2853_v8 = vpack.c.bf16 %v2851_v5, %v2851_v5  ;;  %v6546_v62 = vld [vmem:[%s7900_s0] sm:$0xff]   ;;  %s7907_s0 = sld [smem:[#allocation7_spill]] }
0x147c   : > { %6424 = vmatmul.mubr.msk.bf16.vlgmr.msra.gmra.mrb[60].mxu0 %vm1117_vm3, %v2853_v8  ;;  %v2854_v53 = vpack.c.bf16 %v2852_v13, %v2852_v13 }
0x147d   : > { %6434 = vmatpush3.bf16.xpose.msra.mxu0 %v2959_v52  ;;  %6435 = vmatprep.mubr.msk.bf16.mxu0 %vm6795_vm1, %v6794_v3 }
0x147e   : > { %6430 = vmatmul.mubr.msk.bf16.vlgmr.msra.gmra.mrb[60].mxu1 %vm1117_vm3, %v2854_v53  ;;  %6445 = vmatprep.subr.bf16.mxu0 %v6794_v3 }
0x147f   : > { %6440 = vmatpush3.bf16.xpose.msra.mxu1 %v3009_v61  ;;  %6441 = vmatprep.mubr.msk.bf16.mxu1 %vm6795_vm1, %v6794_v3 }
0x1480   : > { %6451 = vmatprep.subr.bf16.mxu1 %v6794_v3  ;;  %p5959_p5 = scmp.ne.s32.totalorder %s7907_s0, 1 }
0x1481   : > { %vm6812_vm7 = vmmov (!%p5959_p5), 0  }
0x1484   : > { %6436 = vmatmul.mubr.msk.bf16.vlgmr.msra.gmra.mrb[64].mxu0 %vm1117_vm3, %v2952_v49 }
0x1485   : > { %6447 = vmatprep.mubr.msk.bf16.mxu0 %vm6795_vm1, %v6794_v3 }
0x1486   : > { %6442 = vmatmul.mubr.msk.bf16.vlgmr.msra.gmra.mrb[64].mxu1 %vm1117_vm3, %v3002_v9 }
0x1487   : > { %6453 = vmatprep.mubr.msk.bf16.mxu1 %vm6795_vm1, %v6794_v3 }
0x154f   : > { %v2897_v10 = vpop.f32.mrb[60].mxu0 }
0x1550   : > { %v6425_v11 = vpop.f32.mrb[61].mxu0 }
0x1551   : > { %v2900_v12 = vpop.f32.mrb[62].mxu0  ;;  %v2945_v14 = vpop.f32.mrb[60].mxu1 }
0x1552   : > { %v6528_v15 = vpack.i.bf16 %v2945_v14, %v2897_v10  ;;  %v6426_v17 = vpop.f32.mrb[63].mxu0  ;;  %v6431_v18 = vpop.f32.mrb[61].mxu1 }
0x1553   : > { %v2948_v19 = vpop.f32.mrb[62].mxu1 }
0x1554   : > { %v6432_v20 = vpop.f32.mrb[63].mxu1 }
0x1557   : > { %v2995_v21 = vpop.f32.mrb[64].mxu0 }
0x1558   : > { %v3051_v24 = vmul.f32 0.35355338, %v2995_v21  ;;  %v6437_v25 = vpop.f32.mrb[65].mxu0 }
0x1559   : > { %v2998_v26 = vpop.f32.mrb[66].mxu0  ;;  %v3045_v27 = vpop.f32.mrb[64].mxu1 }
0x155a   : > { %v3052_v31 = vmul.f32 0.35355338, %v3045_v27  ;;  %v6438_v32 = vpop.f32.mrb[67].mxu0  ;;  %v6443_v34 = vpop.f32.mrb[65].mxu1  ;;  %v3053_v35 = vsel %vm1117_vm3, %v3051_v24, -inf }
0x155b   : > { %v3048_v37 = vpop.f32.mrb[66].mxu1  ;;  %3054 = vmax.xlane.f32.xlu1 %v3053_v35 }
0x155c   : > { %v6444_v38 = vpop.f32.mrb[67].mxu1  ;;  %v3056_v40 = vsel %vm1117_vm3, %v3052_v31, -inf }
0x155d   : > { %3057 = vmax.xlane.f32.xlu0 %v3056_v40 }
0x15e8   : > { %v3055_v41 = vpop.xlane.xlu1 %3054 }
0x15e9   : > { %v3059_v42 = vsub.f32 %v3051_v24, %v3055_v41 }
0x15ea   : > { %v3058_v43 = vpop.xlane.xlu0 %3057 }
0x15eb   : > { %v3061_v44 = vmul.f32 1.442695, %v3059_v42  ;;  %v3060_v45 = vsub.f32 %v3052_v31, %v3058_v43 }
0x15ed   : > { %6736 = vpow2.f32 %v3061_v44  ;;  %v3063_v46 = vmul.f32 1.442695, %v3060_v45 }
0x15ef   : > { %6738 = vpow2.f32 %v3063_v46 }
0x15f7   : > { %v6737_v1 = vpop.eup %6736 }
0x15f8   : > { %v3065_v47 = vsel %vm1117_vm3, %v6737_v1, 0.0 }
0x15f9   : > { %v6739_v50 = vpop.eup %6738  ;;  %3066 = vadd.xlane.f32.xlu0 %v3065_v47  ;;  %v3326_v47 = vld [vmem:[%s7004_s8 + $0x40] sm:$0xff] }
0x15fa   : > { %v3068_v51 = vsel %vm1117_vm3, %v6739_v50, 0.0 }
0x15fb   : > { %3069 = vadd.xlane.f32.xlu1 %v3068_v51 }
0x160c   : > { %3125 = vrot.lane.b32.xlu1 %v7291_v39, %s6804_s1 }
0x160f   : > { %3077 = vrot.lane.b32.xlu0 %v7289_v36, %s6804_s1 }
0x1610   : > { %6524 = vrot.lane.b32.xlu1 %v6523_v23, %s6807_s25 }
0x1613   : > { %6529 = vrot.lane.b32.xlu0 %v6528_v15, %s6808_s21  ;;  %s7909_s21 = sld [smem:[#allocation26_spill]] (!%p5959_p5) }
0x1686   : > { %v3067_v54 = vpop.xlane.xlu0 %3066 }
0x1687   : > { %6740 = vrcp.f32 %v3067_v54  ;;  %v3327_v54 = vld [vmem:[%s7004_s8 + $0x48] sm:$0xff] }
0x1688   : > { %v3070_v55 = vpop.xlane.xlu1 %3069 }
0x1689   : > { %6742 = vrcp.f32 %v3070_v55 }
0x168a   : > { %v3078_v56 = vpop.permute.xlu0 %3077 }
0x168b   : > { %v3083_v57 = vsel %vm1244_vm4, %v3078_v56, 0 }
0x168c   : > { %6446 = vmatpush3.bf16.msra.mxu0 %v3083_v57  ;;  %v3126_v39 = vpop.permute.xlu1 %3125 }
0x168d   : > { %v3131_v36 = vsel %vm1244_vm4, %v3126_v39, 0  ;;  %6457 = vmatprep.subr.bf16.mxu0 %v6794_v3  ;;  %v3334_v39 = vld [vmem:[%s7004_s8 + $0x80] sm:$0xff] }
0x168e   : > { %6452 = vmatpush3.bf16.msra.mxu1 %v3131_v36  ;;  %v6530_v49 = vpop.permute.xlu0 %6529  ;;  %v3342_v36 = vld [vmem:[%s7004_s8 + $0xc0] sm:$0xff] }
0x168f   : > { %v6532_v10 = vunpack.i.h.bf16 %v6530_v49  ;;  %v6531_v11 = vunpack.i.l.bf16 %v6530_v49 }
0x1690   : > { %v6525_v52 = vpop.permute.xlu1 %6524 }
0x1691   : > { %v6741_v16 = vpop.eup %6740  ;;  %v6527_v53 = vunpack.i.h.bf16 %v6525_v52  ;;  %v6526_v61 = vunpack.i.l.bf16 %v6525_v52 }
0x1692   : > { %v3073_v22 = vmul.f32 %v6741_v16, %v6737_v1  ;;  %v3318_v1 = vld [vmem:[%s7004_s8] sm:$0xff]  ;;  %v3335_v16 = vld [vmem:[%s7004_s8 + $0x88] sm:$0xff] }
0x1693   : > { %v6743_v23 = vpop.eup %6742  ;;  %v3197_v9 = vsel %vm1117_vm3, %v7352_v30, %v6526_v61  ;;  %v5782_v30 = vld [vmem:[%s7901_s30] ss:$0 sm:$0xff]  ;;  %v5789_v51 = vcombine.high %v3318_v1, %v3326_v47  ;;  %v5788_v55 = vcombine.low %v3318_v1, %v3326_v47  ;;  %v3324_v1 = vld [vmem:[%s7004_s8 + $0x30] sm:$0xff]  ;;  %s7908_s30 = sld [smem:[#allocation25_spill]] (!%p5959_p5) }
0x1694   : > { %v3074_v58 = vmul.f32 %v6743_v23, %v6739_v50  ;;  %v3075_v59 = vpack.c.bf16 %v3073_v22, %v3073_v22  ;;  %v3199_v17 = vsel %vm2028_vm5, %v3197_v9, %v6531_v11  ;;  %v3319_v50 = vld [vmem:[%s7004_s8 + $0x8] sm:$0xff]  ;;  %v5805_v22 = vcombine.high %v3334_v39, %v3342_v36  ;;  %v3332_v47 = vld [vmem:[%s7004_s8 + $0x70] sm:$0xff] }
0x1695   : > { %v5790_v56 = vcombine.low %v3319_v50, %v3327_v54  ;;  %v5791_v57 = vcombine.high %v3319_v50, %v3327_v54  ;;  %3597 = vmatprep.subr.bf16.mxu1 %v5789_v51  ;;  %v3343_v23 = vld [vmem:[%s7004_s8 + $0xc8] sm:$0xff]  ;;  %v3325_v50 = vld [vmem:[%s7004_s8 + $0x38] sm:$0xff] }
0x1696   : > { %6448 = vmatmul.mubr.msk.bf16.vlgmr.msra.gmra.mrb[68].mxu0 %vm1117_vm3, %v3075_v59  ;;  %v3076_v60 = vpack.c.bf16 %v3074_v58, %v3074_v58  ;;  %v5804_v58 = vcombine.low %v3334_v39, %v3342_v36  ;;  %v5806_v59 = vcombine.low %v3335_v16, %v3343_v23  ;;  %v3333_v51 = vld [vmem:[%s7004_s8 + $0x78] sm:$0xff]  ;;  %v3340_v39 = vld [vmem:[%s7004_s8 + $0xb0] sm:$0xff] }
0x1697   : > { %6461 = vmatprep.mubr.msk.bf16.mxu0 %vm6795_vm1, %v6794_v3  ;;  %6458 = vmatpush3.bf16.msra.mxu0 %v6546_v62  ;;  %v3320_v62 = vld [vmem:[%s7004_s8 + $0x10] sm:$0xff] }
0x1698   : > { %6454 = vmatmul.mubr.msk.bf16.vlgmr.msra.gmra.mrb[68].mxu1 %vm1117_vm3, %v3076_v60  ;;  %6459 = vmatprep.subr.bf16.mxu0 %v6794_v3  ;;  %v3198_v3 = vsel %vm1117_vm3, %v7354_v33, %v6527_v53  ;;  %v5807_v60 = vcombine.high %v3335_v16, %v3343_v23  ;;  %v3348_v36 = vld [vmem:[%s7004_s8 + $0xf0] sm:$0xff]  ;;  %v3341_v16 = vld [vmem:[%s7004_s8 + $0xb8] sm:$0xff]  ;;  %v5800_v23 = vcombine.low %v3324_v1, %v3332_v47 }
0x1699   : > { %v3200_v18 = vsel %vm2028_vm5, %v3198_v3, %v6532_v10  ;;  %3598 = vmatpush1.bf16.msra.mxu1 %v5788_v55  ;;  %v5786_v10 = vld [vmem:[%s1019_s12] ss:$0 sm:$0xff] }
0x169a   : > { %3599 = vmatprep.subr.bf16.mxu1 %v5805_v22  ;;  %v3349_v22 = vld [vmem:[%s7004_s8 + $0xf8] sm:$0xff] }
0x169b   : > { %6460 = vmatpush3.bf16.msra.mxu0 %v6547_v63  ;;  %v3328_v63 = vld [vmem:[%s7004_s8 + $0x50] sm:$0xff] }
0x169c   : > { %3640 = vmatprep.subr.bf16.mxu0 %v5791_v57  ;;  %v5803_v57 = vcombine.high %v3325_v50, %v3333_v51 }
0x169d   : > { %3600 = vmatpush1.bf16.msra.mxu1 %v5804_v58  ;;  %v5802_v58 = vcombine.low %v3325_v50, %v3333_v51 }
0x1769   : > { %v3119_v0 = vpop.f32.mrb[68].mxu0 }
0x176a   : > { %v6449_v2 = vpop.f32.mrb[69].mxu0 }
0x176b   : > { %v3122_v4 = vpop.f32.mrb[70].mxu0  ;;  %v3167_v5 = vpop.f32.mrb[68].mxu1  ;;  %v6810_v2 = vmov 0  }
0x176c   : > { %v6533_v6 = vpack.i.bf16 %v3167_v5, %v3119_v0  ;;  %v6450_v7 = vpop.f32.mrb[71].mxu0  ;;  %v6455_v13 = vpop.f32.mrb[69].mxu1  ;;  %v3321_v0 = vld [vmem:[%s7004_s8 + $0x18] sm:$0xff]  ;;  %3629 = vmatprep.mubr.bf16.mxu1 %v6810_v2  ;;  %v5793_v4 = vcombine.high %v3320_v62, %v3328_v63 }
0x176d   : > { %v3170_v8 = vpop.f32.mrb[70].mxu1  ;;  %v3329_v5 = vld [vmem:[%s7004_s8 + $0x58] sm:$0xff] }
0x176e   : > { %v6456_v48 = vpop.f32.mrb[71].mxu1  ;;  %6534 = vrot.lane.b32.xlu1 %v6533_v6, %s6809_s7  ;;  %v5792_v6 = vcombine.low %v3320_v62, %v3328_v63  ;;  %v5794_v7 = vcombine.low %v3321_v0, %v3329_v5  ;;  %v5795_v13 = vcombine.high %v3321_v0, %v3329_v5  ;;  %3683 = vmatprep.subr.bf16.mxu1 %v5793_v4  ;;  %s7902_s7 = scalar_lea.vmem %s7836_s19, %s6952_s27  ;;  %v6548_v0 = vld [vmem:[%s7019_s29 + $0x40] sm:$0xff]  }
0x176f   : > { %v5816_v62 = vcombine.low %v3340_v39, %v3348_v36  ;;  %v5818_v63 = vcombine.low %v3341_v16, %v3349_v22  ;;  %v6549_v4 = vld [vmem:[%s7019_s29 + $0xc0] sm:$0xff]  }
0x1770   : > { %v6550_v5 = vld [vmem:[%s7019_s29] sm:$0xff]  }
0x17e0   : > { %v6535_v12 = vpop.permute.xlu1 %6534 }
0x17e1   : > { %v6537_v14 = vunpack.i.h.bf16 %v6535_v12  ;;  %v6536_v15 = vunpack.i.l.bf16 %v6535_v12 }
0x17e3   : > { %v3202_v19 = vsel %vm2031_vm6, %v3200_v18, %v6537_v14  ;;  %v3201_v20 = vsel %vm2031_vm6, %v3199_v17, %v6536_v15  ;;  %v5787_v15 = vld [vmem:[%s7902_s7] ss:$0 sm:$0xff]  ;;  %v3336_v18 = vld [vmem:[%s7004_s8 + $0x90] sm:$0xff] }
0x17e4   : > { %v3203_v21 = vpack.c.bf16 %v3202_v19, %v3201_v20  ;;  %v3344_v19 = vld [vmem:[%s7004_s8 + $0xd0] sm:$0xff]  ;;  %v3337_v20 = vld [vmem:[%s7004_s8 + $0x98] sm:$0xff] }
0x17e6   : > { %6462 = vmatmul.mubr.msk.bf16.vlgmr.msra.gmra.mrb[72].mxu0 %vm1067_vm2, %v3203_v21  ;;  %v3345_v21 = vld [vmem:[%s7004_s8 + $0xd8] sm:$0xff] }
0x17e7   : > { %3641 = vmatpush1.bf16.msra.mxu0 %v5790_v56  ;;  %3672 = vmatprep.mubr.bf16.mxu0 %v6810_v2  ;;  %v5801_v56 = vcombine.high %v3324_v1, %v3332_v47 }
0x17e8   : > { %3642 = vmatprep.subr.bf16.mxu0 %v5807_v60  ;;  %v5819_v60 = vcombine.high %v3341_v16, %v3349_v22 }
0x17eb   : > { %3643 = vmatpush1.bf16.msra.mxu0 %v5806_v59  ;;  %v5817_v59 = vcombine.high %v3340_v39, %v3348_v36 }
0x17ec   : > { %3726 = vmatprep.subr.bf16.mxu0 %v5795_v13  ;;  %v6553_v13 = vld [vmem:[%s7019_s29 + $0xc8] sm:$0xff]  }
0x18b9   : > { %v3264_v33 = vpop.f32.mrb[72].mxu0 }
0x18ba   : > { %v3265_v24 = vadd.f32 %v5782_v30, %v3264_v33  ;;  %v6463_v25 = vpop.f32.mrb[73].mxu0 }
0x18bb   : > { %v3267_v26 = vpop.f32.mrb[74].mxu0  ;;  %v5809_v25 = vcombine.high %v3336_v18, %v3344_v19 }
0x18bc   : > { %v3268_v27 = vadd.f32 %v5782_v30, %v3267_v26  ;;  %v6464_v31 = vpop.f32.mrb[75].mxu0  ;;  %v3271_v32 = vadd.f32 %v3265_v24, %v7275_v28  ;;  %v5811_v26 = vcombine.high %v3337_v20, %v3345_v21 }
0x18bd   : > { %v3330_v31 = vld [vmem:[%s7004_s8 + $0x60] sm:$0xff] }
0x18be   : > { %v3273_v34 = vsel %vm1067_vm2, %v3271_v32, 0.0  ;;  %v3272_v35 = vadd.f32 %v3268_v27, %v7277_v29  ;;  %v3322_v27 = vld [vmem:[%s7004_s8 + $0x20] sm:$0xff] }
0x18bf   : > { %3274 = vadd.xlane.f32.xlu0 %v3273_v34  ;;  %v3331_v34 = vld [vmem:[%s7004_s8 + $0x68] sm:$0xff] }
0x18c0   : > { %v3276_v37 = vsel %vm1067_vm2, %v3272_v35, 0.0 }
0x18c1   : > { %3277 = vadd.xlane.f32.xlu1 %v3276_v37  ;;  %v5810_v37 = vcombine.low %v3337_v20, %v3345_v21  ;;  %v6571_v20 = vld [vmem:[%s7019_s29 + $0xa8] sm:$0xff]   ;;  %v6572_v21 = vld [vmem:[%s7019_s29 + $0x70] sm:$0xff]  }
0x194c   : > { %v3275_v38 = vpop.xlane.xlu0 %3274 }
0x194d   : > { %v3279_v40 = vmul.f32 0.03125, %v3275_v38  ;;  %v5797_v38 = vcombine.high %v3322_v27, %v3330_v31 }
0x194e   : > { %v3278_v41 = vpop.xlane.xlu1 %3277 }
0x194f   : > { %v3281_v42 = vsub.f32 %v3271_v32, %v3279_v40  ;;  %v3280_v43 = vmul.f32 0.03125, %v3278_v41  ;;  %v3323_v32 = vld [vmem:[%s7004_s8 + $0x28] sm:$0xff]  ;;  %v3338_v41 = vld [vmem:[%s7004_s8 + $0xa0] sm:$0xff] }
0x1950   : > { %v5799_v40 = vcombine.high %v3323_v32, %v3331_v34 }
0x1951   : > { %v3282_v44 = vsub.f32 %v3272_v35, %v3280_v43  ;;  %v3283_v45 = vmul.f32 %v3281_v42, %v3281_v42  ;;  %v5808_v35 = vcombine.low %v3336_v18, %v3344_v19  ;;  %v3339_v43 = vld [vmem:[%s7004_s8 + $0xa8] sm:$0xff] }
0x1952   : > { %v6569_v18 = vld [vmem:[%s7019_s29 + $0xe8] sm:$0xff]  }
0x1953   : > { %v3285_v28 = vsel %vm1067_vm2, %v3283_v45, 0.0  ;;  %v3284_v46 = vmul.f32 %v3282_v44, %v3282_v44  ;;  %v5796_v45 = vcombine.low %v3322_v27, %v3330_v31  ;;  %v6570_v19 = vld [vmem:[%s7019_s29 + $0x28] sm:$0xff]   ;;  %v6576_v27 = vld [vmem:[%s7019_s29 + $0x78] sm:$0xff]  }
0x1954   : > { %3286 = vadd.xlane.f32.xlu0 %v3285_v28  ;;  %v5798_v28 = vcombine.low %v3323_v32, %v3331_v34  ;;  %v6577_v31 = vld [vmem:[%s7019_s29 + $0xf8] sm:$0xff]  }
0x1955   : > { %v3288_v29 = vsel %vm1067_vm2, %v3284_v46, 0.0  ;;  %v6578_v32 = vld [vmem:[%s7019_s29 + $0x38] sm:$0xff]  }
0x1956   : > { %v6579_v34 = vld [vmem:[%s7019_s29 + $0xb8] sm:$0xff]  }
0x1958   : > { %3289 = vadd.xlane.f32.xlu0 %v3288_v29 }
0x19e1   : > { %v3287_v8 = vpop.xlane.xlu0 %3286 }
0x19e2   : > { %v3291_v48 = vmul.f32 0.03125, %v3287_v8  ;;  %v6555_v8 = vld [vmem:[%s7019_s29 + $0x88] sm:$0xff]  }
0x19e4   : > { %v3293_v52 = vadd.f32 1e-05, %v3291_v48  ;;  %v6556_v48 = vld [vmem:[%s7019_s29 + $0x50] sm:$0xff]  }
0x19e5   : > { %v3290_v53 = vpop.xlane.xlu0 %3289 }
0x19e6   : > { %6744 = vrsqrt.f32 %v3293_v52  ;;  %v3292_v61 = vmul.f32 0.03125, %v3290_v53  ;;  %v6557_v52 = vld [vmem:[%s7019_s29 + $0xd0] sm:$0xff]  }
0x19e7   : > { %v6558_v53 = vld [vmem:[%s7019_s29 + $0x10] sm:$0xff]  }
0x19e8   : > { %v3294_v49 = vadd.f32 1e-05, %v3292_v61  ;;  %v6559_v61 = vld [vmem:[%s7019_s29 + $0x90] sm:$0xff]  }
0x19ea   : > { %6746 = vrsqrt.f32 %v3294_v49  ;;  %v6560_v49 = vld [vmem:[%s7019_s29 + $0x58] sm:$0xff]  }
0x19f0   : > { %v6745_v3 = vpop.eup %6744 }
0x19f1   : > { %v3297_v9 = vmul.f32 %v6745_v3, %v3281_v42  ;;  %v3346_v42 = vld [vmem:[%s7004_s8 + $0xe0] sm:$0xff]  ;;  %v6561_v3 = vld [vmem:[%s7019_s29 + $0xd8] sm:$0xff]  }
0x19f2   : > { %v5813_v46 = vcombine.high %v3338_v41, %v3346_v42  ;;  %v5812_v54 = vcombine.low %v3338_v41, %v3346_v42  ;;  %v7590_v42 = vld [vmem:[%s7009_s23 + $0x8] sm:$0xff] }
0x19f3   : > { %v3306_v12 = vmul.f32 %v5786_v10, %v3297_v9  ;;  %v6562_v9 = vld [vmem:[%s7019_s29 + $0x18] sm:$0xff]  }
0x19f4   : > { %v6747_v11 = vpop.eup %6746 }
0x19f5   : > { %v3298_v14 = vmul.f32 %v6747_v11, %v3282_v44  ;;  %v7506_v30 = vadd.f32 %v5787_v15, %v3306_v12  ;;  %v3347_v44 = vld [vmem:[%s7004_s8 + $0xe8] sm:$0xff]  ;;  %v6564_v11 = vld [vmem:[%s7019_s29 + $0x60] sm:$0xff]  }
0x19f6   : > { %v5815_v29 = vcombine.high %v3339_v43, %v3347_v44  ;;  %v5814_v55 = vcombine.low %v3339_v43, %v3347_v44  ;;  %v6565_v12 = vld [vmem:[%s7019_s29 + $0xe0] sm:$0xff]  }
0x19f7   : > { %v3307_v17 = vmul.f32 %v5786_v10, %v3298_v14  ;;  %v6563_v10 = vld [vmem:[%s7019_s29 + $0x98] sm:$0xff]   ;;  %v6566_v14 = vld [vmem:[%s7019_s29 + $0x20] sm:$0xff]  }
0x19f9   : > { %v7508_v33 = vadd.f32 %v5787_v15, %v3307_v17  ;;  %v6567_v15 = vld [vmem:[%s7019_s29 + $0xa0] sm:$0xff]   ;;  %v6568_v17 = vld [vmem:[%s7019_s29 + $0x68] sm:$0xff]  }
0x19fb   : > { %v7512_v24 = vpack.c.bf16 %v7508_v33, %v7506_v30 }
0x19fd   : > { %5820 = vmatmul.mubr.msk.bf16.vlgmr.msra.gmra.mrb[72].mxu1 %vm1067_vm2, %v7512_v24  ;;  %5821 = vmatmul.mubr.msk.bf16.vlgmr.msra.gmra.mrb[76].mxu0 %vm1067_vm2, %v7512_v24 }
0x19fe   : > { %3684 = vmatpush1.bf16.msra.mxu1 %v5792_v6  ;;  %3727 = vmatpush1.bf16.msra.mxu0 %v5794_v7  ;;  %v6551_v6 = vld [vmem:[%s7019_s29 + $0x80] sm:$0xff]   ;;  %v6552_v7 = vld [vmem:[%s7019_s29 + $0x48] sm:$0xff]  }
0x19ff   : > { %3685 = vmatprep.subr.bf16.mxu1 %v5809_v25  ;;  %3728 = vmatprep.subr.bf16.mxu0 %v5811_v26  ;;  %v6574_v25 = vld [vmem:[%s7019_s29 + $0x30] sm:$0xff]  }
0x1a00   : > { %3715 = vmatprep.mubr.bf16.mxu1 %v6810_v2  ;;  %3758 = vmatprep.mubr.bf16.mxu0 %v6810_v2  ;;  %v6575_v26 = vld [vmem:[%s7019_s29 + $0xb0] sm:$0xff]  }
0x1a02   : > { %3686 = vmatpush1.bf16.msra.mxu1 %v5808_v35  ;;  %3729 = vmatpush1.bf16.msra.mxu0 %v5810_v37  ;;  %v6580_v35 = vld [vmem:[%s7019_s29 + $0x140] sm:$0xff]  }
0x1a03   : > { %3769 = vmatprep.subr.bf16.mxu1 %v5797_v38  ;;  %3812 = vmatprep.subr.bf16.mxu0 %v5799_v40  ;;  %v6581_v37 = vld [vmem:[%s7019_s29 + $0x1c0] sm:$0xff]   ;;  %v3354_v38 = vlaneseq }
0x1a05   : > { %5822 = vmatmul.mubr.msk.bf16.vlgmr.msra.gmra.mrb[76].mxu1 %vm1067_vm2, %v7512_v24  ;;  %5823 = vmatmul.mubr.msk.bf16.vlgmr.msra.gmra.mrb[80].mxu0 %vm1067_vm2, %v7512_v24  ;;  %v7586_v40 = vshrl.u32 %v3354_v38, 7 }
0x1a06   : > { %3770 = vmatpush1.bf16.msra.mxu1 %v5796_v45  ;;  %3813 = vmatpush1.bf16.msra.mxu0 %v5798_v28  ;;  %v3350_v28 = vld [vmem:[%s7009_s23] sm:$0xff]  ;;  %s7903_s23 = scalar_lea.vmem %s7832_s15, %s6952_s27 }
0x1a07   : > { %3771 = vmatprep.subr.bf16.mxu1 %v5813_v46  ;;  %3814 = vmatprep.subr.bf16.mxu0 %v5815_v29  ;;  %v3380_v41 = vsub.s32 6, %v7586_v40  ;;  %v3356_v44 = vsub.s32 0, %v7586_v40  ;;  %v3364_v45 = vsub.s32 2, %v7586_v40  ;;  %v3360_v46 = vsub.s32 1, %v7586_v40 }
0x1a08   : > { %3801 = vmatprep.mubr.bf16.mxu1 %v6810_v2  ;;  %3844 = vmatprep.mubr.bf16.mxu0 %v6810_v2  ;;  %v3368_v29 = vsub.s32 3, %v7586_v40  ;;  %v3384_v39 = vsub.s32 7, %v7586_v40 }
0x1a09   : > { %v7593_v43 = vrot.slane %v7590_v42, %v3380_v41  ;;  %v3357_v1 = vrot.slane %v3350_v28, %v3356_v44  ;;  %v3365_v47 = vrot.slane %v3350_v28, %v3364_v45  ;;  %v3361_v50 = vrot.slane %v3350_v28, %v3360_v46 }
0x1a0a   : > { %3772 = vmatpush1.bf16.msra.mxu1 %v5812_v54  ;;  %3815 = vmatpush1.bf16.msra.mxu0 %v5814_v55  ;;  %v3369_v51 = vrot.slane %v3350_v28, %v3368_v29  ;;  %v3372_v54 = vsub.s32 4, %v7586_v40 }
0x1a0b   : > { %3855 = vmatprep.subr.bf16.mxu1 %v5801_v56  ;;  %3898 = vmatprep.subr.bf16.mxu0 %v5803_v57  ;;  %v3376_v57 = vsub.s32 5, %v7586_v40 }
0x1a0d   : > { %5824 = vmatmul.mubr.msk.bf16.vlgmr.msra.gmra.mrb[80].mxu1 %vm1067_vm2, %v7512_v24  ;;  %5825 = vmatmul.mubr.msk.bf16.vlgmr.msra.gmra.mrb[84].mxu0 %vm1067_vm2, %v7512_v24 }
0x1a0e   : > { %3856 = vmatpush1.bf16.msra.mxu1 %v5800_v23  ;;  %3899 = vmatpush1.bf16.msra.mxu0 %v5802_v58 }
0x1a0f   : > { %3857 = vmatprep.subr.bf16.mxu1 %v5817_v59  ;;  %3900 = vmatprep.subr.bf16.mxu0 %v5819_v60 }
0x1a10   : > { %3887 = vmatprep.mubr.bf16.mxu1 %v6810_v2  ;;  %3930 = vmatprep.mubr.bf16.mxu0 %v6810_v2  ;;  %v6554_v2 = vld [vmem:[%s7019_s29 + $0x8] sm:$0xff]  }
0x1a12   : > { %3858 = vmatpush1.bf16.msra.mxu1 %v5816_v62  ;;  %3901 = vmatpush1.bf16.msra.mxu0 %v5818_v63 }
0x1a13   : > { %6054 = vmatprep.subr.bf16.mxu1 %v6548_v0  ;;  %6076 = vmatprep.subr.bf16.mxu0 %v6549_v4 }
0x1a15   : > { %5826 = vmatmul.mubr.msk.bf16.vlgmr.msra.gmra.mrb[84].mxu1 %vm1067_vm2, %v7512_v24  ;;  %5827 = vmatmul.mubr.msk.bf16.vlgmr.msra.gmra.mrb[88].mxu0 %vm1067_vm2, %v7512_v24  ;;  %v6573_v24 = vld [vmem:[%s7019_s29 + $0xf0] sm:$0xff]  }
0x1a16   : > { %6055 = vmatpush3.bf16.msra.mxu1 %v6550_v5  ;;  %6077 = vmatpush3.bf16.msra.mxu0 %v6551_v6  ;;  %v3373_v6 = vrot.slane %v3350_v28, %v3372_v54 }
0x1a17   : > { %6056 = vmatprep.subr.bf16.mxu1 %v6552_v7  ;;  %6078 = vmatprep.subr.bf16.mxu0 %v6553_v13  ;;  %v3381_v7 = vrot.slane %v3350_v28, %v3380_v41 }
0x1a1a   : > { %6057 = vmatpush3.bf16.msra.mxu1 %v6554_v2  ;;  %6079 = vmatpush3.bf16.msra.mxu0 %v6555_v8  ;;  %v3377_v8 = vrot.slane %v3350_v28, %v3376_v57 }
0x1a1b   : > { %6058 = vmatprep.subr.bf16.mxu1 %v6556_v48  ;;  %6080 = vmatprep.subr.bf16.mxu0 %v6557_v52  ;;  %v3385_v48 = vrot.slane %v3350_v28, %v3384_v39  ;;  %v3397_v28 = vrot.slane %v7590_v42, %v3364_v45  ;;  %v3401_v45 = vrot.slane %v7590_v42, %v3368_v29 }
0x1a1e   : > { %6059 = vmatpush3.bf16.msra.mxu1 %v6558_v53  ;;  %6081 = vmatpush3.bf16.msra.mxu0 %v6559_v61 }
0x1a1f   : > { %6060 = vmatprep.subr.bf16.mxu1 %v6560_v49  ;;  %6082 = vmatprep.subr.bf16.mxu0 %v6561_v3 }
0x1a22   : > { %6061 = vmatpush3.bf16.msra.mxu1 %v6562_v9  ;;  %6083 = vmatpush3.bf16.msra.mxu0 %v6563_v10 }
0x1a23   : > { %6062 = vmatprep.subr.bf16.mxu1 %v6564_v11  ;;  %6084 = vmatprep.subr.bf16.mxu0 %v6565_v12 }
0x1a26   : > { %6063 = vmatpush3.bf16.msra.mxu1 %v6566_v14  ;;  %6085 = vmatpush3.bf16.msra.mxu0 %v6567_v15 }
0x1a27   : > { %6064 = vmatprep.subr.bf16.mxu1 %v6568_v17  ;;  %6086 = vmatprep.subr.bf16.mxu0 %v6569_v18 }
0x1a2a   : > { %6065 = vmatpush3.bf16.msra.mxu1 %v6570_v19  ;;  %6087 = vmatpush3.bf16.msra.mxu0 %v6571_v20  ;;  %v6582_v20 = vld [vmem:[%s7019_s29 + $0x100] sm:$0xff]  }
0x1a2b   : > { %6066 = vmatprep.subr.bf16.mxu1 %v6572_v21  ;;  %6088 = vmatprep.subr.bf16.mxu0 %v6573_v24  ;;  %v6583_v21 = vld [vmem:[%s7019_s29 + $0x180] sm:$0xff]  }
0x1a2e   : > { %6067 = vmatpush3.bf16.msra.mxu1 %v6574_v25  ;;  %6089 = vmatpush3.bf16.msra.mxu0 %v6575_v26 }
0x1a2f   : > { %6068 = vmatprep.subr.bf16.mxu1 %v6576_v27  ;;  %6090 = vmatprep.subr.bf16.mxu0 %v6577_v31  ;;  %v6584_v31 = vld [vmem:[%s7019_s29 + $0x148] sm:$0xff]  }
0x1a32   : > { %6069 = vmatpush3.bf16.msra.mxu1 %v6578_v32  ;;  %6091 = vmatpush3.bf16.msra.mxu0 %v6579_v34  ;;  %v6585_v32 = vld [vmem:[%s7019_s29 + $0x1c8] sm:$0xff]   ;;  %v3389_v34 = vrot.slane %v7590_v42, %v3356_v44  ;;  %v3393_v44 = vrot.slane %v7590_v42, %v3360_v46  ;;  %v6589_v46 = vld [vmem:[%s7019_s29 + $0x1d0] sm:$0xff]  }
0x1a33   : > { %6098 = vmatprep.subr.bf16.mxu1 %v6580_v35  ;;  %6120 = vmatprep.subr.bf16.mxu0 %v6581_v37 }
0x1ad0   : > { %v3631_v55 = vpop.f32.mrb[72].mxu1  ;;  %v3674_v56 = vpop.f32.mrb[76].mxu0 }
0x1ad1   : > { %v3632_v36 = vadd.f32 %v3631_v55, %v3357_v1  ;;  %v3675_v16 = vadd.f32 %v3674_v56, %v3365_v47  ;;  %v3633_v22 = vpop.f32.mrb[73].mxu1  ;;  %v3676_v23 = vpop.f32.mrb[77].mxu0 }
0x1ad2   : > { %v3634_v58 = vadd.f32 %v3633_v22, %v3361_v50  ;;  %v3677_v59 = vadd.f32 %v3676_v23, %v3369_v51  ;;  %v3635_v60 = vpop.f32.mrb[74].mxu1  ;;  %v3678_v62 = vpop.f32.mrb[78].mxu0 }
0x1ad3   : > { %v3636_v63 = vadd.f32 %v3635_v60, %v3357_v1  ;;  %v3679_v0 = vadd.f32 %v3678_v62, %v3365_v47  ;;  %v3637_v4 = vpop.f32.mrb[75].mxu1  ;;  %v3680_v5 = vpop.f32.mrb[79].mxu0  ;;  %v3941_v52 = vmax.f32 %v3632_v36, 0.0  ;;  %v3943_v53 = vmax.f32 %v3675_v16, 0.0  ;;  %v6586_v36 = vld [vmem:[%s7019_s29 + $0x108] sm:$0xff]   ;;  %v6588_v60 = vld [vmem:[%s7019_s29 + $0x150] sm:$0xff]  }
0x1ad4   : > { %v3638_v13 = vadd.f32 %v3637_v4, %v3361_v50  ;;  %v3681_v2 = vadd.f32 %v3680_v5, %v3369_v51  ;;  %v3942_v3 = vmax.f32 %v3634_v58, 0.0  ;;  %v3944_v9 = vmax.f32 %v3677_v59, 0.0  ;;  %v6587_v16 = vld [vmem:[%s7019_s29 + $0x188] sm:$0xff]  }
0x1ad5   : > { %v3957_v61 = vmax.f32 %v3636_v63, 0.0  ;;  %v3959_v49 = vmax.f32 %v3679_v0, 0.0 }
0x1ad6   : > { %v3958_v10 = vmax.f32 %v3638_v13, 0.0  ;;  %v3960_v11 = vmax.f32 %v3681_v2, 0.0 }
0x1ad7   : > { %v3973_v12 = vpack.c.bf16 %v3957_v61, %v3941_v52  ;;  %v3975_v14 = vpack.c.bf16 %v3959_v49, %v3943_v53 }
0x1ad8   : > { %v3974_v15 = vpack.c.bf16 %v3958_v10, %v3942_v3  ;;  %v3976_v17 = vpack.c.bf16 %v3960_v11, %v3944_v9  ;;  %v3717_v18 = vpop.f32.mrb[76].mxu1  ;;  %v3760_v19 = vpop.f32.mrb[80].mxu0  ;;  %v6592_v3 = vld [vmem:[%s7019_s29 + $0x158] sm:$0xff]  }
0x1ad9   : > { %v3718_v24 = vadd.f32 %v3717_v18, %v3373_v6  ;;  %v3761_v25 = vadd.f32 %v3760_v19, %v3381_v7  ;;  %v3719_v26 = vpop.f32.mrb[77].mxu1  ;;  %v3762_v27 = vpop.f32.mrb[81].mxu0  ;;  %v6593_v9 = vld [vmem:[%s7019_s29 + $0x1d8] sm:$0xff]  }
0x1ada   : > { %v3720_v35 = vadd.f32 %v3719_v26, %v3377_v8  ;;  %v3763_v37 = vadd.f32 %v3762_v27, %v3385_v48  ;;  %v3721_v38 = vpop.f32.mrb[78].mxu1  ;;  %v3764_v41 = vpop.f32.mrb[82].mxu0  ;;  %5045 = vmatprep.mubr.bf16.mxu1 %v3974_v15  ;;  %5086 = vmatprep.mubr.bf16.mxu0 %v3976_v17  ;;  %v6594_v26 = vld [vmem:[%s7019_s29 + $0x118] sm:$0xff]  }
0x1adb   : > { %v3722_v1 = vadd.f32 %v3721_v38, %v3373_v6  ;;  %v3765_v47 = vadd.f32 %v3764_v41, %v3381_v7  ;;  %v3723_v50 = vpop.f32.mrb[79].mxu1  ;;  %v3766_v51 = vpop.f32.mrb[83].mxu0  ;;  %5046 = vmatmul.mubr.bf16.vlgmr.msra.gmra.mrb[88].mxu1 %v3973_v12  ;;  %5087 = vmatmul.mubr.bf16.vlgmr.msra.gmra.mrb[92].mxu0 %v3975_v14  ;;  %v3945_v22 = vmax.f32 %v3718_v24, 0.0  ;;  %v3947_v23 = vmax.f32 %v3761_v25, 0.0  ;;  %v6595_v27 = vld [vmem:[%s7019_s29 + $0x198] sm:$0xff]  }
0x1adc   : > { %v3724_v55 = vadd.f32 %v3723_v50, %v3377_v8  ;;  %v3767_v56 = vadd.f32 %v3766_v51, %v3385_v48  ;;  %6099 = vmatpush3.bf16.msra.mxu1 %v6582_v20  ;;  %6121 = vmatpush3.bf16.msra.mxu0 %v6583_v21  ;;  %v3946_v62 = vmax.f32 %v3720_v35, 0.0  ;;  %v3948_v63 = vmax.f32 %v3763_v37, 0.0  ;;  %v6590_v8 = vld [vmem:[%s7019_s29 + $0x110] sm:$0xff]  }
0x1add   : > { %v3961_v58 = vmax.f32 %v3722_v1, 0.0  ;;  %v3963_v59 = vmax.f32 %v3765_v47, 0.0  ;;  %6100 = vmatprep.subr.bf16.mxu1 %v6584_v31  ;;  %6122 = vmatprep.subr.bf16.mxu0 %v6585_v32  ;;  %v6591_v48 = vld [vmem:[%s7019_s29 + $0x190] sm:$0xff]   ;;  %v3405_v20 = vrot.slane %v7590_v42, %v3372_v54  ;;  %v3409_v21 = vrot.slane %v7590_v42, %v3376_v57  ;;  %v6596_v54 = vld [vmem:[%s7019_s29 + $0x160] sm:$0xff]  }
0x1ade   : > { %v3962_v0 = vmax.f32 %v3724_v55, 0.0  ;;  %v3964_v4 = vmax.f32 %v3767_v56, 0.0  ;;  %v3417_v31 = vrot.slane %v7590_v42, %v3384_v39  ;;  %v6597_v57 = vld [vmem:[%s7019_s29 + $0x1e0] sm:$0xff]  }
0x1adf   : > { %v7629_v5 = vpack.c.bf16 %v3961_v58, %v3945_v22  ;;  %v7631_v6 = vpack.c.bf16 %v3963_v59, %v3947_v23  ;;  %v6599_v55 = vld [vmem:[%s7019_s29 + $0x1a0] sm:$0xff]   ;;  %v6600_v22 = vld [vmem:[%s7019_s29 + $0x168] sm:$0xff]  }
0x1ae0   : > { %v3978_v29 = vpack.c.bf16 %v3962_v0, %v3946_v62  ;;  %v3980_v7 = vpack.c.bf16 %v3964_v4, %v3948_v63  ;;  %6101 = vmatpush3.bf16.msra.mxu1 %v6586_v36  ;;  %6123 = vmatpush3.bf16.msra.mxu0 %v6587_v16  ;;  %v3803_v13 = vpop.f32.mrb[80].mxu1  ;;  %v3846_v2 = vpop.f32.mrb[84].mxu0  ;;  %v6601_v23 = vld [vmem:[%s7019_s29 + $0x1e8] sm:$0xff]  }
0x1ae1   : > { %v3804_v52 = vadd.f32 %v3803_v13, %v3389_v34  ;;  %v3847_v53 = vadd.f32 %v3846_v2, %v3397_v28  ;;  %v3805_v61 = vpop.f32.mrb[81].mxu1  ;;  %v3848_v49 = vpop.f32.mrb[85].mxu0  ;;  %6102 = vmatprep.subr.bf16.mxu1 %v6588_v60  ;;  %6124 = vmatprep.subr.bf16.mxu0 %v6589_v46  ;;  %v6602_v13 = vld [vmem:[%s7019_s29 + $0x128] sm:$0xff]  }
0x1ae2   : > { %v3806_v10 = vadd.f32 %v3805_v61, %v3393_v44  ;;  %v3849_v11 = vadd.f32 %v3848_v49, %v3401_v45  ;;  %v3807_v12 = vpop.f32.mrb[82].mxu1  ;;  %v3850_v14 = vpop.f32.mrb[86].mxu0  ;;  %5127 = vmatprep.mubr.bf16.mxu1 %v3978_v29  ;;  %5168 = vmatprep.mubr.bf16.mxu0 %v3980_v7  ;;  %v6603_v2 = vld [vmem:[%s7019_s29 + $0x1a8] sm:$0xff]   ;;  %v6604_v61 = vld [vmem:[%s7019_s29 + $0x170] sm:$0xff]  }
0x1ae3   : > { %v3808_v15 = vadd.f32 %v3807_v12, %v3389_v34  ;;  %v3851_v17 = vadd.f32 %v3850_v14, %v3397_v28  ;;  %v3809_v18 = vpop.f32.mrb[83].mxu1  ;;  %v3852_v19 = vpop.f32.mrb[87].mxu0  ;;  %v3949_v32 = vmax.f32 %v3804_v52, 0.0  ;;  %v3951_v34 = vmax.f32 %v3847_v53, 0.0 }
0x1ae4   : > { %v3810_v24 = vadd.f32 %v3809_v18, %v3393_v44  ;;  %v3853_v25 = vadd.f32 %v3852_v19, %v3401_v45  ;;  %6103 = vmatpush3.bf16.msra.mxu1 %v6590_v8  ;;  %6125 = vmatpush3.bf16.msra.mxu0 %v6591_v48  ;;  %v3950_v38 = vmax.f32 %v3806_v10, 0.0  ;;  %v3952_v41 = vmax.f32 %v3849_v11, 0.0  ;;  %v6598_v44 = vld [vmem:[%s7019_s29 + $0x120] sm:$0xff]   ;;  %v6607_v18 = vld [vmem:[%s7019_s29 + $0x1b0] sm:$0xff]   ;;  %v6608_v19 = vld [vmem:[%s7019_s29 + $0x178] sm:$0xff]  }
0x1ae5   : > { %v3965_v35 = vmax.f32 %v3808_v15, 0.0  ;;  %v3967_v37 = vmax.f32 %v3851_v17, 0.0  ;;  %6104 = vmatprep.subr.bf16.mxu1 %v6592_v3  ;;  %6126 = vmatprep.subr.bf16.mxu0 %v6593_v9  ;;  %v6606_v17 = vld [vmem:[%s7019_s29 + $0x130] sm:$0xff]  }
0x1ae6   : > { %v3966_v28 = vmax.f32 %v3810_v24, 0.0  ;;  %v3968_v1 = vmax.f32 %v3853_v25, 0.0  ;;  %v6611_v24 = vld [vmem:[%s7019_s29 + $0x1b8] sm:$0xff]   ;;  %v6612_v25 = vld [vmem:[%s7019_s29 + $0x240] sm:$0xff]  }
0x1ae7   : > { %v7650_v47 = vpack.c.bf16 %v3965_v35, %v3949_v32  ;;  %v7652_v40 = vpack.c.bf16 %v3967_v37, %v3951_v34  ;;  %v6616_v32 = vld [vmem:[%s7019_s29 + $0x248] sm:$0xff]  }
0x1ae8   : > { %v7654_v42 = vpack.c.bf16 %v3966_v28, %v3950_v38  ;;  %v7656_v39 = vpack.c.bf16 %v3968_v1, %v3952_v41  ;;  %6105 = vmatpush3.bf16.msra.mxu1 %v6594_v26  ;;  %6127 = vmatpush3.bf16.msra.mxu0 %v6595_v27  ;;  %v3889_v50 = vpop.f32.mrb[84].mxu1  ;;  %v3932_v51 = vpop.f32.mrb[88].mxu0  ;;  %v6613_v26 = vld [vmem:[%s7019_s29 + $0x2c0] sm:$0xff]   ;;  %v6617_v34 = vld [vmem:[%s7019_s29 + $0x2c8] sm:$0xff]   ;;  %v6624_v38 = vld [vmem:[%s7019_s29 + $0x258] sm:$0xff]  }
0x1ae9   : > { %v3890_v56 = vadd.f32 %v3889_v50, %v3405_v20  ;;  %v3933_v36 = vadd.f32 %v3932_v51, %v7593_v43  ;;  %v3891_v16 = vpop.f32.mrb[85].mxu1  ;;  %v3934_v45 = vpop.f32.mrb[89].mxu0  ;;  %6106 = vmatprep.subr.bf16.mxu1 %v6596_v54  ;;  %6128 = vmatprep.subr.bf16.mxu0 %v6597_v57  ;;  %v6614_v27 = vld [vmem:[%s7019_s29 + $0x200] sm:$0xff]   ;;  %v6618_v35 = vld [vmem:[%s7019_s29 + $0x208] sm:$0xff]   ;;  %v6620_v54 = vld [vmem:[%s7019_s29 + $0x250] sm:$0xff]  }
0x1aea   : > { %v3892_v58 = vadd.f32 %v3891_v16, %v3409_v21  ;;  %v3935_v59 = vadd.f32 %v3934_v45, %v3417_v31  ;;  %v3893_v60 = vpop.f32.mrb[86].mxu1  ;;  %v3936_v46 = vpop.f32.mrb[90].mxu0  ;;  %v6619_v37 = vld [vmem:[%s7019_s29 + $0x288] sm:$0xff]   ;;  %v6623_v57 = vld [vmem:[%s7019_s29 + $0x290] sm:$0xff]   ;;  %v6625_v41 = vld [vmem:[%s7019_s29 + $0x2d8] sm:$0xff]  }
0x1aeb   : > { %v3894_v62 = vadd.f32 %v3893_v60, %v3405_v20  ;;  %v3937_v63 = vadd.f32 %v3936_v46, %v7593_v43  ;;  %v3895_v0 = vpop.f32.mrb[87].mxu1  ;;  %v3938_v4 = vpop.f32.mrb[91].mxu0  ;;  %v3953_v8 = vmax.f32 %v3890_v56, 0.0  ;;  %v3955_v48 = vmax.f32 %v3933_v36, 0.0  ;;  %v6605_v43 = vld [vmem:[%s7019_s29 + $0x1f0] sm:$0xff]   ;;  %v6609_v20 = vld [vmem:[%s7019_s29 + $0x1f8] sm:$0xff]  }
0x1aec   : > { %v3896_v29 = vadd.f32 %v3895_v0, %v3409_v21  ;;  %v3939_v7 = vadd.f32 %v3938_v4, %v3417_v31  ;;  %6107 = vmatpush3.bf16.msra.mxu1 %v6598_v44  ;;  %6129 = vmatpush3.bf16.msra.mxu0 %v6599_v55  ;;  %v3954_v49 = vmax.f32 %v3892_v58, 0.0  ;;  %v3956_v3 = vmax.f32 %v3935_v59, 0.0  ;;  %v6610_v21 = vld [vmem:[%s7019_s29 + $0x138] sm:$0xff]   ;;  %v6615_v31 = vld [vmem:[%s7019_s29 + $0x280] sm:$0xff]   ;;  %v6632_v44 = vld [vmem:[%s7019_s29 + $0x268] sm:$0xff]  }
0x1aed   : > { %v3969_v52 = vmax.f32 %v3894_v62, 0.0  ;;  %v3971_v53 = vmax.f32 %v3937_v63, 0.0  ;;  %6108 = vmatprep.subr.bf16.mxu1 %v6600_v22  ;;  %6130 = vmatprep.subr.bf16.mxu0 %v6601_v23  ;;  %v6626_v28 = vld [vmem:[%s7019_s29 + $0x218] sm:$0xff]   ;;  %v6630_v50 = vld [vmem:[%s7019_s29 + $0x220] sm:$0xff]   ;;  %v6633_v55 = vld [vmem:[%s7019_s29 + $0x2e8] sm:$0xff]  }
0x1aee   : > { %v3970_v9 = vmax.f32 %v3896_v29, 0.0  ;;  %v3972_v10 = vmax.f32 %v3939_v7, 0.0  ;;  %v6627_v1 = vld [vmem:[%s7019_s29 + $0x298] sm:$0xff]   ;;  %v6631_v51 = vld [vmem:[%s7019_s29 + $0x2a0] sm:$0xff]   ;;  %v6634_v56 = vld [vmem:[%s7019_s29 + $0x228] sm:$0xff]  }
0x1aef   : > { %v7668_v11 = vpack.c.bf16 %v3969_v52, %v3953_v8  ;;  %v7670_v12 = vpack.c.bf16 %v3971_v53, %v3955_v48  ;;  %v6635_v36 = vld [vmem:[%s7019_s29 + $0x2a8] sm:$0xff]   ;;  %v6636_v16 = vld [vmem:[%s7019_s29 + $0x270] sm:$0xff]   ;;  %v6640_v58 = vld [vmem:[%s7019_s29 + $0x278] sm:$0xff]  }
0x1af0   : > { %v7672_v14 = vpack.c.bf16 %v3970_v9, %v3954_v49  ;;  %v7674_v15 = vpack.c.bf16 %v3972_v10, %v3956_v3  ;;  %6109 = vmatpush3.bf16.msra.mxu1 %v6602_v13  ;;  %6131 = vmatpush3.bf16.msra.mxu0 %v6603_v2  ;;  %v6637_v45 = vld [vmem:[%s7019_s29 + $0x2f0] sm:$0xff]   ;;  %v6641_v59 = vld [vmem:[%s7019_s29 + $0x2f8] sm:$0xff]   ;;  %v6644_v62 = vld [vmem:[%s7019_s29 + $0x340] sm:$0xff]  }
0x1af1   : > { %6110 = vmatprep.subr.bf16.mxu1 %v6604_v61  ;;  %6132 = vmatprep.subr.bf16.mxu0 %v6605_v43  ;;  %v6638_v22 = vld [vmem:[%s7019_s29 + $0x230] sm:$0xff]   ;;  %v6642_v60 = vld [vmem:[%s7019_s29 + $0x238] sm:$0xff]   ;;  %v6645_v63 = vld [vmem:[%s7019_s29 + $0x3c0] sm:$0xff]  }
0x1af2   : > { %v6639_v23 = vld [vmem:[%s7019_s29 + $0x2b0] sm:$0xff]   ;;  %v6643_v46 = vld [vmem:[%s7019_s29 + $0x2b8] sm:$0xff]   ;;  %v6646_v0 = vld [vmem:[%s7019_s29 + $0x300] sm:$0xff]  }
0x1af3   : > { %v6647_v4 = vld [vmem:[%s7019_s29 + $0x380] sm:$0xff]   ;;  %v6648_v29 = vld [vmem:[%s7019_s29 + $0x348] sm:$0xff]   ;;  %v6652_v8 = vld [vmem:[%s7019_s29 + $0x350] sm:$0xff]  }
0x1af4   : > { %6111 = vmatpush3.bf16.msra.mxu1 %v6606_v17  ;;  %6133 = vmatpush3.bf16.msra.mxu0 %v6607_v18  ;;  %v6649_v7 = vld [vmem:[%s7019_s29 + $0x3c8] sm:$0xff]   ;;  %v6655_v48 = vld [vmem:[%s7019_s29 + $0x390] sm:$0xff]   ;;  %v6656_v52 = vld [vmem:[%s7019_s29 + $0x358] sm:$0xff]  }
0x1af5   : > { %6112 = vmatprep.subr.bf16.mxu1 %v6608_v19  ;;  %6134 = vmatprep.subr.bf16.mxu0 %v6609_v20  ;;  %v6650_v13 = vld [vmem:[%s7019_s29 + $0x308] sm:$0xff]   ;;  %v6657_v53 = vld [vmem:[%s7019_s29 + $0x3d8] sm:$0xff]   ;;  %v6660_v49 = vld [vmem:[%s7019_s29 + $0x360] sm:$0xff]  }
0x1af6   : > { %v6651_v2 = vld [vmem:[%s7019_s29 + $0x388] sm:$0xff]   ;;  %v6658_v61 = vld [vmem:[%s7019_s29 + $0x318] sm:$0xff]   ;;  %v6661_v3 = vld [vmem:[%s7019_s29 + $0x3e0] sm:$0xff]  }
0x1af7   : > { %v6659_v43 = vld [vmem:[%s7019_s29 + $0x398] sm:$0xff]   ;;  %v6662_v9 = vld [vmem:[%s7019_s29 + $0x320] sm:$0xff]   ;;  %v6666_v17 = vld [vmem:[%s7019_s29 + $0x328] sm:$0xff]  }
0x1af8   : > { %6113 = vmatpush3.bf16.msra.mxu1 %v6610_v21  ;;  %6135 = vmatpush3.bf16.msra.mxu0 %v6611_v24  ;;  %v6663_v10 = vld [vmem:[%s7019_s29 + $0x3a0] sm:$0xff]   ;;  %v6667_v18 = vld [vmem:[%s7019_s29 + $0x3a8] sm:$0xff]   ;;  %v6668_v19 = vld [vmem:[%s7019_s29 + $0x370] sm:$0xff]  }
0x1af9   : > { %6142 = vmatprep.subr.bf16.mxu1 %v6612_v25  ;;  %6164 = vmatprep.subr.bf16.mxu0 %v6613_v26  ;;  %v6669_v20 = vld [vmem:[%s7019_s29 + $0x3f0] sm:$0xff]   ;;  %v6672_v25 = vld [vmem:[%s7019_s29 + $0x378] sm:$0xff]  }
0x1afa   : > { %v6670_v21 = vld [vmem:[%s7019_s29 + $0x330] sm:$0xff]   ;;  %v6673_v26 = vld [vmem:[%s7019_s29 + $0x3f8] sm:$0xff]  }
0x1afb   : > { %5128 = vmatmul.mubr.bf16.vlgmr.msra.gmra.mrb[92].mxu1 %v7629_v5  ;;  %5169 = vmatmul.mubr.bf16.vlgmr.msra.gmra.mrb[96].mxu0 %v7631_v6  ;;  %v6621_v5 = vld [vmem:[%s7019_s29 + $0x2d0] sm:$0xff]  }
0x1afc   : > { %6143 = vmatpush3.bf16.msra.mxu1 %v6614_v27  ;;  %5209 = vmatprep.mubr.bf16.mxu1 %v7654_v42  ;;  %v6622_v6 = vld [vmem:[%s7019_s29 + $0x210] sm:$0xff]   ;;  %v6628_v42 = vld [vmem:[%s7019_s29 + $0x260] sm:$0xff]   ;;  %v6674_v27 = vld [vmem:[%s7019_s29 + $0x338] sm:$0xff]  }
0x1afd   : > { %6165 = vmatpush3.bf16.msra.mxu0 %v6615_v31  ;;  %5250 = vmatprep.mubr.bf16.mxu0 %v7656_v39  ;;  %v6629_v39 = vld [vmem:[%s7019_s29 + $0x2e0] sm:$0xff]   ;;  %v6671_v24 = vld [vmem:[%s7019_s29 + $0x3b0] sm:$0xff]   ;;  %v6675_v31 = vld [vmem:[%s7019_s29 + $0x3b8] sm:$0xff]  }
0x1afe   : > { %6144 = vmatprep.subr.bf16.mxu1 %v6616_v32  ;;  %6166 = vmatprep.subr.bf16.mxu0 %v6617_v34 }
0x1b00   : > { %6145 = vmatpush3.bf16.msra.mxu1 %v6618_v35 }
0x1b01   : > { %6167 = vmatpush3.bf16.msra.mxu0 %v6619_v37  ;;  %6146 = vmatprep.subr.bf16.mxu1 %v6620_v54 }
0x1b02   : > { %6168 = vmatprep.subr.bf16.mxu0 %v6621_v5 }
0x1b04   : > { %6147 = vmatpush3.bf16.msra.mxu1 %v6622_v6 }
0x1b05   : > { %6169 = vmatpush3.bf16.msra.mxu0 %v6623_v57  ;;  %6148 = vmatprep.subr.bf16.mxu1 %v6624_v38 }
0x1b06   : > { %6170 = vmatprep.subr.bf16.mxu0 %v6625_v41 }
0x1b08   : > { %6149 = vmatpush3.bf16.msra.mxu1 %v6626_v28 }
0x1b09   : > { %6171 = vmatpush3.bf16.msra.mxu0 %v6627_v1  ;;  %6150 = vmatprep.subr.bf16.mxu1 %v6628_v42 }
0x1b0a   : > { %6172 = vmatprep.subr.bf16.mxu0 %v6629_v39 }
0x1b0c   : > { %6151 = vmatpush3.bf16.msra.mxu1 %v6630_v50 }
0x1b0d   : > { %6173 = vmatpush3.bf16.msra.mxu0 %v6631_v51  ;;  %6152 = vmatprep.subr.bf16.mxu1 %v6632_v44 }
0x1b0e   : > { %6174 = vmatprep.subr.bf16.mxu0 %v6633_v55 }
0x1b10   : > { %6153 = vmatpush3.bf16.msra.mxu1 %v6634_v56 }
0x1b11   : > { %6175 = vmatpush3.bf16.msra.mxu0 %v6635_v36  ;;  %6154 = vmatprep.subr.bf16.mxu1 %v6636_v16 }
0x1b12   : > { %6176 = vmatprep.subr.bf16.mxu0 %v6637_v45 }
0x1b14   : > { %6155 = vmatpush3.bf16.msra.mxu1 %v6638_v22 }
0x1b15   : > { %6177 = vmatpush3.bf16.msra.mxu0 %v6639_v23  ;;  %6156 = vmatprep.subr.bf16.mxu1 %v6640_v58 }
0x1b16   : > { %6178 = vmatprep.subr.bf16.mxu0 %v6641_v59 }
0x1b18   : > { %6157 = vmatpush3.bf16.msra.mxu1 %v6642_v60 }
0x1b19   : > { %6179 = vmatpush3.bf16.msra.mxu0 %v6643_v46  ;;  %6186 = vmatprep.subr.bf16.mxu1 %v6644_v62 }
0x1b1a   : > { %6208 = vmatprep.subr.bf16.mxu0 %v6645_v63 }
0x1b1b   : > { %5210 = vmatmul.mubr.bf16.vlgmr.msra.gmra.mrb[96].mxu1 %v7650_v47  ;;  %v6653_v47 = vld [vmem:[%s7019_s29 + $0x3d0] sm:$0xff]  }
0x1b1c   : > { %5251 = vmatmul.mubr.bf16.vlgmr.msra.gmra.mrb[100].mxu0 %v7652_v40  ;;  %6187 = vmatpush3.bf16.msra.mxu1 %v6646_v0  ;;  %v6654_v40 = vld [vmem:[%s7019_s29 + $0x310] sm:$0xff]  }
0x1b1d   : > { %5291 = vmatprep.mubr.bf16.mxu1 %v7672_v14  ;;  %6209 = vmatpush3.bf16.msra.mxu0 %v6647_v4  ;;  %v6664_v14 = vld [vmem:[%s7019_s29 + $0x368] sm:$0xff]  }
0x1b1e   : > { %5332 = vmatprep.mubr.bf16.mxu0 %v7674_v15  ;;  %6188 = vmatprep.subr.bf16.mxu1 %v6648_v29  ;;  %v6665_v15 = vld [vmem:[%s7019_s29 + $0x3e8] sm:$0xff]  }
0x1b1f   : > { %6210 = vmatprep.subr.bf16.mxu0 %v6649_v7 }
0x1b20   : > { %6189 = vmatpush3.bf16.msra.mxu1 %v6650_v13 }
0x1b21   : > { %6211 = vmatpush3.bf16.msra.mxu0 %v6651_v2  ;;  %6190 = vmatprep.subr.bf16.mxu1 %v6652_v8 }
0x1b22   : > { %6212 = vmatprep.subr.bf16.mxu0 %v6653_v47 }
0x1b24   : > { %6191 = vmatpush3.bf16.msra.mxu1 %v6654_v40 }
0x1b25   : > { %6213 = vmatpush3.bf16.msra.mxu0 %v6655_v48  ;;  %6192 = vmatprep.subr.bf16.mxu1 %v6656_v52 }
0x1b26   : > { %6214 = vmatprep.subr.bf16.mxu0 %v6657_v53 }
0x1b28   : > { %6193 = vmatpush3.bf16.msra.mxu1 %v6658_v61 }
0x1b29   : > { %6215 = vmatpush3.bf16.msra.mxu0 %v6659_v43  ;;  %6194 = vmatprep.subr.bf16.mxu1 %v6660_v49 }
0x1b2a   : > { %6216 = vmatprep.subr.bf16.mxu0 %v6661_v3 }
0x1b2c   : > { %6195 = vmatpush3.bf16.msra.mxu1 %v6662_v9 }
0x1b2d   : > { %6217 = vmatpush3.bf16.msra.mxu0 %v6663_v10  ;;  %6196 = vmatprep.subr.bf16.mxu1 %v6664_v14 }
0x1b2e   : > { %6218 = vmatprep.subr.bf16.mxu0 %v6665_v15 }
0x1b30   : > { %6197 = vmatpush3.bf16.msra.mxu1 %v6666_v17 }
0x1b31   : > { %6219 = vmatpush3.bf16.msra.mxu0 %v6667_v18  ;;  %6198 = vmatprep.subr.bf16.mxu1 %v6668_v19 }
0x1b32   : > { %6220 = vmatprep.subr.bf16.mxu0 %v6669_v20 }
0x1b34   : > { %6199 = vmatpush3.bf16.msra.mxu1 %v6670_v21 }
0x1b35   : > { %6221 = vmatpush3.bf16.msra.mxu0 %v6671_v24  ;;  %6200 = vmatprep.subr.bf16.mxu1 %v6672_v25 }
0x1b36   : > { %6222 = vmatprep.subr.bf16.mxu0 %v6673_v26 }
0x1b38   : > { %6201 = vmatpush3.bf16.msra.mxu1 %v6674_v27 }
0x1b39   : > { %6223 = vmatpush3.bf16.msra.mxu0 %v6675_v31  ;;  %v5956_v31 = vld [vmem:[%s7903_s23] ss:$0 sm:$0xff] }
0x1b3b   : > { %5292 = vmatmul.mubr.bf16.vlgmr.msra.gmra.mrb[100].mxu1 %v7668_v11 }
0x1b3c   : > { %5333 = vmatmul.mubr.bf16.vlgmr.msra.gmra.mrb[104].mxu0 %v7670_v12 }
0x1bae   : > { %v6070_v32 = vpop.f32.mrb[88].mxu1  ;;  %v6092_v34 = vpop.f32.mrb[92].mxu0 }
0x1baf   : > { %v6071_v35 = vpop.f32.mrb[89].mxu1  ;;  %v6093_v37 = vpop.f32.mrb[93].mxu0 }
0x1bb0   : > { %v6072_v54 = vadd.f32 %v6071_v35, %v6070_v32  ;;  %v6094_v5 = vadd.f32 %v6093_v37, %v6092_v34  ;;  %v6073_v6 = vpop.f32.mrb[90].mxu1  ;;  %v6095_v57 = vpop.f32.mrb[94].mxu0 }
0x1bb1   : > { %v6074_v38 = vpop.f32.mrb[91].mxu1  ;;  %v6096_v41 = vpop.f32.mrb[95].mxu0 }
0x1bb2   : > { %v5089_v28 = vadd.f32 %v6094_v5, %v6072_v54  ;;  %v6075_v1 = vadd.f32 %v6074_v38, %v6073_v6  ;;  %v6097_v42 = vadd.f32 %v6096_v41, %v6095_v57 }
0x1bb4   : > { %v5092_v39 = vadd.f32 %v6097_v42, %v6075_v1 }
0x1bce   : > { %v6114_v50 = vpop.f32.mrb[92].mxu1  ;;  %v6136_v51 = vpop.f32.mrb[96].mxu0 }
0x1bcf   : > { %v6115_v44 = vpop.f32.mrb[93].mxu1  ;;  %v6137_v11 = vpop.f32.mrb[97].mxu0 }
0x1bd0   : > { %v6116_v55 = vadd.f32 %v6115_v44, %v6114_v50  ;;  %v6138_v12 = vadd.f32 %v6137_v11, %v6136_v51  ;;  %v6117_v56 = vpop.f32.mrb[94].mxu1  ;;  %v6139_v36 = vpop.f32.mrb[98].mxu0 }
0x1bd1   : > { %v6118_v16 = vpop.f32.mrb[95].mxu1  ;;  %v6140_v45 = vpop.f32.mrb[99].mxu0 }
0x1bd2   : > { %v5130_v22 = vadd.f32 %v6116_v55, %v5089_v28  ;;  %v6119_v23 = vadd.f32 %v6118_v16, %v6117_v56  ;;  %v6141_v58 = vadd.f32 %v6140_v45, %v6139_v36  ;;  %v5957_v16 = vld [vmem:[%s7904_s6] ss:$0 sm:$0xff] }
0x1bd4   : > { %v5171_v59 = vadd.f32 %v6138_v12, %v5130_v22  ;;  %v5133_v60 = vadd.f32 %v6119_v23, %v5092_v39  ;;  %v5958_v23 = vld [vmem:[%s7906_s5] ss:$0 sm:$0xff] }
0x1bd6   : > { %v5174_v46 = vadd.f32 %v6141_v58, %v5133_v60 }
0x1bee   : > { %v6158_v62 = vpop.f32.mrb[96].mxu1 }
0x1bef   : > { %v6180_v63 = vpop.f32.mrb[100].mxu0  ;;  %v6159_v0 = vpop.f32.mrb[97].mxu1 }
0x1bf0   : > { %v6160_v4 = vadd.f32 %v6159_v0, %v6158_v62  ;;  %v6181_v29 = vpop.f32.mrb[101].mxu0  ;;  %v6161_v7 = vpop.f32.mrb[98].mxu1  ;;  %v6811_v0 = vmov (!%p5959_p5), 0.0  }
0x1bf1   : > { %v6182_v13 = vadd.f32 %v6181_v29, %v6180_v63  ;;  %v6183_v2 = vpop.f32.mrb[102].mxu0  ;;  %v6162_v8 = vpop.f32.mrb[99].mxu1  ;;  %v6754_v63 = vld [vmem:[%s7908_s30] sm:$0xff] (!%p5959_p5)   ;;  %6465 = vmatprep.subr.bf16.mxu0 (!%p5959_p5), %v6811_v0  ;;  %6469 = vmatprep.mubr.msk.bf16.mxu0 (!%p5959_p5), %vm6812_vm7, %v6811_v0 }
0x1bf2   : > { %v5212_v47 = vadd.f32 %v6160_v4, %v5171_v59  ;;  %v6163_v40 = vadd.f32 %v6162_v8, %v6161_v7  ;;  %v6184_v48 = vpop.f32.mrb[103].mxu0  ;;  %6466 = vmatpush3.bf16.msra.mxu0 (!%p5959_p5), %v6754_v63  ;;  %v6755_v4 = vld [vmem:[%s7908_s30 + $0x8] sm:$0xff] (!%p5959_p5)   ;;  %v5960_v7 = vld [vmem:[%s7909_s21] ss:$0 sm:$0xff] (!%p5959_p5) }
0x1bf3   : > { %v6185_v52 = vadd.f32 %v6184_v48, %v6183_v2  ;;  %6467 = vmatprep.subr.bf16.mxu0 (!%p5959_p5), %v6811_v0 }
0x1bf4   : > { %v5253_v53 = vadd.f32 %v6182_v13, %v5212_v47  ;;  %v5215_v61 = vadd.f32 %v6163_v40, %v5174_v46 }
0x1bf6   : > { %v5256_v43 = vadd.f32 %v6185_v52, %v5215_v61  ;;  %6468 = vmatpush3.bf16.msra.mxu0 (!%p5959_p5), %v6755_v4 }
0x1c0e   : > { %v6202_v49 = vpop.f32.mrb[100].mxu1 }
0x1c0f   : > { %v6224_v3 = vpop.f32.mrb[104].mxu0  ;;  %v6203_v9 = vpop.f32.mrb[101].mxu1 }
0x1c10   : > { %v6204_v10 = vadd.f32 %v6203_v9, %v6202_v49  ;;  %v6225_v14 = vpop.f32.mrb[105].mxu0  ;;  %v6205_v15 = vpop.f32.mrb[102].mxu1 }
0x1c11   : > { %v6226_v17 = vadd.f32 %v6225_v14, %v6224_v3  ;;  %v6227_v18 = vpop.f32.mrb[106].mxu0  ;;  %v6206_v19 = vpop.f32.mrb[103].mxu1 }
0x1c12   : > { %v5294_v20 = vadd.f32 %v6204_v10, %v5253_v53  ;;  %v6207_v21 = vadd.f32 %v6206_v19, %v6205_v15  ;;  %v6228_v24 = vpop.f32.mrb[107].mxu0 }
0x1c13   : > { %v6229_v25 = vadd.f32 %v6228_v24, %v6227_v18 }
0x1c14   : > { %v5335_v26 = vadd.f32 %v6226_v17, %v5294_v20  ;;  %v5297_v27 = vadd.f32 %v6207_v21, %v5256_v43 }
0x1c16   : > { %v5338_v32 = vadd.f32 %v6229_v25, %v5297_v27  ;;  %v5341_v34 = vadd.f32 %v5335_v26, %v7506_v30 }
0x1c18   : > { %v5350_v35 = vadd.f32 %v5956_v31, %v5341_v34  ;;  %v5342_v37 = vadd.f32 %v5338_v32, %v7508_v33 }
0x1c1a   : > { %v5352_v54 = vsel %vm1067_vm2, %v5350_v35, 0.0  ;;  %v5351_v5 = vadd.f32 %v5956_v31, %v5342_v37 }
0x1c1b   : > { %5353 = vadd.xlane.f32.xlu1 %v5352_v54 }
0x1c1c   : > { %v5355_v6 = vsel %vm1067_vm2, %v5351_v5, 0.0 }
0x1c1d   : > { %5356 = vadd.xlane.f32.xlu0 %v5355_v6 }
0x1ca8   : > { %v5354_v57 = vpop.xlane.xlu1 %5353 }
0x1ca9   : > { %v5358_v38 = vmul.f32 0.03125, %v5354_v57 }
0x1caa   : > { %v5357_v41 = vpop.xlane.xlu0 %5356 }
0x1cab   : > { %v5360_v28 = vsub.f32 %v5350_v35, %v5358_v38  ;;  %v5359_v1 = vmul.f32 0.03125, %v5357_v41 }
0x1cad   : > { %v5361_v42 = vsub.f32 %v5351_v5, %v5359_v1  ;;  %v5362_v39 = vmul.f32 %v5360_v28, %v5360_v28 }
0x1caf   : > { %v5364_v30 = vsel %vm1067_vm2, %v5362_v39, 0.0  ;;  %v5363_v50 = vmul.f32 %v5361_v42, %v5361_v42 }
0x1cb0   : > { %5365 = vadd.xlane.f32.xlu1 %v5364_v30 }
0x1cb1   : > { %v5367_v33 = vsel %vm1067_vm2, %v5363_v50, 0.0 }
0x1cb2   : > { %5368 = vadd.xlane.f32.xlu0 %v5367_v33 }
0x1d3d   : > { %v5366_v51 = vpop.xlane.xlu1 %5365 }
0x1d3e   : > { %v5370_v44 = vmul.f32 0.03125, %v5366_v51 }
0x1d3f   : > { %v5369_v11 = vpop.xlane.xlu0 %5368 }
0x1d40   : > { %v5372_v55 = vadd.f32 1e-05, %v5370_v44  ;;  %v5371_v12 = vmul.f32 0.03125, %v5369_v11 }
0x1d42   : > { %6748 = vrsqrt.f32 %v5372_v55  ;;  %v5373_v56 = vadd.f32 1e-05, %v5371_v12 }
0x1d44   : > { %6750 = vrsqrt.f32 %v5373_v56 }
0x1d4c   : > { %v6749_v36 = vpop.eup %6748 }
0x1d4d   : > { %v5376_v45 = vmul.f32 %v6749_v36, %v5360_v28 }
0x1d4e   : > { %v6751_v22 = vpop.eup %6750 }
0x1d4f   : > { %v5385_v58 = vmul.f32 %v5957_v16, %v5376_v45  ;;  %v5377_v59 = vmul.f32 %v6751_v22, %v5361_v42  ;;  %5401 = sbr.rel (%p5959_p5) target bundleno = 7728 (0x1e30), region = 124 }
0x1d51   : > { %v5394_v60 = vadd.f32 %v5958_v23, %v5385_v58  ;;  %v5386_v46 = vmul.f32 %v5957_v16, %v5377_v59 }
0x1d53   : > { %5396 = vst.msk [vmem:[#allocation2] sm:$0xff] %vm1067_vm2, %v5394_v60  ;;  %v5395_v62 = vadd.f32 %v5958_v23, %v5386_v46 }
0x1d55   : > { %5397 = vst.msk [vmem:[#allocation2 + $0x8] sm:$0xff] %vm1067_vm2, %v5395_v62  ;;  %v5402_v29 = vpack.c.bf16 (!%p5959_p5), %v5395_v62, %v5394_v60 }
0x1d57   : > { %6470 = vmatmul.mubr.msk.bf16.vlgmr.msra.gmra.mrb[0].mxu0 %vm1067_vm2, %v5402_v29 }
0x1e2a   : > { %v5463_v13 = vpop.f32.mrb[0].mxu0 }
0x1e2b   : > { %v5464_v2 = vadd.f32 %v5960_v7, %v5463_v13  ;;  %v6471_v8 = vpop.f32.mrb[1].mxu0 }
0x1e2c   : > { %v5466_v47 = vpop.f32.mrb[2].mxu0 }
0x1e2d   : > { %5470 = vst [vmem:[#allocation3] sm:$0xff] %v5464_v2  ;;  %v5467_v40 = vadd.f32 %v5960_v7, %v5466_v47  ;;  %v6472_v48 = vpop.f32.mrb[3].mxu0 }
0x1e2f   : > { %5471 = vst [vmem:[#allocation3 + $0x8] sm:$0xff] %v5467_v40 }
0x1e30 PF: > { %s7910_s7 = sld [smem:[#allocation7_spill]]  ;;  %s6813_s12 = smov [#allocation3]  }
0x1e31   : > { %s5478_s8 = sshll.u32 %s6813_s12, 4  ;;  %s5479_s8 = int_to_ptr.vmem [resolvable:$true] %s5478_s8 }
0x1e32   : > { %s6756_s23 = scalar_lea.vmem %s5479_s8, 256  ;;  %p6763_p10 = scmp.lt.s32.totalorder %s5479_s8, %s5479_s8 }
0x1e33   : > { %p6757_p7 = scmp.ne.s32.totalorder %s5479_s8, %s6756_s23  ;;  %p6764_p11 = scmp.lt.s32.totalorder %s6756_s23, %s6756_s23 }
0x1e35   : > { %p6765_p12 = por %p6764_p11, %p6763_p10 }
0x1e36   : > { %p6477_p6 = scmp.eq.s32.totalorder %s7910_s7, 1 }
0x1e38   : > { %p6758_p8 = pnand %p6757_p7, %p6477_p6 }
0x1e3a   : > { %p6759_p9 = pneg %p6758_p8 }
0x1e3c   : > { %p6766_p13 = pnand %p6765_p12, %p6759_p9 }
0x1e3e   : > { %6769 = shalt.err (!%p6766_p13)
}
0x1e3f   : > { %s7911_s6 = sld [smem:[#allocation27_spill]] }
0x1e45   : > { %s6770_s2 = scalar_lea.hbm %s7911_s6, 256 }
0x1e46   : > { %p6771_p0 = scmp.ne.s32.totalorder %s7911_s6, %s6770_s2  ;;  %p6776_p3 = scmp.lt.u32.totalorder %s6770_s2, %s7911_s6 }
0x1e48   : > { %p6772_p1 = pnand %p6771_p0, %p6477_p6 }
0x1e4a   : > { %p6773_p2 = pneg %p6772_p1 }
0x1e4c   : > { %p6778_p4 = pnand %p6776_p3, %p6773_p2 }
0x1e4e   : > { %6781 = shalt.err (!%p6778_p4)
}
0x1e4f   : > { %s6814_s10 = smov 128  }
0x1e50   : > { %6474 = dma.vmem_to_hbm [thread:$0]  (%p6477_p6), %s5479_s8, 256, %s7911_s6, [#allocation4], %s6814_s10, %s6814_s10, %s6807_s25  }
0x1e51   : > { %6787 = dma.done.wait (%p6477_p6), [#allocation4], 256  }
0x1e52   : > { %6789 = vsyncadd (%p6477_p6), [#allocation4], 4294967040 }
0x1e53 PF: > { %s7912_s3 = sld [smem:[#allocation6_spill]] }
0x1e59   : > { %s35_s5 = sadd.s32 1, %s7912_s3  }
0x1e5a   : > { %p32_p5 = scmp.ge.s32.totalorder %s35_s5, 4  }
0x1e5c   :  { %34 = sbr.rel (!%p32_p5) target bundleno = 19 (0x13), region = 208 }
0x1e63   :  { %5494 = vsyncpa [#allocation4], 1 }
0x1e64   :  { %5496 = vsyncpa [#allocation4 + $0x1], 1 }

</bundles_post_ra>
